<compile_context>
chip_gen: v6e
topology: v6e:2x2x1
jax: 0.10.0
libtpu: 0.0.40
codegen_flags: <defaults>
</compile_context>

<pallas_src>
import functools
import math

import jax
import jax.numpy as jnp
from jax.experimental import pallas as pl
from jax.experimental.pallas import tpu as pltpu

LN_EPS = 1e-12       # HF BertLayerNorm eps
LANE = 128           # lane width used to pad the classifier output


# ------------------------------ fused kernel --------------------------------


def _bert_kernel(
    emb_ref, mask_ref,
    emb_ln_g_ref, emb_ln_b_ref,
    wqkv_ref, bqkv_ref, wo_ref, bo_ref, ln1g_ref, ln1b_ref,
    wi_ref, bi_ref, wf_ref, bf_ref, ln2g_ref, ln2b_ref,
    pool_w_ref, pool_b_ref, cls_w_ref, cls_b_ref,
    out_ref,
    *, B, S, NH, DH, L,
):
    H = NH * DH

    def layernorm(x, g, b):
        mu = jnp.mean(x, axis=-1, keepdims=True)
        d = x - mu
        var = jnp.mean(d * d, axis=-1, keepdims=True)
        return d * jax.lax.rsqrt(var + LN_EPS) * g + b

    def dense(x_f32, w_bf16, b_f32):
        return (
            jnp.dot(x_f32.astype(jnp.bfloat16), w_bf16,
                    preferred_element_type=jnp.float32)
            + b_f32
        )

    # --- embeddings: sum was computed outside (gather glue); LayerNorm here ---
    h = layernorm(emb_ref[...], emb_ln_g_ref[...], emb_ln_b_ref[...])   # [M, H] f32

    mask = mask_ref[...]                                                # [B, S] additive
    scale = 1.0 / math.sqrt(DH)
    c_gelu = math.sqrt(2.0 / math.pi)

    # --- encoder layers (statically unrolled) ---
    for l in range(L):
        # fused QKV projection: [M, H] x [H, 3H]
        qkv = dense(h, wqkv_ref[l], bqkv_ref[l])                        # [M, 3H] f32
        q = (qkv[:, 0:H] * scale).astype(jnp.bfloat16)                  # scale folded into q
        k = qkv[:, H:2 * H].astype(jnp.bfloat16)
        v = qkv[:, 2 * H:3 * H].astype(jnp.bfloat16)

        # per-(batch, head) attention; heads are contiguous 32-lane slices
        ctx_rows = []
        for b in range(B):
            mrow = mask[b:b + 1, :]                                     # [1, S]
            head_blocks = []
            for hh in range(NH):
                qs = q[b * S:(b + 1) * S, hh * DH:(hh + 1) * DH]        # [S, DH]
                ks = k[b * S:(b + 1) * S, hh * DH:(hh + 1) * DH]
                vs = v[b * S:(b + 1) * S, hh * DH:(hh + 1) * DH]
                s = jnp.dot(qs, ks.T, preferred_element_type=jnp.float32) + mrow
                s = s - jnp.max(s, axis=-1, keepdims=True)
                p = jnp.exp(s)
                inv = pl.reciprocal(jnp.sum(p, axis=-1, keepdims=True), approx=True)
                c = jnp.dot(p.astype(jnp.bfloat16), vs,
                            preferred_element_type=jnp.float32) * inv   # [S, DH]
                head_blocks.append(c)
            ctx_rows.append(jnp.concatenate(head_blocks, axis=-1))      # [S, H] lane-dense
        ctx = jnp.concatenate(ctx_rows, axis=0)                         # [M, H]

        # attention output projection + residual LayerNorm
        attn_out = dense(ctx, wo_ref[l], bo_ref[l])
        h1 = layernorm(attn_out + h, ln1g_ref[l], ln1b_ref[l])

        # FFN: intermediate (GELU) + output, fused with the second residual LayerNorm
        inter = dense(h1, wi_ref[l], bi_ref[l])                         # [M, I] f32
        # TODO(synk): HF BERT uses the exact erf-based GELU; tanh approximation is used
        # here for clean EUP lowering inside the Pallas kernel.
        inter = 0.5 * inter * (1.0 + jnp.tanh(c_gelu * (inter + 0.044715 * inter * inter * inter)))
        ffn_out = dense(inter, wf_ref[l], bf_ref[l])
        h = layernorm(ffn_out + h1, ln2g_ref[l], ln2b_ref[l])

    # --- pooler (tanh dense on [CLS] tokens) + classifier, lane-padded logits ---
    cls = jnp.concatenate([h[b * S:b * S + 1, :] for b in range(B)], axis=0)   # [B, H]
    pooled = jnp.tanh(dense(cls, pool_w_ref[...], pool_b_ref[...]))            # [B, H]
    # dropout(pooled): identity in eval mode
    logits = dense(pooled, cls_w_ref[...], cls_b_ref[...])                     # [B, LANE]
    out_ref[...] = logits.astype(out_ref.dtype)


def _spec(shape):
    n = len(shape)
    return pl.BlockSpec(shape, lambda i, _n=n: (0,) * _n)


# ------------------------------ model glue ----------------------------------

CFG = dict(
    vocab=512,        # vocab_size
    hidden=128,       # hidden_size
    layers=2,         # num_hidden_layers
    heads=4,          # num_attention_heads
    inter=512,        # intermediate_size
    max_pos=64,       # max_position_embeddings
    types=2,          # type_vocab_size
    labels=2,         # num_labels
    init_std=0.02,    # initializer_range
)


def init_params(key, cfg):
    std = cfg["init_std"]
    H, I = cfg["hidden"], cfg["inter"]
    ks = iter(jax.random.split(key, 64))

    def nrm(shape):
        return std * jax.random.normal(next(ks), shape, jnp.float32)

    params = {
        "word_emb": nrm((cfg["vocab"], H)),
        "pos_emb": nrm((cfg["max_pos"], H)),
        "type_emb": nrm((cfg["types"], H)),
        "emb_ln_g": jnp.ones((H,), jnp.float32),
        "emb_ln_b": jnp.zeros((H,), jnp.float32),
        "layers": [],
        "pool_w": nrm((H, H)),
        "pool_b": jnp.zeros((H,), jnp.float32),
        # classifier init per init_bert_weights: uniform(-std, std), zero bias
        "cls_w": jax.random.uniform(
            next(ks), (H, cfg["labels"]), jnp.float32, minval=-std, maxval=std
        ),
        "cls_b": jnp.zeros((cfg["labels"],), jnp.float32),
    }
    for _ in range(cfg["layers"]):
        params["layers"].append(
            {
                "q_w": nrm((H, H)), "q_b": jnp.zeros((H,), jnp.float32),
                "k_w": nrm((H, H)), "k_b": jnp.zeros((H,), jnp.float32),
                "v_w": nrm((H, H)), "v_b": jnp.zeros((H,), jnp.float32),
                "o_w": nrm((H, H)), "o_b": jnp.zeros((H,), jnp.float32),
                "attn_ln_g": jnp.ones((H,), jnp.float32),
                "attn_ln_b": jnp.zeros((H,), jnp.float32),
                "i_w": nrm((H, I)), "i_b": jnp.zeros((I,), jnp.float32),
                "f_w": nrm((I, H)), "f_b": jnp.zeros((H,), jnp.float32),
                "out_ln_g": jnp.ones((H,), jnp.float32),
                "out_ln_b": jnp.zeros((H,), jnp.float32),
            }
        )
    return params


def pack_params(params, cfg):
    """One-time repack: stack layer weights, fuse QKV, cast matmul weights to bf16,
    lane-pad the classifier. Biases / LayerNorm params stay f32."""
    NL = cfg["labels"]
    H = cfg["hidden"]
    lys = params["layers"]

    wqkv = jnp.stack(
        [jnp.concatenate([ly["q_w"], ly["k_w"], ly["v_w"]], axis=1) for ly in lys]
    ).astype(jnp.bfloat16)                                                    # [L, H, 3H]
    bqkv = jnp.stack(
        [jnp.concatenate([ly["q_b"], ly["k_b"], ly["v_b"]])[None, :] for ly in lys]
    )                                                                         # [L, 1, 3H]

    packed = dict(
        word_emb=params["word_emb"],
        pos_emb=params["pos_emb"],
        type_emb=params["type_emb"],
        emb_ln_g=params["emb_ln_g"][None, :],
        emb_ln_b=params["emb_ln_b"][None, :],
        wqkv=wqkv, bqkv=bqkv,
        wo=jnp.stack([ly["o_w"] for ly in lys]).astype(jnp.bfloat16),
        bo=jnp.stack([ly["o_b"][None, :] for ly in lys]),
        ln1g=jnp.stack([ly["attn_ln_g"][None, :] for ly in lys]),
        ln1b=jnp.stack([ly["attn_ln_b"][None, :] for ly in lys]),
        wi=jnp.stack([ly["i_w"] for ly in lys]).astype(jnp.bfloat16),
        bi=jnp.stack([ly["i_b"][None, :] for ly in lys]),
        wf=jnp.stack([ly["f_w"] for ly in lys]).astype(jnp.bfloat16),
        bff=jnp.stack([ly["f_b"][None, :] for ly in lys]),
        ln2g=jnp.stack([ly["out_ln_g"][None, :] for ly in lys]),
        ln2b=jnp.stack([ly["out_ln_b"][None, :] for ly in lys]),
        pool_w=params["pool_w"].astype(jnp.bfloat16),
        pool_b=params["pool_b"][None, :],
        cls_w=jnp.zeros((H, LANE), jnp.float32).at[:, :NL].set(params["cls_w"]).astype(jnp.bfloat16),
        cls_b=jnp.zeros((1, LANE), jnp.float32).at[0, :NL].set(params["cls_b"]),
    )
    return packed


def bert_cls_forward(packed, cfg, input_ids, token_type_ids=None,
                     attention_mask=None, label=None):
    """Mirrors BertHFForSequenceClassification.forward (eval mode: dropout = identity)."""
    B, S = input_ids.shape
    H, NH, L, I = cfg["hidden"], cfg["heads"], cfg["layers"], cfg["inter"]
    DH = H // NH
    M = B * S

    if token_type_ids is None:
        token_type_ids = jnp.zeros_like(input_ids)
    if attention_mask is None:
        attention_mask = jnp.ones_like(input_ids)

    # embedding gathers are integer indexing glue (no clean Pallas gather needed here)
    pos_ids = jnp.arange(S, dtype=jnp.int32)
    we = jnp.take(packed["word_emb"], input_ids, axis=0)                 # [B, S, H]
    pe = jnp.take(packed["pos_emb"], pos_ids, axis=0)[None, :, :]        # [1, S, H]
    te = jnp.take(packed["type_emb"], token_type_ids, axis=0)            # [B, S, H]
    emb_sum = (we + pe + te).reshape(M, H)

    # extended attention mask (additive): 0 for keep, -1e4 for masked keys
    add_mask = (1.0 - attention_mask.astype(jnp.float32)) * -10000.0     # [B, S]

    kernel = functools.partial(_bert_kernel, B=B, S=S, NH=NH, DH=DH, L=L)

    logits_pad = pl.pallas_call(
        kernel,
        grid=(1,),
        out_shape=jax.ShapeDtypeStruct((B, LANE), jnp.float32),
        in_specs=[
            _spec((M, H)), _spec((B, S)),
            _spec((1, H)), _spec((1, H)),
            _spec((L, H, 3 * H)), _spec((L, 1, 3 * H)),
            _spec((L, H, H)), _spec((L, 1, H)),
            _spec((L, 1, H)), _spec((L, 1, H)),
            _spec((L, H, I)), _spec((L, 1, I)),
            _spec((L, I, H)), _spec((L, 1, H)),
            _spec((L, 1, H)), _spec((L, 1, H)),
            _spec((H, H)), _spec((1, H)),
            _spec((H, LANE)), _spec((1, LANE)),
        ],
        out_specs=_spec((B, LANE)),
        compiler_params=pltpu.CompilerParams(dimension_semantics=("arbitrary",)),
    )(
        emb_sum, add_mask,
        packed["emb_ln_g"], packed["emb_ln_b"],
        packed["wqkv"], packed["bqkv"], packed["wo"], packed["bo"],
        packed["ln1g"], packed["ln1b"],
        packed["wi"], packed["bi"], packed["wf"], packed["bff"],
        packed["ln2g"], packed["ln2b"],
        packed["pool_w"], packed["pool_b"], packed["cls_w"], packed["cls_b"],
    )

    logits = logits_pad[:, : cfg["labels"]]                              # [B, num_labels]

    if label is not None:
        # CrossEntropyLoss (mean reduction) on tiny [B, num_labels] -> plain JAX glue
        logp = jax.nn.log_softmax(logits, axis=-1)
        loss = -jnp.mean(jnp.take_along_axis(logp, label[:, None], axis=1))
        return loss, logits  # eval-mode path of the PyTorch module
    return logits


# --------------------------------- main --------------------------------------

if __name__ == "__main__":
    key = jax.random.PRNGKey(0)
    pkey, ikey = jax.random.split(key)
    params = init_params(pkey, CFG)
    packed = pack_params(params, CFG)

    B, S = 2, 8
    input_ids = jax.random.randint(ikey, (B, S), 0, CFG["vocab"], dtype=jnp.int32)
    token_type_ids = jnp.concatenate(
        [jnp.zeros((B, S // 2), jnp.int32), jnp.ones((B, S // 2), jnp.int32)], axis=1
    )
    attention_mask = jnp.ones((B, S), jnp.int32).at[1, 6:].set(0)
    label = jnp.array([0, 1], jnp.int32)

    logits = bert_cls_forward(packed, CFG, input_ids, token_type_ids, attention_mask)
    loss, logits_l = bert_cls_forward(
        packed, CFG, input_ids, token_type_ids, attention_mask, label=label
    )
    jax.block_until_ready((logits, loss, logits_l))

    assert logits.shape == (B, CFG["labels"])
    assert loss.shape == ()
    print("KERNEL_OK")
</pallas_src>

<mosaic_0001>
module attributes {stable_mosaic.version = 11 : i64} {
  func.func @_bert_kernel(%arg0: i32, %arg1: memref<16x128xf32, #tpu.memory_space<vmem>>, %arg2: memref<2x8xf32, #tpu.memory_space<vmem>>, %arg3: memref<1x128xf32, #tpu.memory_space<vmem>>, %arg4: memref<1x128xf32, #tpu.memory_space<vmem>>, %arg5: memref<2x128x384xbf16, #tpu.memory_space<vmem>>, %arg6: memref<2x1x384xf32, #tpu.memory_space<vmem>>, %arg7: memref<2x128x128xbf16, #tpu.memory_space<vmem>>, %arg8: memref<2x1x128xf32, #tpu.memory_space<vmem>>, %arg9: memref<2x1x128xf32, #tpu.memory_space<vmem>>, %arg10: memref<2x1x128xf32, #tpu.memory_space<vmem>>, %arg11: memref<2x128x512xbf16, #tpu.memory_space<vmem>>, %arg12: memref<2x1x512xf32, #tpu.memory_space<vmem>>, %arg13: memref<2x512x128xbf16, #tpu.memory_space<vmem>>, %arg14: memref<2x1x128xf32, #tpu.memory_space<vmem>>, %arg15: memref<2x1x128xf32, #tpu.memory_space<vmem>>, %arg16: memref<2x1x128xf32, #tpu.memory_space<vmem>>, %arg17: memref<128x128xbf16, #tpu.memory_space<vmem>>, %arg18: memref<1x128xf32, #tpu.memory_space<vmem>>, %arg19: memref<128x128xbf16, #tpu.memory_space<vmem>>, %arg20: memref<1x128xf32, #tpu.memory_space<vmem>>, %arg21: memref<2x128xf32, #tpu.memory_space<vmem>>) attributes {dimension_semantics = [#tpu.dimension_semantics<arbitrary>], iteration_bounds = array<i64: 1>, scalar_prefetch = 0 : i64, scratch_operands = 0 : i64, tpu.core_type = #tpu.core_type<tc>, window_params = [{pipeline_mode = #tpu.pipeline_mode<synchronous>, transform_indices = @transform_0, window_bounds = array<i64: 16, 128>}, {pipeline_mode = #tpu.pipeline_mode<synchronous>, transform_indices = @transform_1, window_bounds = array<i64: 2, 8>}, {pipeline_mode = #tpu.pipeline_mode<synchronous>, transform_indices = @transform_2, window_bounds = array<i64: 1, 128>}, {pipeline_mode = #tpu.pipeline_mode<synchronous>, transform_indices = @transform_3, window_bounds = array<i64: 1, 128>}, {pipeline_mode = #tpu.pipeline_mode<synchronous>, transform_indices = @transform_4, window_bounds = array<i64: 2, 128, 384>}, {pipeline_mode = #tpu.pipeline_mode<synchronous>, transform_indices = @transform_5, window_bounds = array<i64: 2, 1, 384>}, {pipeline_mode = #tpu.pipeline_mode<synchronous>, transform_indices = @transform_6, window_bounds = array<i64: 2, 128, 128>}, {pipeline_mode = #tpu.pipeline_mode<synchronous>, transform_indices = @transform_7, window_bounds = array<i64: 2, 1, 128>}, {pipeline_mode = #tpu.pipeline_mode<synchronous>, transform_indices = @transform_8, window_bounds = array<i64: 2, 1, 128>}, {pipeline_mode = #tpu.pipeline_mode<synchronous>, transform_indices = @transform_9, window_bounds = array<i64: 2, 1, 128>}, {pipeline_mode = #tpu.pipeline_mode<synchronous>, transform_indices = @transform_10, window_bounds = array<i64: 2, 128, 512>}, {pipeline_mode = #tpu.pipeline_mode<synchronous>, transform_indices = @transform_11, window_bounds = array<i64: 2, 1, 512>}, {pipeline_mode = #tpu.pipeline_mode<synchronous>, transform_indices = @transform_12, window_bounds = array<i64: 2, 512, 128>}, {pipeline_mode = #tpu.pipeline_mode<synchronous>, transform_indices = @transform_13, window_bounds = array<i64: 2, 1, 128>}, {pipeline_mode = #tpu.pipeline_mode<synchronous>, transform_indices = @transform_14, window_bounds = array<i64: 2, 1, 128>}, {pipeline_mode = #tpu.pipeline_mode<synchronous>, transform_indices = @transform_15, window_bounds = array<i64: 2, 1, 128>}, {pipeline_mode = #tpu.pipeline_mode<synchronous>, transform_indices = @transform_16, window_bounds = array<i64: 128, 128>}, {pipeline_mode = #tpu.pipeline_mode<synchronous>, transform_indices = @transform_17, window_bounds = array<i64: 1, 128>}, {pipeline_mode = #tpu.pipeline_mode<synchronous>, transform_indices = @transform_18, window_bounds = array<i64: 128, 128>}, {pipeline_mode = #tpu.pipeline_mode<synchronous>, transform_indices = @transform_19, window_bounds = array<i64: 1, 128>}, {pipeline_mode = #tpu.pipeline_mode<synchronous>, transform_indices = @transform_20, window_bounds = array<i64: 2, 128>}]} {
    %c0 = arith.constant 0 : index
    %c0_0 = arith.constant 0 : index
    %0 = vector.load %arg1[%c0, %c0_0] : memref<16x128xf32, #tpu.memory_space<vmem>>, vector<16x128xf32>
    %c0_1 = arith.constant 0 : index
    %c0_2 = arith.constant 0 : index
    %1 = vector.load %arg3[%c0_1, %c0_2] : memref<1x128xf32, #tpu.memory_space<vmem>>, vector<1x128xf32>
    %c0_3 = arith.constant 0 : index
    %c0_4 = arith.constant 0 : index
    %2 = vector.load %arg4[%c0_3, %c0_4] : memref<1x128xf32, #tpu.memory_space<vmem>>, vector<1x128xf32>
    %cst = arith.constant dense<0.000000e+00> : vector<16xf32>
    %3 = vector.multi_reduction <add>, %0, %cst [1] : vector<16x128xf32> to vector<16xf32>
    %4 = vector.shape_cast %3 : vector<16xf32> to vector<16x1xf32>
    %cst_5 = arith.constant 1.280000e+02 : f32
    %5 = vector.broadcast %cst_5 : f32 to vector<16x1xf32>
    %6 = arith.divf %4, %5 : vector<16x1xf32>
    %7 = vector.broadcast %6 : vector<16x1xf32> to vector<16x128xf32>
    %8 = arith.subf %0, %7 : vector<16x128xf32>
    %9 = arith.mulf %8, %8 : vector<16x128xf32>
    %cst_6 = arith.constant dense<0.000000e+00> : vector<16xf32>
    %10 = vector.multi_reduction <add>, %9, %cst_6 [1] : vector<16x128xf32> to vector<16xf32>
    %11 = vector.shape_cast %10 : vector<16xf32> to vector<16x1xf32>
    %cst_7 = arith.constant 1.280000e+02 : f32
    %12 = vector.broadcast %cst_7 : f32 to vector<16x1xf32>
    %13 = arith.divf %11, %12 : vector<16x1xf32>
    %cst_8 = arith.constant 9.99999996E-13 : f32
    %14 = vector.broadcast %cst_8 : f32 to vector<16x1xf32>
    %15 = arith.addf %13, %14 : vector<16x1xf32>
    %16 = math.rsqrt %15 : vector<16x1xf32>
    %17 = vector.broadcast %16 : vector<16x1xf32> to vector<16x128xf32>
    %18 = arith.mulf %8, %17 : vector<16x128xf32>
    %19 = vector.broadcast %1 : vector<1x128xf32> to vector<16x128xf32>
    %20 = arith.mulf %18, %19 : vector<16x128xf32>
    %21 = vector.broadcast %2 : vector<1x128xf32> to vector<16x128xf32>
    %22 = arith.addf %20, %21 : vector<16x128xf32>
    %c0_9 = arith.constant 0 : index
    %c0_10 = arith.constant 0 : index
    %23 = vector.load %arg2[%c0_9, %c0_10] : memref<2x8xf32, #tpu.memory_space<vmem>>, vector<2x8xf32>
    %c0_11 = arith.constant 0 : index
    %c0_12 = arith.constant 0 : index
    %c0_13 = arith.constant 0 : index
    %24 = vector.load %arg5[%c0_11, %c0_12, %c0_13] : memref<2x128x384xbf16, #tpu.memory_space<vmem>>, vector<1x128x384xbf16>
    %25 = vector.shape_cast %24 : vector<1x128x384xbf16> to vector<128x384xbf16>
    %c0_14 = arith.constant 0 : index
    %c0_15 = arith.constant 0 : index
    %c0_16 = arith.constant 0 : index
    %26 = vector.load %arg6[%c0_14, %c0_15, %c0_16] : memref<2x1x384xf32, #tpu.memory_space<vmem>>, vector<1x1x384xf32>
    %27 = vector.shape_cast %26 : vector<1x1x384xf32> to vector<1x384xf32>
    %28 = arith.truncf %22 : vector<16x128xf32> to vector<16x128xbf16>
    %cst_17 = arith.constant dense<0.000000e+00> : vector<16x384xf32>
    %29 = tpu.matmul %28, %25, %cst_17 {dimension_numbers = #tpu.dot_dimension_numbers<[1], [0], [0], [1], [0, 0, 1, 1], [], []>} : vector<16x128xbf16>, vector<128x384xbf16>, vector<16x384xf32> -> vector<16x384xf32>
    %30 = vector.broadcast %27 : vector<1x384xf32> to vector<16x384xf32>
    %31 = arith.addf %29, %30 : vector<16x384xf32>
    %32 = vector.extract_strided_slice %31 {offsets = [0, 0], sizes = [16, 128], strides = [1, 1]} : vector<16x384xf32> to vector<16x128xf32>
    %cst_18 = arith.constant 0.176776692 : f32
    %33 = vector.broadcast %cst_18 : f32 to vector<16x128xf32>
    %34 = arith.mulf %32, %33 : vector<16x128xf32>
    %35 = arith.truncf %34 : vector<16x128xf32> to vector<16x128xbf16>
    %36 = vector.extract_strided_slice %31 {offsets = [0, 128], sizes = [16, 128], strides = [1, 1]} : vector<16x384xf32> to vector<16x128xf32>
    %37 = arith.truncf %36 : vector<16x128xf32> to vector<16x128xbf16>
    %38 = vector.extract_strided_slice %31 {offsets = [0, 256], sizes = [16, 128], strides = [1, 1]} : vector<16x384xf32> to vector<16x128xf32>
    %39 = arith.truncf %38 : vector<16x128xf32> to vector<16x128xbf16>
    %40 = vector.extract_strided_slice %23 {offsets = [0, 0], sizes = [1, 8], strides = [1, 1]} : vector<2x8xf32> to vector<1x8xf32>
    %41 = vector.extract_strided_slice %35 {offsets = [0, 0], sizes = [8, 32], strides = [1, 1]} : vector<16x128xbf16> to vector<8x32xbf16>
    %42 = vector.extract_strided_slice %37 {offsets = [0, 0], sizes = [8, 32], strides = [1, 1]} : vector<16x128xbf16> to vector<8x32xbf16>
    %43 = vector.extract_strided_slice %39 {offsets = [0, 0], sizes = [8, 32], strides = [1, 1]} : vector<16x128xbf16> to vector<8x32xbf16>
    %44 = tpu.transpose %42, [1, 0] : vector<8x32xbf16> -> vector<32x8xbf16>
    %cst_19 = arith.constant dense<0.000000e+00> : vector<8x8xf32>
    %45 = tpu.matmul %41, %44, %cst_19 {dimension_numbers = #tpu.dot_dimension_numbers<[1], [0], [0], [1], [0, 0, 1, 1], [], []>} : vector<8x32xbf16>, vector<32x8xbf16>, vector<8x8xf32> -> vector<8x8xf32>
    %46 = vector.broadcast %40 : vector<1x8xf32> to vector<8x8xf32>
    %47 = arith.addf %45, %46 : vector<8x8xf32>
    %cst_20 = arith.constant dense<0xFF800000> : vector<8xf32>
    %48 = vector.multi_reduction <maximumf>, %47, %cst_20 [1] : vector<8x8xf32> to vector<8xf32>
    %49 = vector.shape_cast %48 : vector<8xf32> to vector<8x1xf32>
    %50 = vector.broadcast %49 : vector<8x1xf32> to vector<8x8xf32>
    %51 = arith.subf %47, %50 : vector<8x8xf32>
    %52 = math.exp %51 : vector<8x8xf32>
    %cst_21 = arith.constant dense<0.000000e+00> : vector<8xf32>
    %53 = vector.multi_reduction <add>, %52, %cst_21 [1] : vector<8x8xf32> to vector<8xf32>
    %54 = vector.shape_cast %53 : vector<8xf32> to vector<8x1xf32>
    %55 = tpu.reciprocal %54 {approx = true} : vector<8x1xf32> -> vector<8x1xf32>
    %56 = arith.truncf %52 : vector<8x8xf32> to vector<8x8xbf16>
    %cst_22 = arith.constant dense<0.000000e+00> : vector<8x32xf32>
    %57 = tpu.matmul %56, %43, %cst_22 {dimension_numbers = #tpu.dot_dimension_numbers<[1], [0], [0], [1], [0, 0, 1, 1], [], []>} : vector<8x8xbf16>, vector<8x32xbf16>, vector<8x32xf32> -> vector<8x32xf32>
    %58 = vector.broadcast %55 : vector<8x1xf32> to vector<8x32xf32>
    %59 = arith.mulf %57, %58 : vector<8x32xf32>
    %60 = vector.extract_strided_slice %35 {offsets = [0, 32], sizes = [8, 32], strides = [1, 1]} : vector<16x128xbf16> to vector<8x32xbf16>
    %61 = vector.extract_strided_slice %37 {offsets = [0, 32], sizes = [8, 32], strides = [1, 1]} : vector<16x128xbf16> to vector<8x32xbf16>
    %62 = vector.extract_strided_slice %39 {offsets = [0, 32], sizes = [8, 32], strides = [1, 1]} : vector<16x128xbf16> to vector<8x32xbf16>
    %63 = tpu.transpose %61, [1, 0] : vector<8x32xbf16> -> vector<32x8xbf16>
    %cst_23 = arith.constant dense<0.000000e+00> : vector<8x8xf32>
    %64 = tpu.matmul %60, %63, %cst_23 {dimension_numbers = #tpu.dot_dimension_numbers<[1], [0], [0], [1], [0, 0, 1, 1], [], []>} : vector<8x32xbf16>, vector<32x8xbf16>, vector<8x8xf32> -> vector<8x8xf32>
    %65 = vector.broadcast %40 : vector<1x8xf32> to vector<8x8xf32>
    %66 = arith.addf %64, %65 : vector<8x8xf32>
    %cst_24 = arith.constant dense<0xFF800000> : vector<8xf32>
    %67 = vector.multi_reduction <maximumf>, %66, %cst_24 [1] : vector<8x8xf32> to vector<8xf32>
    %68 = vector.shape_cast %67 : vector<8xf32> to vector<8x1xf32>
    %69 = vector.broadcast %68 : vector<8x1xf32> to vector<8x8xf32>
    %70 = arith.subf %66, %69 : vector<8x8xf32>
    %71 = math.exp %70 : vector<8x8xf32>
    %cst_25 = arith.constant dense<0.000000e+00> : vector<8xf32>
    %72 = vector.multi_reduction <add>, %71, %cst_25 [1] : vector<8x8xf32> to vector<8xf32>
    %73 = vector.shape_cast %72 : vector<8xf32> to vector<8x1xf32>
    %74 = tpu.reciprocal %73 {approx = true} : vector<8x1xf32> -> vector<8x1xf32>
    %75 = arith.truncf %71 : vector<8x8xf32> to vector<8x8xbf16>
    %cst_26 = arith.constant dense<0.000000e+00> : vector<8x32xf32>
    %76 = tpu.matmul %75, %62, %cst_26 {dimension_numbers = #tpu.dot_dimension_numbers<[1], [0], [0], [1], [0, 0, 1, 1], [], []>} : vector<8x8xbf16>, vector<8x32xbf16>, vector<8x32xf32> -> vector<8x32xf32>
    %77 = vector.broadcast %74 : vector<8x1xf32> to vector<8x32xf32>
    %78 = arith.mulf %76, %77 : vector<8x32xf32>
    %79 = vector.extract_strided_slice %35 {offsets = [0, 64], sizes = [8, 32], strides = [1, 1]} : vector<16x128xbf16> to vector<8x32xbf16>
    %80 = vector.extract_strided_slice %37 {offsets = [0, 64], sizes = [8, 32], strides = [1, 1]} : vector<16x128xbf16> to vector<8x32xbf16>
    %81 = vector.extract_strided_slice %39 {offsets = [0, 64], sizes = [8, 32], strides = [1, 1]} : vector<16x128xbf16> to vector<8x32xbf16>
    %82 = tpu.transpose %80, [1, 0] : vector<8x32xbf16> -> vector<32x8xbf16>
    %cst_27 = arith.constant dense<0.000000e+00> : vector<8x8xf32>
    %83 = tpu.matmul %79, %82, %cst_27 {dimension_numbers = #tpu.dot_dimension_numbers<[1], [0], [0], [1], [0, 0, 1, 1], [], []>} : vector<8x32xbf16>, vector<32x8xbf16>, vector<8x8xf32> -> vector<8x8xf32>
    %84 = vector.broadcast %40 : vector<1x8xf32> to vector<8x8xf32>
    %85 = arith.addf %83, %84 : vector<8x8xf32>
    %cst_28 = arith.constant dense<0xFF800000> : vector<8xf32>
    %86 = vector.multi_reduction <maximumf>, %85, %cst_28 [1] : vector<8x8xf32> to vector<8xf32>
    %87 = vector.shape_cast %86 : vector<8xf32> to vector<8x1xf32>
    %88 = vector.broadcast %87 : vector<8x1xf32> to vector<8x8xf32>
    %89 = arith.subf %85, %88 : vector<8x8xf32>
    %90 = math.exp %89 : vector<8x8xf32>
    %cst_29 = arith.constant dense<0.000000e+00> : vector<8xf32>
    %91 = vector.multi_reduction <add>, %90, %cst_29 [1] : vector<8x8xf32> to vector<8xf32>
    %92 = vector.shape_cast %91 : vector<8xf32> to vector<8x1xf32>
    %93 = tpu.reciprocal %92 {approx = true} : vector<8x1xf32> -> vector<8x1xf32>
    %94 = arith.truncf %90 : vector<8x8xf32> to vector<8x8xbf16>
    %cst_30 = arith.constant dense<0.000000e+00> : vector<8x32xf32>
    %95 = tpu.matmul %94, %81, %cst_30 {dimension_numbers = #tpu.dot_dimension_numbers<[1], [0], [0], [1], [0, 0, 1, 1], [], []>} : vector<8x8xbf16>, vector<8x32xbf16>, vector<8x32xf32> -> vector<8x32xf32>
    %96 = vector.broadcast %93 : vector<8x1xf32> to vector<8x32xf32>
    %97 = arith.mulf %95, %96 : vector<8x32xf32>
    %98 = vector.extract_strided_slice %35 {offsets = [0, 96], sizes = [8, 32], strides = [1, 1]} : vector<16x128xbf16> to vector<8x32xbf16>
    %99 = vector.extract_strided_slice %37 {offsets = [0, 96], sizes = [8, 32], strides = [1, 1]} : vector<16x128xbf16> to vector<8x32xbf16>
    %100 = vector.extract_strided_slice %39 {offsets = [0, 96], sizes = [8, 32], strides = [1, 1]} : vector<16x128xbf16> to vector<8x32xbf16>
    %101 = tpu.transpose %99, [1, 0] : vector<8x32xbf16> -> vector<32x8xbf16>
    %cst_31 = arith.constant dense<0.000000e+00> : vector<8x8xf32>
    %102 = tpu.matmul %98, %101, %cst_31 {dimension_numbers = #tpu.dot_dimension_numbers<[1], [0], [0], [1], [0, 0, 1, 1], [], []>} : vector<8x32xbf16>, vector<32x8xbf16>, vector<8x8xf32> -> vector<8x8xf32>
    %103 = vector.broadcast %40 : vector<1x8xf32> to vector<8x8xf32>
    %104 = arith.addf %102, %103 : vector<8x8xf32>
    %cst_32 = arith.constant dense<0xFF800000> : vector<8xf32>
    %105 = vector.multi_reduction <maximumf>, %104, %cst_32 [1] : vector<8x8xf32> to vector<8xf32>
    %106 = vector.shape_cast %105 : vector<8xf32> to vector<8x1xf32>
    %107 = vector.broadcast %106 : vector<8x1xf32> to vector<8x8xf32>
    %108 = arith.subf %104, %107 : vector<8x8xf32>
    %109 = math.exp %108 : vector<8x8xf32>
    %cst_33 = arith.constant dense<0.000000e+00> : vector<8xf32>
    %110 = vector.multi_reduction <add>, %109, %cst_33 [1] : vector<8x8xf32> to vector<8xf32>
    %111 = vector.shape_cast %110 : vector<8xf32> to vector<8x1xf32>
    %112 = tpu.reciprocal %111 {approx = true} : vector<8x1xf32> -> vector<8x1xf32>
    %113 = arith.truncf %109 : vector<8x8xf32> to vector<8x8xbf16>
    %cst_34 = arith.constant dense<0.000000e+00> : vector<8x32xf32>
    %114 = tpu.matmul %113, %100, %cst_34 {dimension_numbers = #tpu.dot_dimension_numbers<[1], [0], [0], [1], [0, 0, 1, 1], [], []>} : vector<8x8xbf16>, vector<8x32xbf16>, vector<8x32xf32> -> vector<8x32xf32>
    %115 = vector.broadcast %112 : vector<8x1xf32> to vector<8x32xf32>
    %116 = arith.mulf %114, %115 : vector<8x32xf32>
    %117 = tpu.concatenate %59, %78, %97, %116 in 1 : vector<8x32xf32>, vector<8x32xf32>, vector<8x32xf32>, vector<8x32xf32> -> vector<8x128xf32>
    %118 = vector.extract_strided_slice %23 {offsets = [1, 0], sizes = [1, 8], strides = [1, 1]} : vector<2x8xf32> to vector<1x8xf32>
    %119 = vector.extract_strided_slice %35 {offsets = [8, 0], sizes = [8, 32], strides = [1, 1]} : vector<16x128xbf16> to vector<8x32xbf16>
    %120 = vector.extract_strided_slice %37 {offsets = [8, 0], sizes = [8, 32], strides = [1, 1]} : vector<16x128xbf16> to vector<8x32xbf16>
    %121 = vector.extract_strided_slice %39 {offsets = [8, 0], sizes = [8, 32], strides = [1, 1]} : vector<16x128xbf16> to vector<8x32xbf16>
    %122 = tpu.transpose %120, [1, 0] : vector<8x32xbf16> -> vector<32x8xbf16>
    %cst_35 = arith.constant dense<0.000000e+00> : vector<8x8xf32>
    %123 = tpu.matmul %119, %122, %cst_35 {dimension_numbers = #tpu.dot_dimension_numbers<[1], [0], [0], [1], [0, 0, 1, 1], [], []>} : vector<8x32xbf16>, vector<32x8xbf16>, vector<8x8xf32> -> vector<8x8xf32>
    %124 = vector.broadcast %118 : vector<1x8xf32> to vector<8x8xf32>
    %125 = arith.addf %123, %124 : vector<8x8xf32>
    %cst_36 = arith.constant dense<0xFF800000> : vector<8xf32>
    %126 = vector.multi_reduction <maximumf>, %125, %cst_36 [1] : vector<8x8xf32> to vector<8xf32>
    %127 = vector.shape_cast %126 : vector<8xf32> to vector<8x1xf32>
    %128 = vector.broadcast %127 : vector<8x1xf32> to vector<8x8xf32>
    %129 = arith.subf %125, %128 : vector<8x8xf32>
    %130 = math.exp %129 : vector<8x8xf32>
    %cst_37 = arith.constant dense<0.000000e+00> : vector<8xf32>
    %131 = vector.multi_reduction <add>, %130, %cst_37 [1] : vector<8x8xf32> to vector<8xf32>
    %132 = vector.shape_cast %131 : vector<8xf32> to vector<8x1xf32>
    %133 = tpu.reciprocal %132 {approx = true} : vector<8x1xf32> -> vector<8x1xf32>
    %134 = arith.truncf %130 : vector<8x8xf32> to vector<8x8xbf16>
    %cst_38 = arith.constant dense<0.000000e+00> : vector<8x32xf32>
    %135 = tpu.matmul %134, %121, %cst_38 {dimension_numbers = #tpu.dot_dimension_numbers<[1], [0], [0], [1], [0, 0, 1, 1], [], []>} : vector<8x8xbf16>, vector<8x32xbf16>, vector<8x32xf32> -> vector<8x32xf32>
    %136 = vector.broadcast %133 : vector<8x1xf32> to vector<8x32xf32>
    %137 = arith.mulf %135, %136 : vector<8x32xf32>
    %138 = vector.extract_strided_slice %35 {offsets = [8, 32], sizes = [8, 32], strides = [1, 1]} : vector<16x128xbf16> to vector<8x32xbf16>
    %139 = vector.extract_strided_slice %37 {offsets = [8, 32], sizes = [8, 32], strides = [1, 1]} : vector<16x128xbf16> to vector<8x32xbf16>
    %140 = vector.extract_strided_slice %39 {offsets = [8, 32], sizes = [8, 32], strides = [1, 1]} : vector<16x128xbf16> to vector<8x32xbf16>
    %141 = tpu.transpose %139, [1, 0] : vector<8x32xbf16> -> vector<32x8xbf16>
    %cst_39 = arith.constant dense<0.000000e+00> : vector<8x8xf32>
    %142 = tpu.matmul %138, %141, %cst_39 {dimension_numbers = #tpu.dot_dimension_numbers<[1], [0], [0], [1], [0, 0, 1, 1], [], []>} : vector<8x32xbf16>, vector<32x8xbf16>, vector<8x8xf32> -> vector<8x8xf32>
    %143 = vector.broadcast %118 : vector<1x8xf32> to vector<8x8xf32>
    %144 = arith.addf %142, %143 : vector<8x8xf32>
    %cst_40 = arith.constant dense<0xFF800000> : vector<8xf32>
    %145 = vector.multi_reduction <maximumf>, %144, %cst_40 [1] : vector<8x8xf32> to vector<8xf32>
    %146 = vector.shape_cast %145 : vector<8xf32> to vector<8x1xf32>
    %147 = vector.broadcast %146 : vector<8x1xf32> to vector<8x8xf32>
    %148 = arith.subf %144, %147 : vector<8x8xf32>
    %149 = math.exp %148 : vector<8x8xf32>
    %cst_41 = arith.constant dense<0.000000e+00> : vector<8xf32>
    %150 = vector.multi_reduction <add>, %149, %cst_41 [1] : vector<8x8xf32> to vector<8xf32>
    %151 = vector.shape_cast %150 : vector<8xf32> to vector<8x1xf32>
    %152 = tpu.reciprocal %151 {approx = true} : vector<8x1xf32> -> vector<8x1xf32>
    %153 = arith.truncf %149 : vector<8x8xf32> to vector<8x8xbf16>
    %cst_42 = arith.constant dense<0.000000e+00> : vector<8x32xf32>
    %154 = tpu.matmul %153, %140, %cst_42 {dimension_numbers = #tpu.dot_dimension_numbers<[1], [0], [0], [1], [0, 0, 1, 1], [], []>} : vector<8x8xbf16>, vector<8x32xbf16>, vector<8x32xf32> -> vector<8x32xf32>
    %155 = vector.broadcast %152 : vector<8x1xf32> to vector<8x32xf32>
    %156 = arith.mulf %154, %155 : vector<8x32xf32>
    %157 = vector.extract_strided_slice %35 {offsets = [8, 64], sizes = [8, 32], strides = [1, 1]} : vector<16x128xbf16> to vector<8x32xbf16>
    %158 = vector.extract_strided_slice %37 {offsets = [8, 64], sizes = [8, 32], strides = [1, 1]} : vector<16x128xbf16> to vector<8x32xbf16>
    %159 = vector.extract_strided_slice %39 {offsets = [8, 64], sizes = [8, 32], strides = [1, 1]} : vector<16x128xbf16> to vector<8x32xbf16>
    %160 = tpu.transpose %158, [1, 0] : vector<8x32xbf16> -> vector<32x8xbf16>
    %cst_43 = arith.constant dense<0.000000e+00> : vector<8x8xf32>
    %161 = tpu.matmul %157, %160, %cst_43 {dimension_numbers = #tpu.dot_dimension_numbers<[1], [0], [0], [1], [0, 0, 1, 1], [], []>} : vector<8x32xbf16>, vector<32x8xbf16>, vector<8x8xf32> -> vector<8x8xf32>
    %162 = vector.broadcast %118 : vector<1x8xf32> to vector<8x8xf32>
    %163 = arith.addf %161, %162 : vector<8x8xf32>
    %cst_44 = arith.constant dense<0xFF800000> : vector<8xf32>
    %164 = vector.multi_reduction <maximumf>, %163, %cst_44 [1] : vector<8x8xf32> to vector<8xf32>
    %165 = vector.shape_cast %164 : vector<8xf32> to vector<8x1xf32>
    %166 = vector.broadcast %165 : vector<8x1xf32> to vector<8x8xf32>
    %167 = arith.subf %163, %166 : vector<8x8xf32>
    %168 = math.exp %167 : vector<8x8xf32>
    %cst_45 = arith.constant dense<0.000000e+00> : vector<8xf32>
    %169 = vector.multi_reduction <add>, %168, %cst_45 [1] : vector<8x8xf32> to vector<8xf32>
    %170 = vector.shape_cast %169 : vector<8xf32> to vector<8x1xf32>
    %171 = tpu.reciprocal %170 {approx = true} : vector<8x1xf32> -> vector<8x1xf32>
    %172 = arith.truncf %168 : vector<8x8xf32> to vector<8x8xbf16>
    %cst_46 = arith.constant dense<0.000000e+00> : vector<8x32xf32>
    %173 = tpu.matmul %172, %159, %cst_46 {dimension_numbers = #tpu.dot_dimension_numbers<[1], [0], [0], [1], [0, 0, 1, 1], [], []>} : vector<8x8xbf16>, vector<8x32xbf16>, vector<8x32xf32> -> vector<8x32xf32>
    %174 = vector.broadcast %171 : vector<8x1xf32> to vector<8x32xf32>
    %175 = arith.mulf %173, %174 : vector<8x32xf32>
    %176 = vector.extract_strided_slice %35 {offsets = [8, 96], sizes = [8, 32], strides = [1, 1]} : vector<16x128xbf16> to vector<8x32xbf16>
    %177 = vector.extract_strided_slice %37 {offsets = [8, 96], sizes = [8, 32], strides = [1, 1]} : vector<16x128xbf16> to vector<8x32xbf16>
    %178 = vector.extract_strided_slice %39 {offsets = [8, 96], sizes = [8, 32], strides = [1, 1]} : vector<16x128xbf16> to vector<8x32xbf16>
    %179 = tpu.transpose %177, [1, 0] : vector<8x32xbf16> -> vector<32x8xbf16>
    %cst_47 = arith.constant dense<0.000000e+00> : vector<8x8xf32>
    %180 = tpu.matmul %176, %179, %cst_47 {dimension_numbers = #tpu.dot_dimension_numbers<[1], [0], [0], [1], [0, 0, 1, 1], [], []>} : vector<8x32xbf16>, vector<32x8xbf16>, vector<8x8xf32> -> vector<8x8xf32>
    %181 = vector.broadcast %118 : vector<1x8xf32> to vector<8x8xf32>
    %182 = arith.addf %180, %181 : vector<8x8xf32>
    %cst_48 = arith.constant dense<0xFF800000> : vector<8xf32>
    %183 = vector.multi_reduction <maximumf>, %182, %cst_48 [1] : vector<8x8xf32> to vector<8xf32>
    %184 = vector.shape_cast %183 : vector<8xf32> to vector<8x1xf32>
    %185 = vector.broadcast %184 : vector<8x1xf32> to vector<8x8xf32>
    %186 = arith.subf %182, %185 : vector<8x8xf32>
    %187 = math.exp %186 : vector<8x8xf32>
    %cst_49 = arith.constant dense<0.000000e+00> : vector<8xf32>
    %188 = vector.multi_reduction <add>, %187, %cst_49 [1] : vector<8x8xf32> to vector<8xf32>
    %189 = vector.shape_cast %188 : vector<8xf32> to vector<8x1xf32>
    %190 = tpu.reciprocal %189 {approx = true} : vector<8x1xf32> -> vector<8x1xf32>
    %191 = arith.truncf %187 : vector<8x8xf32> to vector<8x8xbf16>
    %cst_50 = arith.constant dense<0.000000e+00> : vector<8x32xf32>
    %192 = tpu.matmul %191, %178, %cst_50 {dimension_numbers = #tpu.dot_dimension_numbers<[1], [0], [0], [1], [0, 0, 1, 1], [], []>} : vector<8x8xbf16>, vector<8x32xbf16>, vector<8x32xf32> -> vector<8x32xf32>
    %193 = vector.broadcast %190 : vector<8x1xf32> to vector<8x32xf32>
    %194 = arith.mulf %192, %193 : vector<8x32xf32>
    %195 = tpu.concatenate %137, %156, %175, %194 in 1 : vector<8x32xf32>, vector<8x32xf32>, vector<8x32xf32>, vector<8x32xf32> -> vector<8x128xf32>
    %196 = tpu.concatenate %117, %195 in 0 : vector<8x128xf32>, vector<8x128xf32> -> vector<16x128xf32>
    %c0_51 = arith.constant 0 : index
    %c0_52 = arith.constant 0 : index
    %c0_53 = arith.constant 0 : index
    %197 = vector.load %arg7[%c0_51, %c0_52, %c0_53] : memref<2x128x128xbf16, #tpu.memory_space<vmem>>, vector<1x128x128xbf16>
    %198 = vector.shape_cast %197 : vector<1x128x128xbf16> to vector<128x128xbf16>
    %c0_54 = arith.constant 0 : index
    %c0_55 = arith.constant 0 : index
    %c0_56 = arith.constant 0 : index
    %199 = vector.load %arg8[%c0_54, %c0_55, %c0_56] : memref<2x1x128xf32, #tpu.memory_space<vmem>>, vector<1x1x128xf32>
    %200 = vector.shape_cast %199 : vector<1x1x128xf32> to vector<1x128xf32>
    %201 = arith.truncf %196 : vector<16x128xf32> to vector<16x128xbf16>
    %cst_57 = arith.constant dense<0.000000e+00> : vector<16x128xf32>
    %202 = tpu.matmul %201, %198, %cst_57 {dimension_numbers = #tpu.dot_dimension_numbers<[1], [0], [0], [1], [0, 0, 1, 1], [], []>} : vector<16x128xbf16>, vector<128x128xbf16>, vector<16x128xf32> -> vector<16x128xf32>
    %203 = vector.broadcast %200 : vector<1x128xf32> to vector<16x128xf32>
    %204 = arith.addf %202, %203 : vector<16x128xf32>
    %205 = arith.addf %204, %22 : vector<16x128xf32>
    %c0_58 = arith.constant 0 : index
    %c0_59 = arith.constant 0 : index
    %c0_60 = arith.constant 0 : index
    %206 = vector.load %arg9[%c0_58, %c0_59, %c0_60] : memref<2x1x128xf32, #tpu.memory_space<vmem>>, vector<1x1x128xf32>
    %207 = vector.shape_cast %206 : vector<1x1x128xf32> to vector<1x128xf32>
    %c0_61 = arith.constant 0 : index
    %c0_62 = arith.constant 0 : index
    %c0_63 = arith.constant 0 : index
    %208 = vector.load %arg10[%c0_61, %c0_62, %c0_63] : memref<2x1x128xf32, #tpu.memory_space<vmem>>, vector<1x1x128xf32>
    %209 = vector.shape_cast %208 : vector<1x1x128xf32> to vector<1x128xf32>
    %cst_64 = arith.constant dense<0.000000e+00> : vector<16xf32>
    %210 = vector.multi_reduction <add>, %205, %cst_64 [1] : vector<16x128xf32> to vector<16xf32>
    %211 = vector.shape_cast %210 : vector<16xf32> to vector<16x1xf32>
    %cst_65 = arith.constant 1.280000e+02 : f32
    %212 = vector.broadcast %cst_65 : f32 to vector<16x1xf32>
    %213 = arith.divf %211, %212 : vector<16x1xf32>
    %214 = vector.broadcast %213 : vector<16x1xf32> to vector<16x128xf32>
    %215 = arith.subf %205, %214 : vector<16x128xf32>
    %216 = arith.mulf %215, %215 : vector<16x128xf32>
    %cst_66 = arith.constant dense<0.000000e+00> : vector<16xf32>
    %217 = vector.multi_reduction <add>, %216, %cst_66 [1] : vector<16x128xf32> to vector<16xf32>
    %218 = vector.shape_cast %217 : vector<16xf32> to vector<16x1xf32>
    %cst_67 = arith.constant 1.280000e+02 : f32
    %219 = vector.broadcast %cst_67 : f32 to vector<16x1xf32>
    %220 = arith.divf %218, %219 : vector<16x1xf32>
    %cst_68 = arith.constant 9.99999996E-13 : f32
    %221 = vector.broadcast %cst_68 : f32 to vector<16x1xf32>
    %222 = arith.addf %220, %221 : vector<16x1xf32>
    %223 = math.rsqrt %222 : vector<16x1xf32>
    %224 = vector.broadcast %223 : vector<16x1xf32> to vector<16x128xf32>
    %225 = arith.mulf %215, %224 : vector<16x128xf32>
    %226 = vector.broadcast %207 : vector<1x128xf32> to vector<16x128xf32>
    %227 = arith.mulf %225, %226 : vector<16x128xf32>
    %228 = vector.broadcast %209 : vector<1x128xf32> to vector<16x128xf32>
    %229 = arith.addf %227, %228 : vector<16x128xf32>
    %c0_69 = arith.constant 0 : index
    %c0_70 = arith.constant 0 : index
    %c0_71 = arith.constant 0 : index
    %230 = vector.load %arg11[%c0_69, %c0_70, %c0_71] : memref<2x128x512xbf16, #tpu.memory_space<vmem>>, vector<1x128x512xbf16>
    %231 = vector.shape_cast %230 : vector<1x128x512xbf16> to vector<128x512xbf16>
    %c0_72 = arith.constant 0 : index
    %c0_73 = arith.constant 0 : index
    %c0_74 = arith.constant 0 : index
    %232 = vector.load %arg12[%c0_72, %c0_73, %c0_74] : memref<2x1x512xf32, #tpu.memory_space<vmem>>, vector<1x1x512xf32>
    %233 = vector.shape_cast %232 : vector<1x1x512xf32> to vector<1x512xf32>
    %234 = arith.truncf %229 : vector<16x128xf32> to vector<16x128xbf16>
    %cst_75 = arith.constant dense<0.000000e+00> : vector<16x512xf32>
    %235 = tpu.matmul %234, %231, %cst_75 {dimension_numbers = #tpu.dot_dimension_numbers<[1], [0], [0], [1], [0, 0, 1, 1], [], []>} : vector<16x128xbf16>, vector<128x512xbf16>, vector<16x512xf32> -> vector<16x512xf32>
    %236 = vector.broadcast %233 : vector<1x512xf32> to vector<16x512xf32>
    %237 = arith.addf %235, %236 : vector<16x512xf32>
    %cst_76 = arith.constant 5.000000e-01 : f32
    %238 = vector.broadcast %cst_76 : f32 to vector<16x512xf32>
    %239 = arith.mulf %238, %237 : vector<16x512xf32>
    %cst_77 = arith.constant 4.471500e-02 : f32
    %240 = vector.broadcast %cst_77 : f32 to vector<16x512xf32>
    %241 = arith.mulf %240, %237 : vector<16x512xf32>
    %242 = arith.mulf %241, %237 : vector<16x512xf32>
    %243 = arith.mulf %242, %237 : vector<16x512xf32>
    %244 = arith.addf %237, %243 : vector<16x512xf32>
    %cst_78 = arith.constant 0.797884583 : f32
    %245 = vector.broadcast %cst_78 : f32 to vector<16x512xf32>
    %246 = arith.mulf %245, %244 : vector<16x512xf32>
    %247 = math.tanh %246 : vector<16x512xf32>
    %cst_79 = arith.constant 1.000000e+00 : f32
    %248 = vector.broadcast %cst_79 : f32 to vector<16x512xf32>
    %249 = arith.addf %248, %247 : vector<16x512xf32>
    %250 = arith.mulf %239, %249 : vector<16x512xf32>
    %c0_80 = arith.constant 0 : index
    %c0_81 = arith.constant 0 : index
    %c0_82 = arith.constant 0 : index
    %251 = vector.load %arg13[%c0_80, %c0_81, %c0_82] : memref<2x512x128xbf16, #tpu.memory_space<vmem>>, vector<1x512x128xbf16>
    %252 = vector.shape_cast %251 : vector<1x512x128xbf16> to vector<512x128xbf16>
    %c0_83 = arith.constant 0 : index
    %c0_84 = arith.constant 0 : index
    %c0_85 = arith.constant 0 : index
    %253 = vector.load %arg14[%c0_83, %c0_84, %c0_85] : memref<2x1x128xf32, #tpu.memory_space<vmem>>, vector<1x1x128xf32>
    %254 = vector.shape_cast %253 : vector<1x1x128xf32> to vector<1x128xf32>
    %255 = arith.truncf %250 : vector<16x512xf32> to vector<16x512xbf16>
    %cst_86 = arith.constant dense<0.000000e+00> : vector<16x128xf32>
    %256 = tpu.matmul %255, %252, %cst_86 {dimension_numbers = #tpu.dot_dimension_numbers<[1], [0], [0], [1], [0, 0, 1, 1], [], []>} : vector<16x512xbf16>, vector<512x128xbf16>, vector<16x128xf32> -> vector<16x128xf32>
    %257 = vector.broadcast %254 : vector<1x128xf32> to vector<16x128xf32>
    %258 = arith.addf %256, %257 : vector<16x128xf32>
    %259 = arith.addf %258, %229 : vector<16x128xf32>
    %c0_87 = arith.constant 0 : index
    %c0_88 = arith.constant 0 : index
    %c0_89 = arith.constant 0 : index
    %260 = vector.load %arg15[%c0_87, %c0_88, %c0_89] : memref<2x1x128xf32, #tpu.memory_space<vmem>>, vector<1x1x128xf32>
    %261 = vector.shape_cast %260 : vector<1x1x128xf32> to vector<1x128xf32>
    %c0_90 = arith.constant 0 : index
    %c0_91 = arith.constant 0 : index
    %c0_92 = arith.constant 0 : index
    %262 = vector.load %arg16[%c0_90, %c0_91, %c0_92] : memref<2x1x128xf32, #tpu.memory_space<vmem>>, vector<1x1x128xf32>
    %263 = vector.shape_cast %262 : vector<1x1x128xf32> to vector<1x128xf32>
    %cst_93 = arith.constant dense<0.000000e+00> : vector<16xf32>
    %264 = vector.multi_reduction <add>, %259, %cst_93 [1] : vector<16x128xf32> to vector<16xf32>
    %265 = vector.shape_cast %264 : vector<16xf32> to vector<16x1xf32>
    %cst_94 = arith.constant 1.280000e+02 : f32
    %266 = vector.broadcast %cst_94 : f32 to vector<16x1xf32>
    %267 = arith.divf %265, %266 : vector<16x1xf32>
    %268 = vector.broadcast %267 : vector<16x1xf32> to vector<16x128xf32>
    %269 = arith.subf %259, %268 : vector<16x128xf32>
    %270 = arith.mulf %269, %269 : vector<16x128xf32>
    %cst_95 = arith.constant dense<0.000000e+00> : vector<16xf32>
    %271 = vector.multi_reduction <add>, %270, %cst_95 [1] : vector<16x128xf32> to vector<16xf32>
    %272 = vector.shape_cast %271 : vector<16xf32> to vector<16x1xf32>
    %cst_96 = arith.constant 1.280000e+02 : f32
    %273 = vector.broadcast %cst_96 : f32 to vector<16x1xf32>
    %274 = arith.divf %272, %273 : vector<16x1xf32>
    %cst_97 = arith.constant 9.99999996E-13 : f32
    %275 = vector.broadcast %cst_97 : f32 to vector<16x1xf32>
    %276 = arith.addf %274, %275 : vector<16x1xf32>
    %277 = math.rsqrt %276 : vector<16x1xf32>
    %278 = vector.broadcast %277 : vector<16x1xf32> to vector<16x128xf32>
    %279 = arith.mulf %269, %278 : vector<16x128xf32>
    %280 = vector.broadcast %261 : vector<1x128xf32> to vector<16x128xf32>
    %281 = arith.mulf %279, %280 : vector<16x128xf32>
    %282 = vector.broadcast %263 : vector<1x128xf32> to vector<16x128xf32>
    %283 = arith.addf %281, %282 : vector<16x128xf32>
    %c1 = arith.constant 1 : index
    %c0_98 = arith.constant 0 : index
    %c0_99 = arith.constant 0 : index
    %284 = vector.load %arg5[%c1, %c0_98, %c0_99] : memref<2x128x384xbf16, #tpu.memory_space<vmem>>, vector<1x128x384xbf16>
    %285 = vector.shape_cast %284 : vector<1x128x384xbf16> to vector<128x384xbf16>
    %c1_100 = arith.constant 1 : index
    %c0_101 = arith.constant 0 : index
    %c0_102 = arith.constant 0 : index
    %286 = vector.load %arg6[%c1_100, %c0_101, %c0_102] : memref<2x1x384xf32, #tpu.memory_space<vmem>>, vector<1x1x384xf32>
    %287 = vector.shape_cast %286 : vector<1x1x384xf32> to vector<1x384xf32>
    %288 = arith.truncf %283 : vector<16x128xf32> to vector<16x128xbf16>
    %cst_103 = arith.constant dense<0.000000e+00> : vector<16x384xf32>
    %289 = tpu.matmul %288, %285, %cst_103 {dimension_numbers = #tpu.dot_dimension_numbers<[1], [0], [0], [1], [0, 0, 1, 1], [], []>} : vector<16x128xbf16>, vector<128x384xbf16>, vector<16x384xf32> -> vector<16x384xf32>
    %290 = vector.broadcast %287 : vector<1x384xf32> to vector<16x384xf32>
    %291 = arith.addf %289, %290 : vector<16x384xf32>
    %292 = vector.extract_strided_slice %291 {offsets = [0, 0], sizes = [16, 128], strides = [1, 1]} : vector<16x384xf32> to vector<16x128xf32>
    %cst_104 = arith.constant 0.176776692 : f32
    %293 = vector.broadcast %cst_104 : f32 to vector<16x128xf32>
    %294 = arith.mulf %292, %293 : vector<16x128xf32>
    %295 = arith.truncf %294 : vector<16x128xf32> to vector<16x128xbf16>
    %296 = vector.extract_strided_slice %291 {offsets = [0, 128], sizes = [16, 128], strides = [1, 1]} : vector<16x384xf32> to vector<16x128xf32>
    %297 = arith.truncf %296 : vector<16x128xf32> to vector<16x128xbf16>
    %298 = vector.extract_strided_slice %291 {offsets = [0, 256], sizes = [16, 128], strides = [1, 1]} : vector<16x384xf32> to vector<16x128xf32>
    %299 = arith.truncf %298 : vector<16x128xf32> to vector<16x128xbf16>
    %300 = vector.extract_strided_slice %23 {offsets = [0, 0], sizes = [1, 8], strides = [1, 1]} : vector<2x8xf32> to vector<1x8xf32>
    %301 = vector.extract_strided_slice %295 {offsets = [0, 0], sizes = [8, 32], strides = [1, 1]} : vector<16x128xbf16> to vector<8x32xbf16>
    %302 = vector.extract_strided_slice %297 {offsets = [0, 0], sizes = [8, 32], strides = [1, 1]} : vector<16x128xbf16> to vector<8x32xbf16>
    %303 = vector.extract_strided_slice %299 {offsets = [0, 0], sizes = [8, 32], strides = [1, 1]} : vector<16x128xbf16> to vector<8x32xbf16>
    %304 = tpu.transpose %302, [1, 0] : vector<8x32xbf16> -> vector<32x8xbf16>
    %cst_105 = arith.constant dense<0.000000e+00> : vector<8x8xf32>
    %305 = tpu.matmul %301, %304, %cst_105 {dimension_numbers = #tpu.dot_dimension_numbers<[1], [0], [0], [1], [0, 0, 1, 1], [], []>} : vector<8x32xbf16>, vector<32x8xbf16>, vector<8x8xf32> -> vector<8x8xf32>
    %306 = vector.broadcast %300 : vector<1x8xf32> to vector<8x8xf32>
    %307 = arith.addf %305, %306 : vector<8x8xf32>
    %cst_106 = arith.constant dense<0xFF800000> : vector<8xf32>
    %308 = vector.multi_reduction <maximumf>, %307, %cst_106 [1] : vector<8x8xf32> to vector<8xf32>
    %309 = vector.shape_cast %308 : vector<8xf32> to vector<8x1xf32>
    %310 = vector.broadcast %309 : vector<8x1xf32> to vector<8x8xf32>
    %311 = arith.subf %307, %310 : vector<8x8xf32>
    %312 = math.exp %311 : vector<8x8xf32>
    %cst_107 = arith.constant dense<0.000000e+00> : vector<8xf32>
    %313 = vector.multi_reduction <add>, %312, %cst_107 [1] : vector<8x8xf32> to vector<8xf32>
    %314 = vector.shape_cast %313 : vector<8xf32> to vector<8x1xf32>
    %315 = tpu.reciprocal %314 {approx = true} : vector<8x1xf32> -> vector<8x1xf32>
    %316 = arith.truncf %312 : vector<8x8xf32> to vector<8x8xbf16>
    %cst_108 = arith.constant dense<0.000000e+00> : vector<8x32xf32>
    %317 = tpu.matmul %316, %303, %cst_108 {dimension_numbers = #tpu.dot_dimension_numbers<[1], [0], [0], [1], [0, 0, 1, 1], [], []>} : vector<8x8xbf16>, vector<8x32xbf16>, vector<8x32xf32> -> vector<8x32xf32>
    %318 = vector.broadcast %315 : vector<8x1xf32> to vector<8x32xf32>
    %319 = arith.mulf %317, %318 : vector<8x32xf32>
    %320 = vector.extract_strided_slice %295 {offsets = [0, 32], sizes = [8, 32], strides = [1, 1]} : vector<16x128xbf16> to vector<8x32xbf16>
    %321 = vector.extract_strided_slice %297 {offsets = [0, 32], sizes = [8, 32], strides = [1, 1]} : vector<16x128xbf16> to vector<8x32xbf16>
    %322 = vector.extract_strided_slice %299 {offsets = [0, 32], sizes = [8, 32], strides = [1, 1]} : vector<16x128xbf16> to vector<8x32xbf16>
    %323 = tpu.transpose %321, [1, 0] : vector<8x32xbf16> -> vector<32x8xbf16>
    %cst_109 = arith.constant dense<0.000000e+00> : vector<8x8xf32>
    %324 = tpu.matmul %320, %323, %cst_109 {dimension_numbers = #tpu.dot_dimension_numbers<[1], [0], [0], [1], [0, 0, 1, 1], [], []>} : vector<8x32xbf16>, vector<32x8xbf16>, vector<8x8xf32> -> vector<8x8xf32>
    %325 = vector.broadcast %300 : vector<1x8xf32> to vector<8x8xf32>
    %326 = arith.addf %324, %325 : vector<8x8xf32>
    %cst_110 = arith.constant dense<0xFF800000> : vector<8xf32>
    %327 = vector.multi_reduction <maximumf>, %326, %cst_110 [1] : vector<8x8xf32> to vector<8xf32>
    %328 = vector.shape_cast %327 : vector<8xf32> to vector<8x1xf32>
    %329 = vector.broadcast %328 : vector<8x1xf32> to vector<8x8xf32>
    %330 = arith.subf %326, %329 : vector<8x8xf32>
    %331 = math.exp %330 : vector<8x8xf32>
    %cst_111 = arith.constant dense<0.000000e+00> : vector<8xf32>
    %332 = vector.multi_reduction <add>, %331, %cst_111 [1] : vector<8x8xf32> to vector<8xf32>
    %333 = vector.shape_cast %332 : vector<8xf32> to vector<8x1xf32>
    %334 = tpu.reciprocal %333 {approx = true} : vector<8x1xf32> -> vector<8x1xf32>
    %335 = arith.truncf %331 : vector<8x8xf32> to vector<8x8xbf16>
    %cst_112 = arith.constant dense<0.000000e+00> : vector<8x32xf32>
    %336 = tpu.matmul %335, %322, %cst_112 {dimension_numbers = #tpu.dot_dimension_numbers<[1], [0], [0], [1], [0, 0, 1, 1], [], []>} : vector<8x8xbf16>, vector<8x32xbf16>, vector<8x32xf32> -> vector<8x32xf32>
    %337 = vector.broadcast %334 : vector<8x1xf32> to vector<8x32xf32>
    %338 = arith.mulf %336, %337 : vector<8x32xf32>
    %339 = vector.extract_strided_slice %295 {offsets = [0, 64], sizes = [8, 32], strides = [1, 1]} : vector<16x128xbf16> to vector<8x32xbf16>
    %340 = vector.extract_strided_slice %297 {offsets = [0, 64], sizes = [8, 32], strides = [1, 1]} : vector<16x128xbf16> to vector<8x32xbf16>
    %341 = vector.extract_strided_slice %299 {offsets = [0, 64], sizes = [8, 32], strides = [1, 1]} : vector<16x128xbf16> to vector<8x32xbf16>
    %342 = tpu.transpose %340, [1, 0] : vector<8x32xbf16> -> vector<32x8xbf16>
    %cst_113 = arith.constant dense<0.000000e+00> : vector<8x8xf32>
    %343 = tpu.matmul %339, %342, %cst_113 {dimension_numbers = #tpu.dot_dimension_numbers<[1], [0], [0], [1], [0, 0, 1, 1], [], []>} : vector<8x32xbf16>, vector<32x8xbf16>, vector<8x8xf32> -> vector<8x8xf32>
    %344 = vector.broadcast %300 : vector<1x8xf32> to vector<8x8xf32>
    %345 = arith.addf %343, %344 : vector<8x8xf32>
    %cst_114 = arith.constant dense<0xFF800000> : vector<8xf32>
    %346 = vector.multi_reduction <maximumf>, %345, %cst_114 [1] : vector<8x8xf32> to vector<8xf32>
    %347 = vector.shape_cast %346 : vector<8xf32> to vector<8x1xf32>
    %348 = vector.broadcast %347 : vector<8x1xf32> to vector<8x8xf32>
    %349 = arith.subf %345, %348 : vector<8x8xf32>
    %350 = math.exp %349 : vector<8x8xf32>
    %cst_115 = arith.constant dense<0.000000e+00> : vector<8xf32>
    %351 = vector.multi_reduction <add>, %350, %cst_115 [1] : vector<8x8xf32> to vector<8xf32>
    %352 = vector.shape_cast %351 : vector<8xf32> to vector<8x1xf32>
    %353 = tpu.reciprocal %352 {approx = true} : vector<8x1xf32> -> vector<8x1xf32>
    %354 = arith.truncf %350 : vector<8x8xf32> to vector<8x8xbf16>
    %cst_116 = arith.constant dense<0.000000e+00> : vector<8x32xf32>
    %355 = tpu.matmul %354, %341, %cst_116 {dimension_numbers = #tpu.dot_dimension_numbers<[1], [0], [0], [1], [0, 0, 1, 1], [], []>} : vector<8x8xbf16>, vector<8x32xbf16>, vector<8x32xf32> -> vector<8x32xf32>
    %356 = vector.broadcast %353 : vector<8x1xf32> to vector<8x32xf32>
    %357 = arith.mulf %355, %356 : vector<8x32xf32>
    %358 = vector.extract_strided_slice %295 {offsets = [0, 96], sizes = [8, 32], strides = [1, 1]} : vector<16x128xbf16> to vector<8x32xbf16>
    %359 = vector.extract_strided_slice %297 {offsets = [0, 96], sizes = [8, 32], strides = [1, 1]} : vector<16x128xbf16> to vector<8x32xbf16>
    %360 = vector.extract_strided_slice %299 {offsets = [0, 96], sizes = [8, 32], strides = [1, 1]} : vector<16x128xbf16> to vector<8x32xbf16>
    %361 = tpu.transpose %359, [1, 0] : vector<8x32xbf16> -> vector<32x8xbf16>
    %cst_117 = arith.constant dense<0.000000e+00> : vector<8x8xf32>
    %362 = tpu.matmul %358, %361, %cst_117 {dimension_numbers = #tpu.dot_dimension_numbers<[1], [0], [0], [1], [0, 0, 1, 1], [], []>} : vector<8x32xbf16>, vector<32x8xbf16>, vector<8x8xf32> -> vector<8x8xf32>
    %363 = vector.broadcast %300 : vector<1x8xf32> to vector<8x8xf32>
    %364 = arith.addf %362, %363 : vector<8x8xf32>
    %cst_118 = arith.constant dense<0xFF800000> : vector<8xf32>
    %365 = vector.multi_reduction <maximumf>, %364, %cst_118 [1] : vector<8x8xf32> to vector<8xf32>
    %366 = vector.shape_cast %365 : vector<8xf32> to vector<8x1xf32>
    %367 = vector.broadcast %366 : vector<8x1xf32> to vector<8x8xf32>
    %368 = arith.subf %364, %367 : vector<8x8xf32>
    %369 = math.exp %368 : vector<8x8xf32>
    %cst_119 = arith.constant dense<0.000000e+00> : vector<8xf32>
    %370 = vector.multi_reduction <add>, %369, %cst_119 [1] : vector<8x8xf32> to vector<8xf32>
    %371 = vector.shape_cast %370 : vector<8xf32> to vector<8x1xf32>
    %372 = tpu.reciprocal %371 {approx = true} : vector<8x1xf32> -> vector<8x1xf32>
    %373 = arith.truncf %369 : vector<8x8xf32> to vector<8x8xbf16>
    %cst_120 = arith.constant dense<0.000000e+00> : vector<8x32xf32>
    %374 = tpu.matmul %373, %360, %cst_120 {dimension_numbers = #tpu.dot_dimension_numbers<[1], [0], [0], [1], [0, 0, 1, 1], [], []>} : vector<8x8xbf16>, vector<8x32xbf16>, vector<8x32xf32> -> vector<8x32xf32>
    %375 = vector.broadcast %372 : vector<8x1xf32> to vector<8x32xf32>
    %376 = arith.mulf %374, %375 : vector<8x32xf32>
    %377 = tpu.concatenate %319, %338, %357, %376 in 1 : vector<8x32xf32>, vector<8x32xf32>, vector<8x32xf32>, vector<8x32xf32> -> vector<8x128xf32>
    %378 = vector.extract_strided_slice %23 {offsets = [1, 0], sizes = [1, 8], strides = [1, 1]} : vector<2x8xf32> to vector<1x8xf32>
    %379 = vector.extract_strided_slice %295 {offsets = [8, 0], sizes = [8, 32], strides = [1, 1]} : vector<16x128xbf16> to vector<8x32xbf16>
    %380 = vector.extract_strided_slice %297 {offsets = [8, 0], sizes = [8, 32], strides = [1, 1]} : vector<16x128xbf16> to vector<8x32xbf16>
    %381 = vector.extract_strided_slice %299 {offsets = [8, 0], sizes = [8, 32], strides = [1, 1]} : vector<16x128xbf16> to vector<8x32xbf16>
    %382 = tpu.transpose %380, [1, 0] : vector<8x32xbf16> -> vector<32x8xbf16>
    %cst_121 = arith.constant dense<0.000000e+00> : vector<8x8xf32>
    %383 = tpu.matmul %379, %382, %cst_121 {dimension_numbers = #tpu.dot_dimension_numbers<[1], [0], [0], [1], [0, 0, 1, 1], [], []>} : vector<8x32xbf16>, vector<32x8xbf16>, vector<8x8xf32> -> vector<8x8xf32>
    %384 = vector.broadcast %378 : vector<1x8xf32> to vector<8x8xf32>
    %385 = arith.addf %383, %384 : vector<8x8xf32>
    %cst_122 = arith.constant dense<0xFF800000> : vector<8xf32>
    %386 = vector.multi_reduction <maximumf>, %385, %cst_122 [1] : vector<8x8xf32> to vector<8xf32>
    %387 = vector.shape_cast %386 : vector<8xf32> to vector<8x1xf32>
    %388 = vector.broadcast %387 : vector<8x1xf32> to vector<8x8xf32>
    %389 = arith.subf %385, %388 : vector<8x8xf32>
    %390 = math.exp %389 : vector<8x8xf32>
    %cst_123 = arith.constant dense<0.000000e+00> : vector<8xf32>
    %391 = vector.multi_reduction <add>, %390, %cst_123 [1] : vector<8x8xf32> to vector<8xf32>
    %392 = vector.shape_cast %391 : vector<8xf32> to vector<8x1xf32>
    %393 = tpu.reciprocal %392 {approx = true} : vector<8x1xf32> -> vector<8x1xf32>
    %394 = arith.truncf %390 : vector<8x8xf32> to vector<8x8xbf16>
    %cst_124 = arith.constant dense<0.000000e+00> : vector<8x32xf32>
    %395 = tpu.matmul %394, %381, %cst_124 {dimension_numbers = #tpu.dot_dimension_numbers<[1], [0], [0], [1], [0, 0, 1, 1], [], []>} : vector<8x8xbf16>, vector<8x32xbf16>, vector<8x32xf32> -> vector<8x32xf32>
    %396 = vector.broadcast %393 : vector<8x1xf32> to vector<8x32xf32>
    %397 = arith.mulf %395, %396 : vector<8x32xf32>
    %398 = vector.extract_strided_slice %295 {offsets = [8, 32], sizes = [8, 32], strides = [1, 1]} : vector<16x128xbf16> to vector<8x32xbf16>
    %399 = vector.extract_strided_slice %297 {offsets = [8, 32], sizes = [8, 32], strides = [1, 1]} : vector<16x128xbf16> to vector<8x32xbf16>
    %400 = vector.extract_strided_slice %299 {offsets = [8, 32], sizes = [8, 32], strides = [1, 1]} : vector<16x128xbf16> to vector<8x32xbf16>
    %401 = tpu.transpose %399, [1, 0] : vector<8x32xbf16> -> vector<32x8xbf16>
    %cst_125 = arith.constant dense<0.000000e+00> : vector<8x8xf32>
    %402 = tpu.matmul %398, %401, %cst_125 {dimension_numbers = #tpu.dot_dimension_numbers<[1], [0], [0], [1], [0, 0, 1, 1], [], []>} : vector<8x32xbf16>, vector<32x8xbf16>, vector<8x8xf32> -> vector<8x8xf32>
    %403 = vector.broadcast %378 : vector<1x8xf32> to vector<8x8xf32>
    %404 = arith.addf %402, %403 : vector<8x8xf32>
    %cst_126 = arith.constant dense<0xFF800000> : vector<8xf32>
    %405 = vector.multi_reduction <maximumf>, %404, %cst_126 [1] : vector<8x8xf32> to vector<8xf32>
    %406 = vector.shape_cast %405 : vector<8xf32> to vector<8x1xf32>
    %407 = vector.broadcast %406 : vector<8x1xf32> to vector<8x8xf32>
    %408 = arith.subf %404, %407 : vector<8x8xf32>
    %409 = math.exp %408 : vector<8x8xf32>
    %cst_127 = arith.constant dense<0.000000e+00> : vector<8xf32>
    %410 = vector.multi_reduction <add>, %409, %cst_127 [1] : vector<8x8xf32> to vector<8xf32>
    %411 = vector.shape_cast %410 : vector<8xf32> to vector<8x1xf32>
    %412 = tpu.reciprocal %411 {approx = true} : vector<8x1xf32> -> vector<8x1xf32>
    %413 = arith.truncf %409 : vector<8x8xf32> to vector<8x8xbf16>
    %cst_128 = arith.constant dense<0.000000e+00> : vector<8x32xf32>
    %414 = tpu.matmul %413, %400, %cst_128 {dimension_numbers = #tpu.dot_dimension_numbers<[1], [0], [0], [1], [0, 0, 1, 1], [], []>} : vector<8x8xbf16>, vector<8x32xbf16>, vector<8x32xf32> -> vector<8x32xf32>
    %415 = vector.broadcast %412 : vector<8x1xf32> to vector<8x32xf32>
    %416 = arith.mulf %414, %415 : vector<8x32xf32>
    %417 = vector.extract_strided_slice %295 {offsets = [8, 64], sizes = [8, 32], strides = [1, 1]} : vector<16x128xbf16> to vector<8x32xbf16>
    %418 = vector.extract_strided_slice %297 {offsets = [8, 64], sizes = [8, 32], strides = [1, 1]} : vector<16x128xbf16> to vector<8x32xbf16>
    %419 = vector.extract_strided_slice %299 {offsets = [8, 64], sizes = [8, 32], strides = [1, 1]} : vector<16x128xbf16> to vector<8x32xbf16>
    %420 = tpu.transpose %418, [1, 0] : vector<8x32xbf16> -> vector<32x8xbf16>
    %cst_129 = arith.constant dense<0.000000e+00> : vector<8x8xf32>
    %421 = tpu.matmul %417, %420, %cst_129 {dimension_numbers = #tpu.dot_dimension_numbers<[1], [0], [0], [1], [0, 0, 1, 1], [], []>} : vector<8x32xbf16>, vector<32x8xbf16>, vector<8x8xf32> -> vector<8x8xf32>
    %422 = vector.broadcast %378 : vector<1x8xf32> to vector<8x8xf32>
    %423 = arith.addf %421, %422 : vector<8x8xf32>
    %cst_130 = arith.constant dense<0xFF800000> : vector<8xf32>
    %424 = vector.multi_reduction <maximumf>, %423, %cst_130 [1] : vector<8x8xf32> to vector<8xf32>
    %425 = vector.shape_cast %424 : vector<8xf32> to vector<8x1xf32>
    %426 = vector.broadcast %425 : vector<8x1xf32> to vector<8x8xf32>
    %427 = arith.subf %423, %426 : vector<8x8xf32>
    %428 = math.exp %427 : vector<8x8xf32>
    %cst_131 = arith.constant dense<0.000000e+00> : vector<8xf32>
    %429 = vector.multi_reduction <add>, %428, %cst_131 [1] : vector<8x8xf32> to vector<8xf32>
    %430 = vector.shape_cast %429 : vector<8xf32> to vector<8x1xf32>
    %431 = tpu.reciprocal %430 {approx = true} : vector<8x1xf32> -> vector<8x1xf32>
    %432 = arith.truncf %428 : vector<8x8xf32> to vector<8x8xbf16>
    %cst_132 = arith.constant dense<0.000000e+00> : vector<8x32xf32>
    %433 = tpu.matmul %432, %419, %cst_132 {dimension_numbers = #tpu.dot_dimension_numbers<[1], [0], [0], [1], [0, 0, 1, 1], [], []>} : vector<8x8xbf16>, vector<8x32xbf16>, vector<8x32xf32> -> vector<8x32xf32>
    %434 = vector.broadcast %431 : vector<8x1xf32> to vector<8x32xf32>
    %435 = arith.mulf %433, %434 : vector<8x32xf32>
    %436 = vector.extract_strided_slice %295 {offsets = [8, 96], sizes = [8, 32], strides = [1, 1]} : vector<16x128xbf16> to vector<8x32xbf16>
    %437 = vector.extract_strided_slice %297 {offsets = [8, 96], sizes = [8, 32], strides = [1, 1]} : vector<16x128xbf16> to vector<8x32xbf16>
    %438 = vector.extract_strided_slice %299 {offsets = [8, 96], sizes = [8, 32], strides = [1, 1]} : vector<16x128xbf16> to vector<8x32xbf16>
    %439 = tpu.transpose %437, [1, 0] : vector<8x32xbf16> -> vector<32x8xbf16>
    %cst_133 = arith.constant dense<0.000000e+00> : vector<8x8xf32>
    %440 = tpu.matmul %436, %439, %cst_133 {dimension_numbers = #tpu.dot_dimension_numbers<[1], [0], [0], [1], [0, 0, 1, 1], [], []>} : vector<8x32xbf16>, vector<32x8xbf16>, vector<8x8xf32> -> vector<8x8xf32>
    %441 = vector.broadcast %378 : vector<1x8xf32> to vector<8x8xf32>
    %442 = arith.addf %440, %441 : vector<8x8xf32>
    %cst_134 = arith.constant dense<0xFF800000> : vector<8xf32>
    %443 = vector.multi_reduction <maximumf>, %442, %cst_134 [1] : vector<8x8xf32> to vector<8xf32>
    %444 = vector.shape_cast %443 : vector<8xf32> to vector<8x1xf32>
    %445 = vector.broadcast %444 : vector<8x1xf32> to vector<8x8xf32>
    %446 = arith.subf %442, %445 : vector<8x8xf32>
    %447 = math.exp %446 : vector<8x8xf32>
    %cst_135 = arith.constant dense<0.000000e+00> : vector<8xf32>
    %448 = vector.multi_reduction <add>, %447, %cst_135 [1] : vector<8x8xf32> to vector<8xf32>
    %449 = vector.shape_cast %448 : vector<8xf32> to vector<8x1xf32>
    %450 = tpu.reciprocal %449 {approx = true} : vector<8x1xf32> -> vector<8x1xf32>
    %451 = arith.truncf %447 : vector<8x8xf32> to vector<8x8xbf16>
    %cst_136 = arith.constant dense<0.000000e+00> : vector<8x32xf32>
    %452 = tpu.matmul %451, %438, %cst_136 {dimension_numbers = #tpu.dot_dimension_numbers<[1], [0], [0], [1], [0, 0, 1, 1], [], []>} : vector<8x8xbf16>, vector<8x32xbf16>, vector<8x32xf32> -> vector<8x32xf32>
    %453 = vector.broadcast %450 : vector<8x1xf32> to vector<8x32xf32>
    %454 = arith.mulf %452, %453 : vector<8x32xf32>
    %455 = tpu.concatenate %397, %416, %435, %454 in 1 : vector<8x32xf32>, vector<8x32xf32>, vector<8x32xf32>, vector<8x32xf32> -> vector<8x128xf32>
    %456 = tpu.concatenate %377, %455 in 0 : vector<8x128xf32>, vector<8x128xf32> -> vector<16x128xf32>
    %c1_137 = arith.constant 1 : index
    %c0_138 = arith.constant 0 : index
    %c0_139 = arith.constant 0 : index
    %457 = vector.load %arg7[%c1_137, %c0_138, %c0_139] : memref<2x128x128xbf16, #tpu.memory_space<vmem>>, vector<1x128x128xbf16>
    %458 = vector.shape_cast %457 : vector<1x128x128xbf16> to vector<128x128xbf16>
    %c1_140 = arith.constant 1 : index
    %c0_141 = arith.constant 0 : index
    %c0_142 = arith.constant 0 : index
    %459 = vector.load %arg8[%c1_140, %c0_141, %c0_142] : memref<2x1x128xf32, #tpu.memory_space<vmem>>, vector<1x1x128xf32>
    %460 = vector.shape_cast %459 : vector<1x1x128xf32> to vector<1x128xf32>
    %461 = arith.truncf %456 : vector<16x128xf32> to vector<16x128xbf16>
    %cst_143 = arith.constant dense<0.000000e+00> : vector<16x128xf32>
    %462 = tpu.matmul %461, %458, %cst_143 {dimension_numbers = #tpu.dot_dimension_numbers<[1], [0], [0], [1], [0, 0, 1, 1], [], []>} : vector<16x128xbf16>, vector<128x128xbf16>, vector<16x128xf32> -> vector<16x128xf32>
    %463 = vector.broadcast %460 : vector<1x128xf32> to vector<16x128xf32>
    %464 = arith.addf %462, %463 : vector<16x128xf32>
    %465 = arith.addf %464, %283 : vector<16x128xf32>
    %c1_144 = arith.constant 1 : index
    %c0_145 = arith.constant 0 : index
    %c0_146 = arith.constant 0 : index
    %466 = vector.load %arg9[%c1_144, %c0_145, %c0_146] : memref<2x1x128xf32, #tpu.memory_space<vmem>>, vector<1x1x128xf32>
    %467 = vector.shape_cast %466 : vector<1x1x128xf32> to vector<1x128xf32>
    %c1_147 = arith.constant 1 : index
    %c0_148 = arith.constant 0 : index
    %c0_149 = arith.constant 0 : index
    %468 = vector.load %arg10[%c1_147, %c0_148, %c0_149] : memref<2x1x128xf32, #tpu.memory_space<vmem>>, vector<1x1x128xf32>
    %469 = vector.shape_cast %468 : vector<1x1x128xf32> to vector<1x128xf32>
    %cst_150 = arith.constant dense<0.000000e+00> : vector<16xf32>
    %470 = vector.multi_reduction <add>, %465, %cst_150 [1] : vector<16x128xf32> to vector<16xf32>
    %471 = vector.shape_cast %470 : vector<16xf32> to vector<16x1xf32>
    %cst_151 = arith.constant 1.280000e+02 : f32
    %472 = vector.broadcast %cst_151 : f32 to vector<16x1xf32>
    %473 = arith.divf %471, %472 : vector<16x1xf32>
    %474 = vector.broadcast %473 : vector<16x1xf32> to vector<16x128xf32>
    %475 = arith.subf %465, %474 : vector<16x128xf32>
    %476 = arith.mulf %475, %475 : vector<16x128xf32>
    %cst_152 = arith.constant dense<0.000000e+00> : vector<16xf32>
    %477 = vector.multi_reduction <add>, %476, %cst_152 [1] : vector<16x128xf32> to vector<16xf32>
    %478 = vector.shape_cast %477 : vector<16xf32> to vector<16x1xf32>
    %cst_153 = arith.constant 1.280000e+02 : f32
    %479 = vector.broadcast %cst_153 : f32 to vector<16x1xf32>
    %480 = arith.divf %478, %479 : vector<16x1xf32>
    %cst_154 = arith.constant 9.99999996E-13 : f32
    %481 = vector.broadcast %cst_154 : f32 to vector<16x1xf32>
    %482 = arith.addf %480, %481 : vector<16x1xf32>
    %483 = math.rsqrt %482 : vector<16x1xf32>
    %484 = vector.broadcast %483 : vector<16x1xf32> to vector<16x128xf32>
    %485 = arith.mulf %475, %484 : vector<16x128xf32>
    %486 = vector.broadcast %467 : vector<1x128xf32> to vector<16x128xf32>
    %487 = arith.mulf %485, %486 : vector<16x128xf32>
    %488 = vector.broadcast %469 : vector<1x128xf32> to vector<16x128xf32>
    %489 = arith.addf %487, %488 : vector<16x128xf32>
    %c1_155 = arith.constant 1 : index
    %c0_156 = arith.constant 0 : index
    %c0_157 = arith.constant 0 : index
    %490 = vector.load %arg11[%c1_155, %c0_156, %c0_157] : memref<2x128x512xbf16, #tpu.memory_space<vmem>>, vector<1x128x512xbf16>
    %491 = vector.shape_cast %490 : vector<1x128x512xbf16> to vector<128x512xbf16>
    %c1_158 = arith.constant 1 : index
    %c0_159 = arith.constant 0 : index
    %c0_160 = arith.constant 0 : index
    %492 = vector.load %arg12[%c1_158, %c0_159, %c0_160] : memref<2x1x512xf32, #tpu.memory_space<vmem>>, vector<1x1x512xf32>
    %493 = vector.shape_cast %492 : vector<1x1x512xf32> to vector<1x512xf32>
    %494 = arith.truncf %489 : vector<16x128xf32> to vector<16x128xbf16>
    %cst_161 = arith.constant dense<0.000000e+00> : vector<16x512xf32>
    %495 = tpu.matmul %494, %491, %cst_161 {dimension_numbers = #tpu.dot_dimension_numbers<[1], [0], [0], [1], [0, 0, 1, 1], [], []>} : vector<16x128xbf16>, vector<128x512xbf16>, vector<16x512xf32> -> vector<16x512xf32>
    %496 = vector.broadcast %493 : vector<1x512xf32> to vector<16x512xf32>
    %497 = arith.addf %495, %496 : vector<16x512xf32>
    %cst_162 = arith.constant 5.000000e-01 : f32
    %498 = vector.broadcast %cst_162 : f32 to vector<16x512xf32>
    %499 = arith.mulf %498, %497 : vector<16x512xf32>
    %cst_163 = arith.constant 4.471500e-02 : f32
    %500 = vector.broadcast %cst_163 : f32 to vector<16x512xf32>
    %501 = arith.mulf %500, %497 : vector<16x512xf32>
    %502 = arith.mulf %501, %497 : vector<16x512xf32>
    %503 = arith.mulf %502, %497 : vector<16x512xf32>
    %504 = arith.addf %497, %503 : vector<16x512xf32>
    %cst_164 = arith.constant 0.797884583 : f32
    %505 = vector.broadcast %cst_164 : f32 to vector<16x512xf32>
    %506 = arith.mulf %505, %504 : vector<16x512xf32>
    %507 = math.tanh %506 : vector<16x512xf32>
    %cst_165 = arith.constant 1.000000e+00 : f32
    %508 = vector.broadcast %cst_165 : f32 to vector<16x512xf32>
    %509 = arith.addf %508, %507 : vector<16x512xf32>
    %510 = arith.mulf %499, %509 : vector<16x512xf32>
    %c1_166 = arith.constant 1 : index
    %c0_167 = arith.constant 0 : index
    %c0_168 = arith.constant 0 : index
    %511 = vector.load %arg13[%c1_166, %c0_167, %c0_168] : memref<2x512x128xbf16, #tpu.memory_space<vmem>>, vector<1x512x128xbf16>
    %512 = vector.shape_cast %511 : vector<1x512x128xbf16> to vector<512x128xbf16>
    %c1_169 = arith.constant 1 : index
    %c0_170 = arith.constant 0 : index
    %c0_171 = arith.constant 0 : index
    %513 = vector.load %arg14[%c1_169, %c0_170, %c0_171] : memref<2x1x128xf32, #tpu.memory_space<vmem>>, vector<1x1x128xf32>
    %514 = vector.shape_cast %513 : vector<1x1x128xf32> to vector<1x128xf32>
    %515 = arith.truncf %510 : vector<16x512xf32> to vector<16x512xbf16>
    %cst_172 = arith.constant dense<0.000000e+00> : vector<16x128xf32>
    %516 = tpu.matmul %515, %512, %cst_172 {dimension_numbers = #tpu.dot_dimension_numbers<[1], [0], [0], [1], [0, 0, 1, 1], [], []>} : vector<16x512xbf16>, vector<512x128xbf16>, vector<16x128xf32> -> vector<16x128xf32>
    %517 = vector.broadcast %514 : vector<1x128xf32> to vector<16x128xf32>
    %518 = arith.addf %516, %517 : vector<16x128xf32>
    %519 = arith.addf %518, %489 : vector<16x128xf32>
    %c1_173 = arith.constant 1 : index
    %c0_174 = arith.constant 0 : index
    %c0_175 = arith.constant 0 : index
    %520 = vector.load %arg15[%c1_173, %c0_174, %c0_175] : memref<2x1x128xf32, #tpu.memory_space<vmem>>, vector<1x1x128xf32>
    %521 = vector.shape_cast %520 : vector<1x1x128xf32> to vector<1x128xf32>
    %c1_176 = arith.constant 1 : index
    %c0_177 = arith.constant 0 : index
    %c0_178 = arith.constant 0 : index
    %522 = vector.load %arg16[%c1_176, %c0_177, %c0_178] : memref<2x1x128xf32, #tpu.memory_space<vmem>>, vector<1x1x128xf32>
    %523 = vector.shape_cast %522 : vector<1x1x128xf32> to vector<1x128xf32>
    %cst_179 = arith.constant dense<0.000000e+00> : vector<16xf32>
    %524 = vector.multi_reduction <add>, %519, %cst_179 [1] : vector<16x128xf32> to vector<16xf32>
    %525 = vector.shape_cast %524 : vector<16xf32> to vector<16x1xf32>
    %cst_180 = arith.constant 1.280000e+02 : f32
    %526 = vector.broadcast %cst_180 : f32 to vector<16x1xf32>
    %527 = arith.divf %525, %526 : vector<16x1xf32>
    %528 = vector.broadcast %527 : vector<16x1xf32> to vector<16x128xf32>
    %529 = arith.subf %519, %528 : vector<16x128xf32>
    %530 = arith.mulf %529, %529 : vector<16x128xf32>
    %cst_181 = arith.constant dense<0.000000e+00> : vector<16xf32>
    %531 = vector.multi_reduction <add>, %530, %cst_181 [1] : vector<16x128xf32> to vector<16xf32>
    %532 = vector.shape_cast %531 : vector<16xf32> to vector<16x1xf32>
    %cst_182 = arith.constant 1.280000e+02 : f32
    %533 = vector.broadcast %cst_182 : f32 to vector<16x1xf32>
    %534 = arith.divf %532, %533 : vector<16x1xf32>
    %cst_183 = arith.constant 9.99999996E-13 : f32
    %535 = vector.broadcast %cst_183 : f32 to vector<16x1xf32>
    %536 = arith.addf %534, %535 : vector<16x1xf32>
    %537 = math.rsqrt %536 : vector<16x1xf32>
    %538 = vector.broadcast %537 : vector<16x1xf32> to vector<16x128xf32>
    %539 = arith.mulf %529, %538 : vector<16x128xf32>
    %540 = vector.broadcast %521 : vector<1x128xf32> to vector<16x128xf32>
    %541 = arith.mulf %539, %540 : vector<16x128xf32>
    %542 = vector.broadcast %523 : vector<1x128xf32> to vector<16x128xf32>
    %543 = arith.addf %541, %542 : vector<16x128xf32>
    %544 = vector.extract_strided_slice %543 {offsets = [0, 0], sizes = [1, 128], strides = [1, 1]} : vector<16x128xf32> to vector<1x128xf32>
    %545 = vector.extract_strided_slice %543 {offsets = [8, 0], sizes = [1, 128], strides = [1, 1]} : vector<16x128xf32> to vector<1x128xf32>
    %546 = tpu.concatenate %544, %545 in 0 : vector<1x128xf32>, vector<1x128xf32> -> vector<2x128xf32>
    %c0_184 = arith.constant 0 : index
    %c0_185 = arith.constant 0 : index
    %547 = vector.load %arg17[%c0_184, %c0_185] : memref<128x128xbf16, #tpu.memory_space<vmem>>, vector<128x128xbf16>
    %c0_186 = arith.constant 0 : index
    %c0_187 = arith.constant 0 : index
    %548 = vector.load %arg18[%c0_186, %c0_187] : memref<1x128xf32, #tpu.memory_space<vmem>>, vector<1x128xf32>
    %549 = arith.truncf %546 : vector<2x128xf32> to vector<2x128xbf16>
    %cst_188 = arith.constant dense<0.000000e+00> : vector<2x128xf32>
    %550 = tpu.matmul %549, %547, %cst_188 {dimension_numbers = #tpu.dot_dimension_numbers<[1], [0], [0], [1], [0, 0, 1, 1], [], []>} : vector<2x128xbf16>, vector<128x128xbf16>, vector<2x128xf32> -> vector<2x128xf32>
    %551 = vector.broadcast %548 : vector<1x128xf32> to vector<2x128xf32>
    %552 = arith.addf %550, %551 : vector<2x128xf32>
    %553 = math.tanh %552 : vector<2x128xf32>
    %c0_189 = arith.constant 0 : index
    %c0_190 = arith.constant 0 : index
    %554 = vector.load %arg19[%c0_189, %c0_190] : memref<128x128xbf16, #tpu.memory_space<vmem>>, vector<128x128xbf16>
    %c0_191 = arith.constant 0 : index
    %c0_192 = arith.constant 0 : index
    %555 = vector.load %arg20[%c0_191, %c0_192] : memref<1x128xf32, #tpu.memory_space<vmem>>, vector<1x128xf32>
    %556 = arith.truncf %553 : vector<2x128xf32> to vector<2x128xbf16>
    %cst_193 = arith.constant dense<0.000000e+00> : vector<2x128xf32>
    %557 = tpu.matmul %556, %554, %cst_193 {dimension_numbers = #tpu.dot_dimension_numbers<[1], [0], [0], [1], [0, 0, 1, 1], [], []>} : vector<2x128xbf16>, vector<128x128xbf16>, vector<2x128xf32> -> vector<2x128xf32>
    %558 = vector.broadcast %555 : vector<1x128xf32> to vector<2x128xf32>
    %559 = arith.addf %557, %558 : vector<2x128xf32>
    %c0_194 = arith.constant 0 : index
    %c0_195 = arith.constant 0 : index
    %560 = vector.load %arg21[%c0_194, %c0_195] : memref<2x128xf32, #tpu.memory_space<vmem>>, vector<2x128xf32>
    tpu.vector_store %arg21[%c0_194, %c0_195], %559 {strides = array<i32>} : memref<2x128xf32, #tpu.memory_space<vmem>>, vector<2x128xf32>,
    return
  }
  func.func @transform_0(%arg0: i32) -> (i32, i32) {
    %c0_i32 = arith.constant 0 : i32
    %c0_i32_0 = arith.constant 0 : i32
    %c0_i32_1 = arith.constant 0 : i32
    return %c0_i32, %c0_i32_0 : i32, i32
  }
  func.func @transform_1(%arg0: i32) -> (i32, i32) {
    %c0_i32 = arith.constant 0 : i32
    %c0_i32_0 = arith.constant 0 : i32
    %c0_i32_1 = arith.constant 0 : i32
    return %c0_i32, %c0_i32_0 : i32, i32
  }
  func.func @transform_2(%arg0: i32) -> (i32, i32) {
    %c0_i32 = arith.constant 0 : i32
    %c0_i32_0 = arith.constant 0 : i32
    %c0_i32_1 = arith.constant 0 : i32
    return %c0_i32, %c0_i32_0 : i32, i32
  }
  func.func @transform_3(%arg0: i32) -> (i32, i32) {
    %c0_i32 = arith.constant 0 : i32
    %c0_i32_0 = arith.constant 0 : i32
    %c0_i32_1 = arith.constant 0 : i32
    return %c0_i32, %c0_i32_0 : i32, i32
  }
  func.func @transform_4(%arg0: i32) -> (i32, i32, i32) {
    %c0_i32 = arith.constant 0 : i32
    %c0_i32_0 = arith.constant 0 : i32
    %c0_i32_1 = arith.constant 0 : i32
    %c0_i32_2 = arith.constant 0 : i32
    return %c0_i32, %c0_i32_0, %c0_i32_1 : i32, i32, i32
  }
  func.func @transform_5(%arg0: i32) -> (i32, i32, i32) {
    %c0_i32 = arith.constant 0 : i32
    %c0_i32_0 = arith.constant 0 : i32
    %c0_i32_1 = arith.constant 0 : i32
    %c0_i32_2 = arith.constant 0 : i32
    return %c0_i32, %c0_i32_0, %c0_i32_1 : i32, i32, i32
  }
  func.func @transform_6(%arg0: i32) -> (i32, i32, i32) {
    %c0_i32 = arith.constant 0 : i32
    %c0_i32_0 = arith.constant 0 : i32
    %c0_i32_1 = arith.constant 0 : i32
    %c0_i32_2 = arith.constant 0 : i32
    return %c0_i32, %c0_i32_0, %c0_i32_1 : i32, i32, i32
  }
  func.func @transform_7(%arg0: i32) -> (i32, i32, i32) {
    %c0_i32 = arith.constant 0 : i32
    %c0_i32_0 = arith.constant 0 : i32
    %c0_i32_1 = arith.constant 0 : i32
    %c0_i32_2 = arith.constant 0 : i32
    return %c0_i32, %c0_i32_0, %c0_i32_1 : i32, i32, i32
  }
  func.func @transform_8(%arg0: i32) -> (i32, i32, i32) {
    %c0_i32 = arith.constant 0 : i32
    %c0_i32_0 = arith.constant 0 : i32
    %c0_i32_1 = arith.constant 0 : i32
    %c0_i32_2 = arith.constant 0 : i32
    return %c0_i32, %c0_i32_0, %c0_i32_1 : i32, i32, i32
  }
  func.func @transform_9(%arg0: i32) -> (i32, i32, i32) {
    %c0_i32 = arith.constant 0 : i32
    %c0_i32_0 = arith.constant 0 : i32
    %c0_i32_1 = arith.constant 0 : i32
    %c0_i32_2 = arith.constant 0 : i32
    return %c0_i32, %c0_i32_0, %c0_i32_1 : i32, i32, i32
  }
  func.func @transform_10(%arg0: i32) -> (i32, i32, i32) {
    %c0_i32 = arith.constant 0 : i32
    %c0_i32_0 = arith.constant 0 : i32
    %c0_i32_1 = arith.constant 0 : i32
    %c0_i32_2 = arith.constant 0 : i32
    return %c0_i32, %c0_i32_0, %c0_i32_1 : i32, i32, i32
  }
  func.func @transform_11(%arg0: i32) -> (i32, i32, i32) {
    %c0_i32 = arith.constant 0 : i32
    %c0_i32_0 = arith.constant 0 : i32
    %c0_i32_1 = arith.constant 0 : i32
    %c0_i32_2 = arith.constant 0 : i32
    return %c0_i32, %c0_i32_0, %c0_i32_1 : i32, i32, i32
  }
  func.func @transform_12(%arg0: i32) -> (i32, i32, i32) {
    %c0_i32 = arith.constant 0 : i32
    %c0_i32_0 = arith.constant 0 : i32
    %c0_i32_1 = arith.constant 0 : i32
    %c0_i32_2 = arith.constant 0 : i32
    return %c0_i32, %c0_i32_0, %c0_i32_1 : i32, i32, i32
  }
  func.func @transform_13(%arg0: i32) -> (i32, i32, i32) {
    %c0_i32 = arith.constant 0 : i32
    %c0_i32_0 = arith.constant 0 : i32
    %c0_i32_1 = arith.constant 0 : i32
    %c0_i32_2 = arith.constant 0 : i32
    return %c0_i32, %c0_i32_0, %c0_i32_1 : i32, i32, i32
  }
  func.func @transform_14(%arg0: i32) -> (i32, i32, i32) {
    %c0_i32 = arith.constant 0 : i32
    %c0_i32_0 = arith.constant 0 : i32
    %c0_i32_1 = arith.constant 0 : i32
    %c0_i32_2 = arith.constant 0 : i32
    return %c0_i32, %c0_i32_0, %c0_i32_1 : i32, i32, i32
  }
  func.func @transform_15(%arg0: i32) -> (i32, i32, i32) {
    %c0_i32 = arith.constant 0 : i32
    %c0_i32_0 = arith.constant 0 : i32
    %c0_i32_1 = arith.constant 0 : i32
    %c0_i32_2 = arith.constant 0 : i32
    return %c0_i32, %c0_i32_0, %c0_i32_1 : i32, i32, i32
  }
  func.func @transform_16(%arg0: i32) -> (i32, i32) {
    %c0_i32 = arith.constant 0 : i32
    %c0_i32_0 = arith.constant 0 : i32
    %c0_i32_1 = arith.constant 0 : i32
    return %c0_i32, %c0_i32_0 : i32, i32
  }
  func.func @transform_17(%arg0: i32) -> (i32, i32) {
    %c0_i32 = arith.constant 0 : i32
    %c0_i32_0 = arith.constant 0 : i32
    %c0_i32_1 = arith.constant 0 : i32
    return %c0_i32, %c0_i32_0 : i32, i32
  }
  func.func @transform_18(%arg0: i32) -> (i32, i32) {
    %c0_i32 = arith.constant 0 : i32
    %c0_i32_0 = arith.constant 0 : i32
    %c0_i32_1 = arith.constant 0 : i32
    return %c0_i32, %c0_i32_0 : i32, i32
  }
  func.func @transform_19(%arg0: i32) -> (i32, i32) {
    %c0_i32 = arith.constant 0 : i32
    %c0_i32_0 = arith.constant 0 : i32
    %c0_i32_1 = arith.constant 0 : i32
    return %c0_i32, %c0_i32_0 : i32, i32
  }
  func.func @transform_20(%arg0: i32) -> (i32, i32) {
    %c0_i32 = arith.constant 0 : i32
    %c0_i32_0 = arith.constant 0 : i32
    %c0_i32_1 = arith.constant 0 : i32
    return %c0_i32, %c0_i32_0 : i32, i32
  }
}

</mosaic_0001>

<bundles_post_ra>
// kernel: tpu_custom_call.1
= control target key start
LH: loop header
LB: loop body
LE: loop exit
PB: predicated region body
PF: predicated region fallthrough
CT: control target
= control target key end

     0   :  { %s7006_s0 = inlined_call_operand.hbm [shape: f32[16,128], index: 0, kind: input, shape index: {}]   ;;  %s7007_s1 = inlined_call_operand.hbm [shape: f32[2,8], index: 1, kind: input, shape index: {}]   ;;  %s7008_s2 = inlined_call_operand.hbm [shape: f32[1,128], index: 2, kind: input, shape index: {}]   ;;  %s7009_s3 = inlined_call_operand.hbm [shape: f32[1,128], index: 3, kind: input, shape index: {}]   ;;  %s7010_s4 = inlined_call_operand.hbm [shape: bf16[2,128,384], index: 4, kind: input, shape index: {}]   ;;  %s7011_s5 = inlined_call_operand.vmem [shape: f32[2,1,384], index: 5, kind: input, shape index: {}]   ;;  %s7012_s6 = inlined_call_operand.hbm [shape: bf16[2,128,128], index: 6, kind: input, shape index: {}]   ;;  %s7013_s7 = inlined_call_operand.vmem [shape: f32[2,1,128], index: 7, kind: input, shape index: {}]   ;;  %s7014_s8 = inlined_call_operand.hbm [shape: f32[2,1,128], index: 8, kind: input, shape index: {}]   ;;  %s7015_s9 = inlined_call_operand.hbm [shape: f32[2,1,128], index: 9, kind: input, shape index: {}]   ;;  %s7016_s10 = inlined_call_operand.hbm [shape: bf16[2,128,512], index: 10, kind: input, shape index: {}]   ;;  %s7017_s11 = inlined_call_operand.vmem [shape: f32[2,1,512], index: 11, kind: input, shape index: {}]   ;;  %s7018_s12 = inlined_call_operand.hbm [shape: bf16[2,512,128], index: 12, kind: input, shape index: {}]   ;;  %s7019_s13 = inlined_call_operand.vmem [shape: f32[2,1,128], index: 13, kind: input, shape index: {}]   ;;  %s7020_s14 = inlined_call_operand.vmem [shape: f32[2,1,128], index: 14, kind: input, shape index: {}]   ;;  %s7021_s15 = inlined_call_operand.vmem [shape: f32[2,1,128], index: 15, kind: input, shape index: {}]   ;;  %s7022_s16 = inlined_call_operand.hbm [shape: bf16[128,128], index: 16, kind: input, shape index: {}]   ;;  %s7023_s17 = inlined_call_operand.vmem [shape: f32[1,128], index: 17, kind: input, shape index: {}]   ;;  %s7024_s18 = inlined_call_operand.hbm [shape: bf16[128,128], index: 18, kind: input, shape index: {}]   ;;  %s7025_s19 = inlined_call_operand.vmem [shape: f32[1,128], index: 19, kind: input, shape index: {}]   ;;  %s7026_s20 = inlined_call_operand.hbm [shape: f32[2,128], index: 20, kind: output, shape index: {}]  }
   0x1   :  { %7029 = sst [smem:[#allocation31_spill]] %s7006_s0 }
   0x2   :  { %7030 = sst [smem:[#allocation32_spill]] %s7007_s1 }
   0x3   :  { %7031 = sst [smem:[#allocation33_spill]] %s7008_s2 }
   0x4   :  { %7032 = sst [smem:[#allocation34_spill]] %s7009_s3 }
   0x5   :  { %7033 = sst [smem:[#allocation35_spill]] %s7010_s4 }
   0x6   :  { %25 = vsyncpa [#allocation3], 0 }
   0x7   :  { %26 = vsyncpa [#allocation6], 0 }
   0x8   :  { %27 = vsyncpa [#allocation9], 0 }
   0x9   :  { %28 = vsyncpa [#allocation12], 0 }
   0xa   :  { %29 = vsyncpa [#allocation15], 0 }
   0xb   :  { %30 = vsyncpa [#allocation18], 0 }
   0xc   :  { %31 = vsyncpa [#allocation21], 0 }
   0xd   :  { %32 = vsyncpa [#allocation4], 0  ;;  %s6212_s1 = smov [#allocation5]   ;;  %s6213_s23 = smov [#allocation8]  }
   0xe   :  { %s51_s22 = sshll.u32 %s6212_s1, 4  ;;  %s71_s24 = sshll.u32 %s6213_s23, 4  ;;  %s52_s22 = int_to_ptr.vmem [resolvable:$true] %s51_s22  ;;  %s72_s24 = int_to_ptr.vmem [resolvable:$true] %s71_s24 }
   0xf   :  { %s5944_s2 = scalar_lea.vmem %s52_s22, 32  ;;  %p5949_p1 = scmp.lt.s32.totalorder %s52_s22, %s52_s22 }
  0x10   :  { %p5945_p0 = scmp.ne.s32.totalorder %s52_s22, %s5944_s2  ;;  %p5950_p2 = scmp.lt.s32.totalorder %s5944_s2, %s5944_s2 }
  0x12   :  { %p5951_p3 = por %p5950_p2, %p5949_p1 }
  0x14   :  { %p5952_p4 = pnand %p5951_p3, %p5945_p0 }
  0x16   :  { %5955 = shalt.err (!%p5952_p4)
}
  0x17   :  { %s7034_s26 = sld [smem:[#allocation32_spill]]  ;;  %s5964_s27 = scalar_lea.vmem %s72_s24, 16 }
  0x18   :  { %p5965_p5 = scmp.ne.s32.totalorder %s72_s24, %s5964_s27  ;;  %s5968_s28 = scalar_lea.vmem %s72_s24, 32 }
  0x19   :  { %p5969_p6 = scmp.lt.s32.totalorder %s72_s24, %s72_s24  ;;  %p5970_p7 = scmp.lt.s32.totalorder %s5968_s28, %s5964_s27 }
  0x1b   :  { %p5971_p8 = por %p5970_p7, %p5969_p6 }
  0x1d   :  { %54 = dma.hbm_to_vmem [thread:$0]  %s7034_s26, 32, %s52_s22, [#allocation6]  }
  0x1e   :  { %p5972_p9 = pnand %p5971_p8, %p5965_p5 }
  0x20   :  { %5975 = shalt.err (!%p5972_p9)
}
  0x21   :  { %s7035_s30 = sld [smem:[#allocation34_spill]]  ;;  %s6214_s0 = smov [#allocation11]  }
  0x22   :  { %s94_s21 = sshll.u32 %s6214_s0, 4  ;;  %s95_s21 = int_to_ptr.vmem [resolvable:$true] %s94_s21 }
  0x23   :  { %s5984_s1 = scalar_lea.vmem %s95_s21, 2048  ;;  %p5989_p11 = scmp.lt.s32.totalorder %s95_s21, %s95_s21 }
  0x24   :  { %p5985_p10 = scmp.ne.s32.totalorder %s95_s21, %s5984_s1  ;;  %p5990_p12 = scmp.lt.s32.totalorder %s5984_s1, %s5984_s1 }
  0x26   :  { %p5991_p13 = por %p5990_p12, %p5989_p11 }
  0x27   :  { %74 = dma.hbm_to_vmem [thread:$0]  %s7035_s30, 16, %s72_s24, [#allocation9]  }
  0x28   :  { %p5992_p0 = pnand %p5991_p13, %p5985_p10 }
  0x2a   :  { %5995 = shalt.err (!%p5992_p0)
}
  0x2b   :  { %s7027_s22 = smov 64   ;;  %s6216_s23 = smov 4  }
  0x2c   :  { %100 = dma.hbm_to_vmem [thread:$0]  %s7012_s6, 2048, %s95_s21, [#allocation12], %s7027_s22, %s7027_s22, %s6216_s23  }
  0x2d   :  { %s6217_s24 = smov [#allocation14]   ;;  %s6218_s26 = smov [#allocation17]  }
  0x2e   :  { %s120_s3 = sshll.u32 %s6217_s24, 4  ;;  %s146_s27 = sshll.u32 %s6218_s26, 4  ;;  %s121_s3 = int_to_ptr.vmem [resolvable:$true] %s120_s3  ;;  %s147_s27 = int_to_ptr.vmem [resolvable:$true] %s146_s27 }
  0x2f   :  { %s6004_s28 = scalar_lea.vmem %s121_s3, 32  ;;  %p6009_p2 = scmp.lt.s32.totalorder %s121_s3, %s121_s3 }
  0x30   :  { %p6005_p1 = scmp.ne.s32.totalorder %s121_s3, %s6004_s28  ;;  %p6010_p3 = scmp.lt.s32.totalorder %s6004_s28, %s6004_s28 }
  0x32   :  { %p6011_p4 = por %p6010_p3, %p6009_p2 }
  0x34   :  { %p6012_p5 = pnand %p6011_p4, %p6005_p1 }
  0x36   :  { %6015 = shalt.err (!%p6012_p5)
}
  0x37   :  { %s6219_s4 = smov 16   ;;  %s6220_s29 = smov 1  }
  0x38   :  { %126 = dma.hbm_to_vmem [thread:$0]  %s7015_s9, 32, %s121_s3, [#allocation15], %s6219_s4, %s6219_s4, %s6220_s29  }
  0x39   :  { %s6024_s6 = scalar_lea.vmem %s147_s27, 8192  ;;  %p6029_p7 = scmp.lt.s32.totalorder %s147_s27, %s147_s27 }
  0x3a   :  { %p6025_p6 = scmp.ne.s32.totalorder %s147_s27, %s6024_s6  ;;  %p6030_p8 = scmp.lt.s32.totalorder %s6024_s6, %s6024_s6 }
  0x3c   :  { %p6031_p9 = por %p6030_p8, %p6029_p7 }
  0x3e   :  { %p6032_p10 = pnand %p6031_p9, %p6025_p6 }
  0x40   :  { %6035 = shalt.err (!%p6032_p10)
}
  0x41   :  { %152 = dma.hbm_to_vmem [thread:$0]  %s7018_s12, 8192, %s147_s27, [#allocation18], %s7027_s22, %s7027_s22, %s6216_s23  }
  0x42   :  { %s6221_s2 = smov [#allocation2]  }
  0x43   :  { %s38_s25 = sshll.u32 %s6221_s2, 4  ;;  %s39_s25 = int_to_ptr.vmem [resolvable:$true] %s38_s25 }
  0x44   :  { %s6044_s24 = scalar_lea.vmem %s39_s25, 256  ;;  %p6049_p12 = scmp.lt.s32.totalorder %s39_s25, %s39_s25 }
  0x45   :  { %p6045_p11 = scmp.ne.s32.totalorder %s39_s25, %s6044_s24  ;;  %p6050_p13 = scmp.lt.s32.totalorder %s6044_s24, %s6044_s24 }
  0x47   :  { %p6051_p0 = por %p6050_p13, %p6049_p12 }
  0x49   :  { %p6052_p1 = pnand %p6051_p0, %p6045_p11 }
  0x4b   :  { %6055 = shalt.err (!%p6052_p1)
}
  0x4c   :  { %s6222_s9 = smov 128   ;;  %s6223_s3 = smov 8  }
  0x4d   :  { %s7036_s30 = sld [smem:[#allocation31_spill]]  ;;  %s6224_s0 = smov [#allocation7]  }
  0x4e   :  { %s61_s6 = sshll.u32 %s6224_s0, 4  ;;  %s6225_s21 = smov [#allocation10]   ;;  %s62_s6 = int_to_ptr.vmem [resolvable:$true] %s61_s6 }
  0x4f   :  { %s80_s12 = sshll.u32 %s6225_s21, 4  ;;  %s6064_s27 = scalar_lea.vmem %s62_s6, 16  ;;  %s81_s12 = int_to_ptr.vmem [resolvable:$true] %s80_s12 }
  0x50   :  { %p6065_p2 = scmp.ne.s32.totalorder %s62_s6, %s6064_s27  ;;  %s6068_s1 = scalar_lea.vmem %s62_s6, 32 }
  0x51   :  { %p6069_p3 = scmp.lt.s32.totalorder %s62_s6, %s62_s6  ;;  %p6070_p4 = scmp.lt.s32.totalorder %s6068_s1, %s6064_s27 }
  0x53   :  { %44 = dma.hbm_to_vmem [thread:$0]  %s7036_s30, 256, %s39_s25, [#allocation3], %s6222_s9, %s6222_s9, %s6223_s3  }
  0x54   :  { %p6071_p5 = por %p6070_p4, %p6069_p3 }
  0x56   :  { %p6072_p6 = pnand %p6071_p5, %p6065_p2 }
  0x58   :  { %6075 = shalt.err (!%p6072_p6)
}
  0x59   :  { %s7037_s22 = sld [smem:[#allocation33_spill]]  ;;  %s6084_s26 = scalar_lea.vmem %s81_s12, 6144 }
  0x5a   :  { %p6085_p7 = scmp.ne.s32.totalorder %s81_s12, %s6084_s26  ;;  %p6089_p8 = scmp.lt.s32.totalorder %s81_s12, %s81_s12 }
  0x5b   :  { %p6090_p9 = scmp.lt.s32.totalorder %s6084_s26, %s6084_s26 }
  0x5d   :  { %p6091_p10 = por %p6090_p9, %p6089_p8 }
  0x5f   :  { %64 = dma.hbm_to_vmem [thread:$0]  %s7037_s22, 16, %s62_s6, [#allocation6]  }
  0x60   :  { %p6092_p11 = pnand %p6091_p10, %p6085_p7 }
  0x62   :  { %6095 = shalt.err (!%p6092_p11)
}
  0x63   :  { %s6226_s25 = smov 192   ;;  %s6227_s9 = smov 12  }
  0x64   :  { %s7038_s30 = sld [smem:[#allocation35_spill]]  ;;  %s6228_s0 = smov [#allocation13]  }
  0x65   :  { %s108_s21 = sshll.u32 %s6228_s0, 4  ;;  %s6229_s27 = smov [#allocation16]   ;;  %s109_s21 = int_to_ptr.vmem [resolvable:$true] %s108_s21 }
  0x66   :  { %s132_s1 = sshll.u32 %s6229_s27, 4  ;;  %s6104_s22 = scalar_lea.vmem %s109_s21, 32  ;;  %s133_s1 = int_to_ptr.vmem [resolvable:$true] %s132_s1 }
  0x67   :  { %p6105_p12 = scmp.ne.s32.totalorder %s109_s21, %s6104_s22  ;;  %p6109_p13 = scmp.lt.s32.totalorder %s109_s21, %s109_s21 }
  0x68   :  { %p6110_p0 = scmp.lt.s32.totalorder %s6104_s22, %s6104_s22 }
  0x6a   :  { %86 = dma.hbm_to_vmem [thread:$0]  %s7038_s30, 6144, %s81_s12, [#allocation9], %s6226_s25, %s6226_s25, %s6227_s9  }
  0x6b   :  { %p6111_p1 = por %p6110_p0, %p6109_p13 }
  0x6d   :  { %p6112_p2 = pnand %p6111_p1, %p6105_p12 }
  0x6f   :  { %6115 = shalt.err (!%p6112_p2)
}
  0x70   :  { %114 = dma.hbm_to_vmem [thread:$0]  %s7014_s8, 32, %s109_s21, [#allocation12], %s6219_s4, %s6219_s4, %s6220_s29  }
  0x71   :  { %s6124_s12 = scalar_lea.vmem %s133_s1, 8192  ;;  %p6129_p4 = scmp.lt.s32.totalorder %s133_s1, %s133_s1 }
  0x72   :  { %p6125_p3 = scmp.ne.s32.totalorder %s133_s1, %s6124_s12  ;;  %p6130_p5 = scmp.lt.s32.totalorder %s6124_s12, %s6124_s12 }
  0x74   :  { %p6131_p6 = por %p6130_p5, %p6129_p4 }
  0x76   :  { %p6132_p7 = pnand %p6131_p6, %p6125_p3 }
  0x78   :  { %6135 = shalt.err (!%p6132_p7)
}
  0x79   :  { %s6230_s24 = smov 256   ;;  %s6231_s9 = smov [#allocation19]  }
  0x7a   :  { %138 = dma.hbm_to_vmem [thread:$0]  %s7016_s10, 8192, %s133_s1, [#allocation15], %s6230_s24, %s6230_s24, %s6219_s4  }
  0x7b   :  { %s164_s3 = sshll.u32 %s6231_s9, 4  ;;  %s6232_s28 = smov [#allocation20]   ;;  %s165_s3 = int_to_ptr.vmem [resolvable:$true] %s164_s3 }
  0x7c   :  { %s178_s30 = sshll.u32 %s6232_s28, 4  ;;  %s6144_s0 = scalar_lea.vmem %s165_s3, 1024  ;;  %s179_s30 = int_to_ptr.vmem [resolvable:$true] %s178_s30 }
  0x7d   :  { %p6145_p8 = scmp.ne.s32.totalorder %s165_s3, %s6144_s0  ;;  %p6149_p9 = scmp.lt.s32.totalorder %s165_s3, %s165_s3 }
  0x7e   :  { %p6150_p10 = scmp.lt.s32.totalorder %s6144_s0, %s6144_s0 }
  0x80   :  { %p6151_p11 = por %p6150_p10, %p6149_p9 }
  0x82   :  { %p6152_p12 = pnand %p6151_p11, %p6145_p8 }
  0x84   :  { %6155 = shalt.err (!%p6152_p12)
}
  0x85   :  { %s7039_s8 = smov 64   ;;  %s6164_s10 = scalar_lea.vmem %s179_s30, 1024 }
  0x86   :  { %170 = dma.hbm_to_vmem [thread:$0]  %s7022_s16, 1024, %s165_s3, [#allocation18], %s7039_s8, %s7039_s8, %s6216_s23  }
  0x87   :  { %p6165_p13 = scmp.ne.s32.totalorder %s179_s30, %s6164_s10  ;;  %p6169_p0 = scmp.lt.s32.totalorder %s179_s30, %s179_s30 }
  0x88   :  { %p6170_p1 = scmp.lt.s32.totalorder %s6164_s10, %s6164_s10 }
  0x8a   :  { %p6171_p2 = por %p6170_p1, %p6169_p0 }
  0x8c   :  { %p6172_p3 = pnand %p6171_p2, %p6165_p13 }
  0x8e   :  { %6175 = shalt.err (!%p6172_p3)
}
  0x8f   :  { %184 = dma.hbm_to_vmem [thread:$0]  %s7024_s18, 1024, %s179_s30, [#allocation21], %s7039_s8, %s7039_s8, %s6216_s23  }
  0x90   :  { %6196 = dma.done.wait [#allocation3], 256  }
  0x91   :  { %6197 = vsyncadd [#allocation3], 4294967040 }
  0x92   :  { %6198 = dma.done.wait [#allocation6], 48  }
  0x93   :  { %6199 = vsyncadd [#allocation6], 4294967248 }
  0x94   :  { %6200 = dma.done.wait [#allocation9], 6160  }
  0x95   :  { %6201 = vsyncadd [#allocation9], 4294961136 }
  0x96   :  { %6202 = dma.done.wait [#allocation12], 2080  }
  0x97   :  { %6203 = vsyncadd [#allocation12], 4294965216 }
  0x98   :  { %6204 = dma.done.wait [#allocation15], 8224  }
  0x99   :  { %6205 = vsyncadd [#allocation15], 4294959072 }
  0x9a   :  { %6206 = dma.done.wait [#allocation18], 9216  }
  0x9b   :  { %6207 = vsyncadd [#allocation18], 4294958080 }
  0x9c   :  { %6208 = dma.done.wait [#allocation21], 1024  }
  0x9d   :  { %6209 = vsyncadd [#allocation21], 4294966272  ;;  %v224_v0 = vld [vmem:[#allocation2] sm:$0xff]  ;;  %v225_v1 = vld [vmem:[#allocation2 + $0x8] sm:$0xff]  ;;  %v6233_v4 = vmov 0.0   ;;  %v6234_v27 = vmov 0   ;;  %v303_v53 = vlaneseq }
  0x9e   :  { %228 = vadd.xlane.f32.xlu0 %v224_v0  ;;  %v5562_v2 = vld [vmem:[#allocation10 + $0xac] ss:$12 sps:$4 sm:$0xff]   ;;  %v5564_v3 = vld [vmem:[#allocation10 + $0xa8] ss:$12 sps:$4 sm:$0xff]   ;;  %5193 = vmatprep.subr.bf16.mxu1 %v6233_v4  ;;  %v5565_v5 = vld [vmem:[#allocation10 + $0xb0] ss:$12 sps:$4 sm:$0xff]  }
  0x9f   :  { %446 = vmatprep.subr.bf16.mxu0 %v5562_v2  ;;  %5194 = vmatpush3.bf16.msra.mxu1 %v5565_v5  ;;  %v5566_v14 = vld [vmem:[#allocation10 + $0x94] ss:$12 sps:$4 sm:$0xff]   ;;  %v5568_v15 = vld [vmem:[#allocation10 + $0x90] ss:$12 sps:$4 sm:$0xff]   ;;  %v5569_v16 = vld [vmem:[#allocation10 + $0x98] ss:$12 sps:$4 sm:$0xff]  }
  0xa0   :  { %447 = vmatpush1.bf16.msra.mxu0 %v5564_v3  ;;  %5195 = vmatprep.subr.bf16.mxu1 %v6233_v4  ;;  %v5570_v17 = vld [vmem:[#allocation10 + $0x7c] ss:$12 sps:$4 sm:$0xff]   ;;  %v5572_v18 = vld [vmem:[#allocation10 + $0x78] ss:$12 sps:$4 sm:$0xff]   ;;  %v5573_v19 = vld [vmem:[#allocation10 + $0x80] ss:$12 sps:$4 sm:$0xff]  }
  0xa1   :  { %448 = vmatprep.subr.bf16.mxu0 %v5566_v14  ;;  %v5574_v20 = vld [vmem:[#allocation10 + $0x64] ss:$12 sps:$4 sm:$0xff]   ;;  %v5576_v21 = vld [vmem:[#allocation10 + $0x60] ss:$12 sps:$4 sm:$0xff]   ;;  %v5577_v22 = vld [vmem:[#allocation10 + $0x68] ss:$12 sps:$4 sm:$0xff]   ;;  %478 = vmatprep.mubr.bf16.mxu0 %v6234_v27 }
  0xa2   :  { %230 = vadd.xlane.f32.xlu0 %v225_v1  ;;  %v5578_v23 = vld [vmem:[#allocation10 + $0x4c] ss:$12 sps:$4 sm:$0xff]   ;;  %v5580_v24 = vld [vmem:[#allocation10 + $0x48] ss:$12 sps:$4 sm:$0xff]   ;;  %v5581_v25 = vld [vmem:[#allocation10 + $0x50] ss:$12 sps:$4 sm:$0xff]  }
  0xa3   :  { %5196 = vmatpush3.bf16.msra.mxu1 %v5569_v16  ;;  %v5582_v26 = vld [vmem:[#allocation10 + $0x34] ss:$12 sps:$4 sm:$0xff]   ;;  %vm6235_vm0 = vmmov 0   ;;  %v5584_v28 = vld [vmem:[#allocation10 + $0x30] ss:$12 sps:$4 sm:$0xff]   ;;  %v6432_v54 = vshrl.u32 %v303_v53, 7 }
  0xa4   :  { %449 = vmatpush1.bf16.msra.mxu0 %v5568_v15  ;;  %5197 = vmatprep.subr.bf16.mxu1 %v6233_v4  ;;  %v5585_v29 = vld [vmem:[#allocation10 + $0x38] ss:$12 sps:$4 sm:$0xff]   ;;  %v5586_v30 = vld [vmem:[#allocation10 + $0x1c] ss:$12 sps:$4 sm:$0xff]   ;;  %v5589_v32 = vld [vmem:[#allocation10 + $0x20] ss:$12 sps:$4 sm:$0xff]  }
  0xa5   :  { %450 = vmatprep.subr.bf16.mxu0 %v5570_v17  ;;  %5209 = vmatprep.mubr.msk.bf16.mxu1 %vm6235_vm0, %v6233_v4  ;;  %v5588_v31 = vld [vmem:[#allocation10 + $0x18] ss:$12 sps:$4 sm:$0xff]   ;;  %v5592_v34 = vld [vmem:[#allocation10] ss:$12 sps:$4 sm:$0xff]   ;;  %v5593_v35 = vld [vmem:[#allocation10 + $0x8] ss:$12 sps:$4 sm:$0xff]  }
  0xa6   :  { %v5590_v33 = vld [vmem:[#allocation10 + $0x4] ss:$12 sps:$4 sm:$0xff]   ;;  %v4725_v44 = vld [vmem:[#allocation7] ss:$0 sm:$0xff]  ;;  %v4726_v48 = vld [vmem:[#allocation8] ss:$0 sm:$0xff] }
  0xa7   :  { %5198 = vmatpush3.bf16.msra.mxu1 %v5573_v19  ;;  %v6435_v55 = vsub.s32 1, %v6432_v54  ;;  %v300_v58 = vld [vmem:[%s7011_s5] sm:$0x7]  ;;  %v6441_v61 = vsub.s32 0, %v6432_v54  ;;  %vm539_vm1 = vcmask 261120   ;;  %s6236_s23 = smov 96  }
  0xa8   :  { %451 = vmatpush1.bf16.msra.mxu0 %v5572_v18  ;;  %5199 = vmatprep.subr.bf16.mxu1 %v6233_v4  ;;  %vm601_vm2 = vcmask 1043456   ;;  %s6237_s1 = smov 32   ;;  %vm586_vm3 = vcmask 64512   ;;  %vm992_vm4 = vcmask 523264   ;;  %vm994_vm5 = vcmask 785408  }
  0xa9   :  { %452 = vmatprep.subr.bf16.mxu0 %v5574_v20  ;;  %v310_v62 = vrot.slane %v300_v58, %v6435_v55  ;;  %v306_v5 = vrot.slane %v300_v58, %v6441_v61  ;;  %vm4476_vm6 = vcmask 1040384  }
  0xab   :  { %5200 = vmatpush3.bf16.msra.mxu1 %v5577_v22 }
  0xac   :  { %453 = vmatpush1.bf16.msra.mxu0 %v5576_v21  ;;  %5201 = vmatprep.subr.bf16.mxu1 %v6233_v4 }
  0xad   :  { %454 = vmatprep.subr.bf16.mxu0 %v5578_v23 }
  0xaf   :  { %5202 = vmatpush3.bf16.msra.mxu1 %v5581_v25 }
  0xb0   :  { %455 = vmatpush1.bf16.msra.mxu0 %v5580_v24  ;;  %5203 = vmatprep.subr.bf16.mxu1 %v6233_v4 }
  0xb1   :  { %456 = vmatprep.subr.bf16.mxu0 %v5582_v26 }
  0xb3   :  { %5204 = vmatpush3.bf16.msra.mxu1 %v5585_v29 }
  0xb4   :  { %457 = vmatpush1.bf16.msra.mxu0 %v5584_v28  ;;  %5205 = vmatprep.subr.bf16.mxu1 %v6233_v4  ;;  %v6473_v28 = vld [vmem:[#allocation5] sm:$0x3] }
  0xb5   :  { %458 = vmatprep.subr.bf16.mxu0 %v5586_v30  ;;  %v6477_v29 = vrot.slane %v6473_v28, %v6441_v61 }
  0xb7   :  { %5206 = vmatpush3.bf16.msra.mxu1 %v5589_v32 }
  0xb8   :  { %459 = vmatpush1.bf16.msra.mxu0 %v5588_v31  ;;  %5207 = vmatprep.subr.bf16.mxu1 %v6233_v4 }
  0xb9   :  { %460 = vmatprep.subr.bf16.mxu0 %v5590_v33 }
  0xbb   :  { %5208 = vmatpush3.bf16.msra.mxu1 %v5593_v35 }
  0xbc   :  { %461 = vmatpush1.bf16.msra.mxu0 %v5592_v34  ;;  %5213 = vmatprep.subr.bf16.mxu1 %v6233_v4 }
  0xbd   :  { %5237 = vmatprep.subr.bf16.mxu0 %v6233_v4 }
 0x127   :  { %v229_v6 = vpop.xlane.xlu0 %228 }
 0x128   :  { %v233_v7 = vmul.f32 0.0078125, %v229_v6 }
 0x12a   :  { %v6401_v8 = vsub.f32 %v224_v0, %v233_v7 }
 0x12b   :  { %v231_v9 = vpop.xlane.xlu0 %230 }
 0x12c   :  { %v234_v10 = vmul.f32 0.0078125, %v231_v9  ;;  %v237_v11 = vmul.f32 %v6401_v8, %v6401_v8 }
 0x12e   :  { %v6405_v12 = vsub.f32 %v225_v1, %v234_v10  ;;  %239 = vadd.xlane.f32.xlu1 %v237_v11  ;;  %v6445_v1 = vsub.s32 2, %v6432_v54 }
 0x130   :  { %v238_v13 = vmul.f32 %v6405_v12, %v6405_v12 }
 0x132   :  { %241 = vadd.xlane.f32.xlu1 %v238_v13 }
 0x1b7   :  { %v240_v36 = vpop.xlane.xlu1 %239 }
 0x1b8   :  { %v243_v37 = vmul.f32 0.0078125, %v240_v36 }
 0x1ba   :  { %v245_v38 = vadd.f32 1e-12, %v243_v37 }
 0x1bb   :  { %v242_v39 = vpop.xlane.xlu1 %241 }
 0x1bc   :  { %5818 = vrsqrt.f32 %v245_v38  ;;  %v244_v40 = vmul.f32 0.0078125, %v242_v39 }
 0x1be   :  { %v246_v41 = vadd.f32 1e-12, %v244_v40 }
 0x1c0   :  { %5820 = vrsqrt.f32 %v246_v41 }
 0x1c9   :  { %v5819_v42 = vpop.eup %5818 }
 0x1ca   :  { %v249_v43 = vmul.f32 %v5819_v42, %v6401_v8  ;;  %v314_v8 = vrot.slane %v300_v58, %v6445_v1 }
 0x1cc   :  { %v257_v47 = vmul.f32 %v4725_v44, %v249_v43 }
 0x1cd   :  { %v5821_v45 = vpop.eup %5820 }
 0x1ce   :  { %v250_v46 = vmul.f32 %v5821_v45, %v6405_v12  ;;  %v6422_v50 = vadd.f32 %v4726_v48, %v257_v47 }
 0x1d0   :  { %v258_v49 = vmul.f32 %v4725_v44, %v250_v46 }
 0x1d2   :  { %v6424_v51 = vadd.f32 %v4726_v48, %v258_v49 }
 0x1d4   :  { %v301_v52 = vpack.c.bf16 %v6424_v51, %v6422_v50 }
 0x1d6   :  { %479 = vmatmul.mubr.bf16.vlgmr.msra.gmra.mxu0 %v301_v52  ;;  %5210 = vmatmul.mubr.bf16.vlgmr.msra.gmra.mxu1 %v301_v52 }
 0x1d7   :  { %5215 = vmatprep.mubr.msk.bf16.mxu1 %vm6235_vm0, %v6233_v4  ;;  %5239 = vmatprep.mubr.msk.bf16.mxu0 %vm6235_vm0, %v6233_v4 }
 0x296   :  { %v480_v56 = vpop.f32.mrf.mxu0  ;;  %v523_v57 = vpop.f32.mrf.mxu1 }
 0x297   :  { %v481_v11 = vadd.f32 %v480_v56, %v306_v5  ;;  %v524_v14 = vadd.f32 %v523_v57, %v314_v8 }
 0x298   :  { %v482_v59 = vpop.f32.mrf.mxu0  ;;  %v5211_v60 = vpop.f32.mrf.mxu1 }
 0x299   :  { %v483_v6 = vadd.f32 %v482_v59, %v310_v62  ;;  %v530_v16 = vmul.f32 0.17677669, %v481_v11 }
 0x29a   :  { %v484_v63 = vpop.f32.mrf.mxu0  ;;  %v526_v0 = vpop.f32.mrf.mxu1 }
 0x29b   :  { %v485_v9 = vadd.f32 %v484_v63, %v306_v5  ;;  %v527_v12 = vadd.f32 %v526_v0, %v314_v8 }
 0x29c   :  { %v486_v2 = vpop.f32.mrf.mxu0  ;;  %v5212_v3 = vpop.f32.mrf.mxu1 }
 0x29d   :  { %v487_v7 = vadd.f32 %v486_v2, %v310_v62  ;;  %v531_v15 = vmul.f32 0.17677669, %v485_v9  ;;  %v6452_v17 = vpack.c.bf16 %v527_v12, %v524_v14  ;;  %v6533_v9 = vrot.slane %v6473_v28, %v6435_v55 }
 0x29f   :  { %v533_v10 = vpack.c.bf16 %v487_v7, %v483_v6  ;;  %v532_v18 = vpack.c.bf16 %v531_v15, %v530_v16  ;;  %v603_v19 = vsel %vm601_vm2, %v6452_v17, 0 }
 0x2a1   :  { %650 = vrot.lane.b32.xlu1 %v533_v10, %s6236_s23  ;;  %v544_v13 = vsel %vm539_vm1, %v533_v10, 0  ;;  %v1001_v20 = vrot.slane %v533_v10, 4  ;;  %v1000_v36 = vrot.slane %v532_v18, 4 }
 0x2a2   :  { %5214 = vmatpush3.bf16.xpose.msra.mxu1 %v544_v13 }
 0x2a3   :  { %5219 = vmatprep.subr.bf16.mxu1 %v6233_v4  ;;  %v1006_v48 = vsel %vm539_vm1, %v1001_v20, 0 }
 0x2a5   :  { %761 = vrot.lane.b32.xlu1 %v533_v10, %s7039_s8 }
 0x2a9   :  { %759 = vrot.lane.b32.xlu1 %v532_v18, %s7039_s8  ;;  %5216 = vmatmul.mubr.msk.bf16.vlgmr.msra.gmra.mxu1 %vm539_vm1, %v532_v18 }
 0x2aa   :  { %5220 = vmatpush3.bf16.msra.mxu1 %v603_v19  ;;  %5221 = vmatprep.mubr.msk.bf16.mxu1 %vm6235_vm0, %v6233_v4 }
 0x2ab   :  { %5225 = vmatprep.subr.bf16.mxu1 %v6233_v4 }
 0x2ad   :  { %871 = vrot.lane.b32.xlu1 %v533_v10, %s6237_s1 }
 0x2b1   :  { %1109 = vrot.lane.b32.xlu1 %v1001_v20, %s6236_s23 }
 0x2b5   :  { %1219 = vrot.lane.b32.xlu1 %v1001_v20, %s7039_s8 }
 0x2b9   :  { %1329 = vrot.lane.b32.xlu1 %v1001_v20, %s6237_s1 }
 0x313   :  { %v651_v21 = vpop.permute.xlu1 %650 }
 0x314   :  { %v656_v57 = vsel %vm539_vm1, %v651_v21, 0 }
 0x317   :  { %v762_v22 = vpop.permute.xlu1 %761 }
 0x318   :  { %v767_v23 = vsel %vm539_vm1, %v762_v22, 0 }
 0x319   :  { %5238 = vmatpush3.bf16.xpose.msra.mxu0 %v767_v23 }
 0x31a   :  { %5249 = vmatprep.subr.bf16.mxu0 %v6233_v4 }
 0x31b   :  { %v760_v24 = vpop.permute.xlu1 %759 }
 0x31f   :  { %v872_v25 = vpop.permute.xlu1 %871 }
 0x320   :  { %v877_v26 = vsel %vm539_vm1, %v872_v25, 0  ;;  %5240 = vmatmul.mubr.msk.bf16.vlgmr.msra.gmra.mxu0 %vm539_vm1, %v760_v24 }
 0x321   :  { %5250 = vmatpush3.bf16.xpose.msra.mxu0 %v877_v26  ;;  %5251 = vmatprep.mubr.msk.bf16.mxu0 %vm6235_vm0, %v6233_v4 }
 0x322   :  { %5261 = vmatprep.subr.bf16.mxu0 %v6233_v4 }
 0x323   :  { %v1110_v49 = vpop.permute.xlu1 %1109 }
 0x324   :  { %v1115_v52 = vsel %vm539_vm1, %v1110_v49, 0  ;;  %v1059_v49 = vrot.slane %v6452_v17, 4 }
 0x327   :  { %v1220_v58 = vpop.permute.xlu1 %1219 }
 0x328   :  { %v1225_v60 = vsel %vm539_vm1, %v1220_v58, 0 }
 0x32b   :  { %v1330_v62 = vpop.permute.xlu1 %1329 }
 0x32c   :  { %v1335_v0 = vsel %vm539_vm1, %v1330_v62, 0 }
 0x369   :  { %v580_v30 = vpop.f32.mrf.mxu1 }
 0x36a   :  { %v581_v31 = vadd.f32 %v580_v30, %v6477_v29 }
 0x36b   :  { %v5217_v32 = vpop.f32.mrf.mxu1 }
 0x36c   :  { %v587_v33 = vsel %vm586_vm3, %v581_v31, -inf }
 0x36d   :  { %588 = vmax.xlane.f32.xlu0 %v587_v33  ;;  %v583_v34 = vpop.f32.mrf.mxu1 }
 0x36f   :  { %v5218_v35 = vpop.f32.mrf.mxu1 }
 0x383   :  { %647 = vrot.lane.b32.xlu0 %v532_v18, %s6236_s23 }
 0x387   :  { %869 = vrot.lane.b32.xlu0 %v532_v18, %s6237_s1 }
 0x38b   :  { %1107 = vrot.lane.b32.xlu0 %v1000_v36, %s6236_s23 }
 0x38f   :  { %1217 = vrot.lane.b32.xlu0 %v1000_v36, %s7039_s8 }
 0x393   :  { %1327 = vrot.lane.b32.xlu0 %v1000_v36, %s6237_s1 }
 0x3e0   :  { %v803_v37 = vpop.f32.mrf.mxu0 }
 0x3e1   :  { %v6487_v38 = vadd.f32 %v803_v37, %v6477_v29 }
 0x3e2   :  { %v5241_v39 = vpop.f32.mrf.mxu0 }
 0x3e3   :  { %v809_v40 = vsel %vm586_vm3, %v6487_v38, -inf }
 0x3e4   :  { %v806_v41 = vpop.f32.mrf.mxu0  ;;  %810 = vmax.xlane.f32.xlu0 %v809_v40 }
 0x3e6   :  { %v5242_v42 = vpop.f32.mrf.mxu0 }
 0x3f6   :  { %v589_v43 = vpop.xlane.xlu0 %588 }
 0x3f7   :  { %v590_v44 = vsub.f32 %v581_v31, %v589_v43 }
 0x3f9   :  { %v591_v45 = vmul.f32 1.442695, %v590_v44 }
 0x3fa   :  { %v648_v46 = vpop.permute.xlu0 %647 }
 0x3fb   :  { %5822 = vpow2.f32 %v591_v45 }
 0x3fe   :  { %v870_v47 = vpop.permute.xlu0 %869 }
 0x3ff   :  { %5252 = vmatmul.mubr.msk.bf16.vlgmr.msra.gmra.mxu0 %vm539_vm1, %v870_v47 }
 0x400   :  { %5262 = vmatpush3.bf16.xpose.msra.mxu0 %v1006_v48  ;;  %5263 = vmatprep.mubr.msk.bf16.mxu0 %vm6235_vm0, %v6233_v4 }
 0x401   :  { %5273 = vmatprep.subr.bf16.mxu0 %v6233_v4 }
 0x402   :  { %v1108_v59 = vpop.permute.xlu0 %1107 }
 0x406   :  { %v1218_v63 = vpop.permute.xlu0 %1217 }
 0x407   :  { %5264 = vmatmul.mubr.msk.bf16.vlgmr.msra.gmra.mxu0 %vm539_vm1, %v1000_v36 }
 0x408   :  { %v6498_v53 = vpop.eup %5822  ;;  %5274 = vmatpush3.bf16.xpose.msra.mxu0 %v1115_v52  ;;  %5275 = vmatprep.mubr.msk.bf16.mxu0 %vm6235_vm0, %v6233_v4 }
 0x409   :  { %v597_v56 = vpack.c.bf16 %v6498_v53, %v6498_v53  ;;  %5285 = vmatprep.subr.bf16.mxu0 %v6233_v4 }
 0x40a   :  { %v1328_v2 = vpop.permute.xlu0 %1327 }
 0x40b   :  { %5222 = vmatmul.mubr.msk.bf16.vlgmr.msra.gmra.mxu1 %vm586_vm3, %v597_v56 }
 0x40c   :  { %5226 = vmatpush3.bf16.xpose.msra.mxu1 %v656_v57  ;;  %5227 = vmatprep.mubr.msk.bf16.mxu1 %vm6235_vm0, %v6233_v4 }
 0x40d   :  { %5231 = vmatprep.subr.bf16.mxu1 %v6233_v4 }
 0x40f   :  { %5276 = vmatmul.mubr.msk.bf16.vlgmr.msra.gmra.mxu0 %vm539_vm1, %v1108_v59 }
 0x410   :  { %5286 = vmatpush3.bf16.xpose.msra.mxu0 %v1225_v60  ;;  %5287 = vmatprep.mubr.msk.bf16.mxu0 %vm6235_vm0, %v6233_v4 }
 0x411   :  { %5297 = vmatprep.subr.bf16.mxu0 %v6233_v4 }
 0x413   :  { %5228 = vmatmul.mubr.msk.bf16.vlgmr.msra.gmra.mxu1 %vm539_vm1, %v648_v46 }
 0x414   :  { %5233 = vmatprep.mubr.msk.bf16.mxu1 %vm6235_vm0, %v6233_v4 }
 0x417   :  { %5288 = vmatmul.mubr.msk.bf16.vlgmr.msra.gmra.mxu0 %vm539_vm1, %v1218_v63 }
 0x418   :  { %5298 = vmatpush3.bf16.xpose.msra.mxu0 %v1335_v0  ;;  %5299 = vmatprep.mubr.msk.bf16.mxu0 %vm6235_vm0, %v6233_v4 }
 0x419   :  { %5309 = vmatprep.subr.bf16.mxu0 %v6233_v4 }
 0x41f   :  { %5300 = vmatmul.mubr.msk.bf16.vlgmr.msra.gmra.mxu0 %vm539_vm1, %v1328_v2 }
 0x420   :  { %5325 = vmatprep.mubr.msk.bf16.mxu0 %vm6235_vm0, %v6233_v4 }
 0x46d   :  { %v811_v52 = vpop.xlane.xlu0 %810 }
 0x46e   :  { %v812_v56 = vsub.f32 %v6487_v38, %v811_v52 }
 0x470   :  { %v813_v57 = vmul.f32 1.442695, %v812_v56 }
 0x472   :  { %5824 = vpow2.f32 %v813_v57 }
 0x47f   :  { %v5825_v58 = vpop.eup %5824 }
 0x480   :  { %v815_v59 = vsel %vm586_vm3, %v5825_v58, 0.0 }
 0x4bf   :  { %v913_v3 = vpop.f32.mrf.mxu0 }
 0x4c0   :  { %v6527_v5 = vadd.f32 %v913_v3, %v6477_v29 }
 0x4c1   :  { %v5253_v6 = vpop.f32.mrf.mxu0 }
 0x4c2   :  { %v919_v7 = vsel %vm586_vm3, %v6527_v5, -inf }
 0x4c3   :  { %920 = vmax.xlane.f32.xlu0 %v919_v7  ;;  %v916_v8 = vpop.f32.mrf.mxu0 }
 0x4c5   :  { %v5254_v10 = vpop.f32.mrf.mxu0 }
 0x4c7   :  { %v1042_v11 = vpop.f32.mrf.mxu0 }
 0x4c8   :  { %v6536_v12 = vadd.f32 %v1042_v11, %v6533_v9 }
 0x4c9   :  { %v5265_v13 = vpop.f32.mrf.mxu0 }
 0x4ca   :  { %v1048_v14 = vsel %vm586_vm3, %v6536_v12, -inf }
 0x4cb   :  { %1049 = vmax.xlane.f32.xlu0 %v1048_v14  ;;  %v6540_v15 = vpop.f32.mrf.mxu1  ;;  %v1045_v16 = vpop.f32.mrf.mxu0 }
 0x4cd   :  { %v5223_v18 = vpop.f32.mrf.mxu1  ;;  %v5266_v19 = vpop.f32.mrf.mxu0 }
 0x4cf   :  { %v642_v20 = vpop.f32.mrf.mxu1  ;;  %v1151_v21 = vpop.f32.mrf.mxu0 }
 0x4d0   :  { %v1152_v22 = vadd.f32 %v1151_v21, %v6533_v9 }
 0x4d1   :  { %v5224_v23 = vpop.f32.mrf.mxu1  ;;  %v5277_v24 = vpop.f32.mrf.mxu0 }
 0x4d2   :  { %v1157_v25 = vsel %vm586_vm3, %v1152_v22, -inf  ;;  %v593_v23 = vsel %vm586_vm3, %v6498_v53, 0.0  ;;  %v819_v24 = vpack.c.bf16 %v5825_v58, %v5825_v58  ;;  %v1064_v53 = vsel %vm601_vm2, %v1059_v49, 0  ;;  %v5594_v58 = vld [vmem:[#allocation11 + $0x38] sm:$0xff]  }
 0x4d3   :  { %1158 = vmax.xlane.f32.xlu0 %v1157_v25  ;;  %v692_v26 = vpop.f32.mrf.mxu1  ;;  %v1154_v28 = vpop.f32.mrf.mxu0  ;;  %5310 = vmatpush3.bf16.msra.mxu0 %v5594_v58 }
 0x4d4   :  { %v693_v30 = vadd.f32 %v692_v26, %v6477_v29  ;;  %5311 = vmatprep.subr.bf16.mxu0 %v6233_v4 }
 0x4d5   :  { %v5229_v31 = vpop.f32.mrf.mxu1  ;;  %v5278_v32 = vpop.f32.mrf.mxu0 }
 0x4d6   :  { %v698_v33 = vsel %vm586_vm3, %v693_v30, -inf }
 0x4d7   :  { %v1261_v34 = vpop.f32.mrf.mxu0  ;;  %699 = vmax.xlane.f32.xlu1 %v698_v33  ;;  %v695_v35 = vpop.f32.mrf.mxu1 }
 0x4d8   :  { %v6553_v45 = vadd.f32 %v1261_v34, %v6533_v9 }
 0x4d9   :  { %v5230_v36 = vpop.f32.mrf.mxu1  ;;  %v5289_v37 = vpop.f32.mrf.mxu0 }
 0x4da   :  { %v1267_v48 = vsel %vm586_vm3, %v6553_v45, -inf }
 0x4db   :  { %v1264_v39 = vpop.f32.mrf.mxu0 }
 0x4dd   :  { %v5290_v40 = vpop.f32.mrf.mxu0 }
 0x4df   :  { %v1371_v41 = vpop.f32.mrf.mxu0 }
 0x4e0   :  { %v6556_v46 = vadd.f32 %v1371_v41, %v6533_v9 }
 0x4e1   :  { %v5301_v42 = vpop.f32.mrf.mxu0 }
 0x4e2   :  { %v1377_v47 = vsel %vm586_vm3, %v6556_v46, -inf }
 0x4e3   :  { %v1374_v43 = vpop.f32.mrf.mxu0 }
 0x4e5   :  { %v5302_v44 = vpop.f32.mrf.mxu0 }
 0x4e8   :  { %710 = vrot.lane.b32.xlu1 %v6452_v17, %s6236_s23 }
 0x4e9   :  { %820 = vrot.lane.b32.xlu0 %v6452_v17, %s7039_s8 }
 0x4ed   :  { %930 = vrot.lane.b32.xlu0 %v6452_v17, %s6237_s1 }
 0x50c   :  { %1378 = vmax.xlane.f32.xlu0 %v1377_v47  ;;  %1268 = vmax.xlane.f32.xlu1 %v1267_v48 }
 0x51d   :  { %1168 = vrot.lane.b32.xlu1 %v1059_v49, %s6236_s23 }
 0x521   :  { %1388 = vrot.lane.b32.xlu1 %v1059_v49, %s6237_s1 }
 0x522   :  { %1278 = vrot.lane.b32.xlu0 %v1059_v49, %s7039_s8 }
 0x545   :  { %816 = vadd.xlane.f32.xlu1 %v815_v59  ;;  %v5595_v59 = vld [vmem:[#allocation11 + $0x30] sm:$0xff]  }
 0x546   :  { %5312 = vmatpush3.bf16.msra.mxu0 %v5595_v59 }
 0x547   :  { %5313 = vmatprep.subr.bf16.mxu0 %v6233_v4 }
 0x54c   :  { %v921_v60 = vpop.xlane.xlu0 %920 }
 0x54d   :  { %v922_v63 = vsub.f32 %v6527_v5, %v921_v60 }
 0x54f   :  { %v923_v2 = vmul.f32 1.442695, %v922_v63 }
 0x554   :  { %v1050_v62 = vpop.xlane.xlu0 %1049 }
 0x555   :  { %v1051_v18 = vsub.f32 %v6536_v12, %v1050_v62 }
 0x55c   :  { %v1159_v17 = vpop.xlane.xlu0 %1158 }
 0x55d   :  { %v1160_v0 = vsub.f32 %v1152_v22, %v1159_v17  ;;  %v1052_v22 = vmul.f32 1.442695, %v1051_v18 }
 0x55f   :  { %v1161_v3 = vmul.f32 1.442695, %v1160_v0 }
 0x560   :  { %v700_v6 = vpop.xlane.xlu1 %699  ;;  %v821_v16 = vpop.permute.xlu0 %820 }
 0x561   :  { %5826 = vpow2.f32 %v1161_v3  ;;  %v701_v7 = vsub.f32 %v693_v30, %v700_v6  ;;  %v826_v21 = vsel %vm601_vm2, %v821_v16, 0 }
 0x562   :  { %5828 = vpow2.f32 %v923_v2 }
 0x563   :  { %v702_v8 = vmul.f32 1.442695, %v701_v7 }
 0x564   :  { %v711_v38 = vpop.permute.xlu1 %710  ;;  %v931_v12 = vpop.permute.xlu0 %930 }
 0x565   :  { %5830 = vpow2.f32 %v702_v8  ;;  %v716_v10 = vsel %vm601_vm2, %v711_v38, 0  ;;  %v936_v25 = vsel %vm601_vm2, %v931_v12, 0 }
 0x566   :  { %5232 = vmatpush3.bf16.msra.mxu1 %v716_v10  ;;  %5832 = vpow2.f32 %v1052_v22  ;;  %v5597_v22 = vld [vmem:[#allocation11 + $0x20] sm:$0xff]  }
 0x567   :  { %5243 = vmatprep.subr.bf16.mxu1 %v6233_v4 }
 0x56e   :  { %v5827_v11 = vpop.eup %5826 }
 0x56f   :  { %v1163_v13 = vsel %vm586_vm3, %v5827_v11, 0.0  ;;  %v5829_v5 = vpop.eup %5828  ;;  %v1167_v40 = vpack.c.bf16 %v5827_v11, %v5827_v11 }
 0x570   :  { %1164 = vadd.xlane.f32.xlu0 %v1163_v13  ;;  %v925_v19 = vsel %vm586_vm3, %v5829_v5, 0.0  ;;  %v929_v26 = vpack.c.bf16 %v5829_v5, %v5829_v5 }
 0x572   :  { %v5831_v14 = vpop.eup %5830 }
 0x573   :  { %v708_v20 = vpack.c.bf16 %v5831_v14, %v5831_v14  ;;  %v5833_v28 = vpop.eup %5832  ;;  %v704_v48 = vsel %vm586_vm3, %v5831_v14, 0.0 }
 0x574   :  { %926 = vadd.xlane.f32.xlu0 %v925_v19  ;;  %v1058_v30 = vpack.c.bf16 %v5833_v28, %v5833_v28  ;;  %v1054_v57 = vsel %vm586_vm3, %v5833_v28, 0.0 }
 0x575   :  { %5234 = vmatmul.mubr.msk.bf16.vlgmr.msra.gmra.mxu1 %vm586_vm3, %v708_v20 }
 0x576   :  { %5244 = vmatpush3.bf16.msra.mxu1 %v826_v21  ;;  %5245 = vmatprep.mubr.msk.bf16.mxu1 %vm6235_vm0, %v6233_v4  ;;  %v5596_v21 = vld [vmem:[#allocation11 + $0x28] sm:$0xff]  }
 0x577   :  { %5255 = vmatprep.subr.bf16.mxu1 %v6233_v4  ;;  %5314 = vmatpush3.bf16.msra.mxu0 %v5596_v21 }
 0x578   :  { %594 = vadd.xlane.f32.xlu0 %v593_v23  ;;  %5315 = vmatprep.subr.bf16.mxu0 %v6233_v4 }
 0x57b   :  { %5316 = vmatpush3.bf16.msra.mxu0 %v5597_v22 }
 0x57c   :  { %5317 = vmatprep.subr.bf16.mxu0 %v6233_v4 }
 0x57d   :  { %5246 = vmatmul.mubr.msk.bf16.vlgmr.msra.gmra.mxu1 %vm586_vm3, %v819_v24 }
 0x57e   :  { %5256 = vmatpush3.bf16.msra.mxu1 %v936_v25  ;;  %5257 = vmatprep.mubr.msk.bf16.mxu1 %vm6235_vm0, %v6233_v4  ;;  %v5598_v25 = vld [vmem:[#allocation11 + $0x18] sm:$0xff]  }
 0x57f   :  { %5267 = vmatprep.subr.bf16.mxu1 %v6233_v4  ;;  %5318 = vmatpush3.bf16.msra.mxu0 %v5598_v25 }
 0x580   :  { %5319 = vmatprep.subr.bf16.mxu0 %v6233_v4 }
 0x585   :  { %5258 = vmatmul.mubr.msk.bf16.vlgmr.msra.gmra.mxu1 %vm586_vm3, %v929_v26 }
 0x586   :  { %5268 = vmatpush3.bf16.msra.mxu1 %v1064_v53  ;;  %5269 = vmatprep.mubr.msk.bf16.mxu1 %vm6235_vm0, %v6233_v4 }
 0x587   :  { %5279 = vmatprep.subr.bf16.mxu1 %v6233_v4 }
 0x58d   :  { %5270 = vmatmul.mubr.msk.bf16.vlgmr.msra.gmra.mxu1 %vm586_vm3, %v1058_v30 }
 0x58e   :  { %5281 = vmatprep.mubr.msk.bf16.mxu1 %vm6235_vm0, %v6233_v4 }
 0x595   :  { %v1379_v31 = vpop.xlane.xlu0 %1378  ;;  %v1269_v32 = vpop.xlane.xlu1 %1268 }
 0x596   :  { %v1270_v33 = vsub.f32 %v6553_v45, %v1269_v32  ;;  %v1380_v35 = vsub.f32 %v6556_v46, %v1379_v31 }
 0x598   :  { %v1271_v34 = vmul.f32 1.442695, %v1270_v33  ;;  %v1381_v41 = vmul.f32 1.442695, %v1380_v35  ;;  %v5599_v35 = vld [vmem:[#allocation11 + $0x10] sm:$0xff]  }
 0x599   :  { %v1169_v36 = vpop.permute.xlu1 %1168  ;;  %v1279_v39 = vpop.permute.xlu0 %1278  ;;  %5320 = vmatpush3.bf16.msra.mxu0 %v5599_v35  ;;  %v5605_v35 = vld [vmem:[#allocation16 + $0xe8] ss:$16 sps:$4 sm:$0xff]  }
 0x59a   :  { %v1174_v37 = vsel %vm601_vm2, %v1169_v36, 0  ;;  %5834 = vpow2.f32 %v1271_v34  ;;  %v1284_v42 = vsel %vm601_vm2, %v1279_v39, 0  ;;  %v5600_v36 = vld [vmem:[#allocation11 + $0x8] sm:$0xff]   ;;  %5321 = vmatprep.subr.bf16.mxu0 %v6233_v4 }
 0x59b   :  { %5280 = vmatpush3.bf16.msra.mxu1 %v1174_v37  ;;  %5836 = vpow2.f32 %v1381_v41 }
 0x59c   :  { %5291 = vmatprep.subr.bf16.mxu1 %v6233_v4 }
 0x59d   :  { %v1389_v44 = vpop.permute.xlu1 %1388  ;;  %5322 = vmatpush3.bf16.msra.mxu0 %v5600_v36  ;;  %v5607_v36 = vld [vmem:[#allocation16 + $0xec] ss:$16 sps:$4 sm:$0xff]  }
 0x59e   :  { %5282 = vmatmul.mubr.msk.bf16.vlgmr.msra.gmra.mxu1 %vm586_vm3, %v1167_v40  ;;  %v1394_v47 = vsel %vm601_vm2, %v1389_v44, 0  ;;  %5323 = vmatprep.subr.bf16.mxu0 %v6233_v4 }
 0x59f   :  { %5292 = vmatpush3.bf16.msra.mxu1 %v1284_v42  ;;  %5293 = vmatprep.mubr.msk.bf16.mxu1 %vm6235_vm0, %v6233_v4 }
 0x5a0   :  { %5303 = vmatprep.subr.bf16.mxu1 %v6233_v4 }
 0x5a7   :  { %v5835_v43 = vpop.eup %5834 }
 0x5a8   :  { %v1273_v45 = vsel %vm586_vm3, %v5835_v43, 0.0  ;;  %v1277_v46 = vpack.c.bf16 %v5835_v43, %v5835_v43  ;;  %v5837_v49 = vpop.eup %5836  ;;  %v5601_v43 = vld [vmem:[#allocation11] sm:$0xff]  }
 0x5a9   :  { %1274 = vadd.xlane.f32.xlu1 %v1273_v45  ;;  %v1383_v52 = vsel %vm586_vm3, %v5837_v49, 0.0  ;;  %v1387_v56 = vpack.c.bf16 %v5837_v49, %v5837_v49  ;;  %5324 = vmatpush3.bf16.msra.mxu0 %v5601_v43 }
 0x5aa   :  { %5294 = vmatmul.mubr.msk.bf16.vlgmr.msra.gmra.mxu1 %vm586_vm3, %v1277_v46  ;;  %1865 = vmatprep.subr.bf16.mxu0 %v5607_v36  ;;  %v5652_v36 = vld [vmem:[#allocation17 + $0x38] sm:$0xff]  }
 0x5ab   :  { %5304 = vmatpush3.bf16.msra.mxu1 %v1394_v47  ;;  %5305 = vmatprep.mubr.msk.bf16.mxu1 %vm6235_vm0, %v6233_v4 }
 0x5ad   :  { %705 = vadd.xlane.f32.xlu1 %v704_v48 }
 0x5b1   :  { %1384 = vadd.xlane.f32.xlu1 %v1383_v52 }
 0x5b2   :  { %5306 = vmatmul.mubr.msk.bf16.vlgmr.msra.gmra.mxu1 %vm586_vm3, %v1387_v56 }
 0x5b3   :  { %1854 = vmatprep.mubr.bf16.mxu1 %v6234_v27 }
 0x5b5   :  { %1055 = vadd.xlane.f32.xlu1 %v1054_v57 }
 0x5ce   :  { %v817_v6 = vpop.xlane.xlu1 %816 }
 0x5f9   :  { %v1165_v16 = vpop.xlane.xlu0 %1164 }
 0x5fd   :  { %v927_v31 = vpop.xlane.xlu0 %926 }
 0x632   :  { %v1275_v38 = vpop.xlane.xlu1 %1274 }
 0x635   :  { %v752_v60 = vpop.f32.mrf.mxu1 }
 0x636   :  { %v706_v5 = vpop.xlane.xlu1 %705 }
 0x637   :  { %v5235_v62 = vpop.f32.mrf.mxu1  ;;  %5838 = vrcp.f32 %v706_v5 }
 0x638   :  { %5840 = vrcp.f32 %v1165_v16 }
 0x639   :  { %v755_v63 = vpop.f32.mrf.mxu1  ;;  %5842 = vrcp.f32 %v817_v6 }
 0x63a   :  { %5844 = vrcp.f32 %v1275_v38  ;;  %v1385_v33 = vpop.xlane.xlu1 %1384  ;;  %v595_v63 = vpop.xlane.xlu0 %594 }
 0x63b   :  { %v5236_v17 = vpop.f32.mrf.mxu1  ;;  %5846 = vrcp.f32 %v927_v31 }
 0x63c   :  { %5848 = vrcp.f32 %v1385_v33  ;;  %v5602_v33 = vld [vmem:[#allocation16 + $0xe0] ss:$16 sps:$4 sm:$0xff]  }
 0x63d   :  { %v862_v0 = vpop.f32.mrf.mxu1  ;;  %5850 = vrcp.f32 %v595_v63  ;;  %v5631_v63 = vld [vmem:[#allocation16 + $0x6c] ss:$16 sps:$4 sm:$0xff]  }
 0x63e   :  { %v1056_v17 = vpop.xlane.xlu1 %1055 }
 0x63f   :  { %v5247_v2 = vpop.f32.mrf.mxu1  ;;  %5852 = vrcp.f32 %v1056_v17  ;;  %v5626_v17 = vld [vmem:[#allocation16 + $0x60] ss:$16 sps:$4 sm:$0xff]  }
 0x641   :  { %v865_v3 = vpop.f32.mrf.mxu1 }
 0x643   :  { %v5248_v7 = vpop.f32.mrf.mxu1 }
 0x644   :  { %v5839_v23 = vpop.eup %5838 }
 0x645   :  { %v972_v8 = vpop.f32.mrf.mxu1  ;;  %v5841_v12 = vpop.eup %5840  ;;  %v758_v26 = vmul.f32 %v5839_v23, %v752_v60 }
 0x646   :  { %v5843_v37 = vpop.eup %5842 }
 0x647   :  { %v5259_v10 = vpop.f32.mrf.mxu1  ;;  %v5845_v39 = vpop.eup %5844  ;;  %v868_v41 = vmul.f32 %v5843_v37, %v862_v0 }
 0x648   :  { %v5847_v48 = vpop.eup %5846 }
 0x649   :  { %v975_v11 = vpop.f32.mrf.mxu1  ;;  %v5849_v49 = vpop.eup %5848  ;;  %v978_v56 = vmul.f32 %v5847_v48, %v972_v8  ;;  %v5616_v48 = vld [vmem:[#allocation16 + $0xa4] ss:$16 sps:$4 sm:$0xff]  }
 0x64a   :  { %v5851_v2 = vpop.eup %5850 }
 0x64b   :  { %v5260_v13 = vpop.f32.mrf.mxu1 }
 0x64c   :  { %v5853_v6 = vpop.eup %5852  ;;  %v645_v13 = vmul.f32 %v5851_v2, %v6540_v15  ;;  %v4767_v15 = vld [vmem:[%s7013_s7] ss:$0 sm:$0xff] }
 0x64d   :  { %v6615_v14 = vpop.f32.mrf.mxu1  ;;  %v5634_v2 = vld [vmem:[#allocation16 + $0x44] ss:$16 sps:$4 sm:$0xff]  }
 0x64e   :  { %v1106_v8 = vmul.f32 %v5853_v6, %v6615_v14  ;;  %v5632_v6 = vld [vmem:[#allocation16 + $0x40] ss:$16 sps:$4 sm:$0xff]  }
 0x64f   :  { %v5271_v18 = vpop.f32.mrf.mxu1 }
 0x651   :  { %v1103_v19 = vpop.f32.mrf.mxu1 }
 0x653   :  { %v5272_v20 = vpop.f32.mrf.mxu1 }
 0x65e   :  { %v1210_v24 = vpop.f32.mrf.mxu1 }
 0x65f   :  { %v1216_v53 = vmul.f32 %v5841_v12, %v1210_v24 }
 0x660   :  { %v5283_v28 = vpop.f32.mrf.mxu1 }
 0x661   :  { %v5532_v30 = vpack.i.bf16 %v1216_v53, %v758_v26 }
 0x662   :  { %v1213_v32 = vpop.f32.mrf.mxu1 }
 0x663   :  { %5533 = vrot.lane.b32.xlu0 %v5532_v30, %s6237_s1 }
 0x664   :  { %v5284_v34 = vpop.f32.mrf.mxu1 }
 0x665   :  { %v5604_v34 = vld [vmem:[#allocation16 + $0xe4] ss:$16 sps:$4 sm:$0xff]  }
 0x666   :  { %1822 = vmatprep.subr.bf16.mxu1 %v5604_v34  ;;  %v5650_v34 = vld [vmem:[#allocation17 + $0x78] sm:$0xff]  }
 0x667   :  { %1823 = vmatpush1.bf16.msra.mxu1 %v5602_v33 }
 0x66a   :  { %v1320_v40 = vpop.f32.mrf.mxu1 }
 0x66b   :  { %v1326_v42 = vmul.f32 %v5845_v39, %v1320_v40 }
 0x66c   :  { %v5295_v44 = vpop.f32.mrf.mxu1 }
 0x66d   :  { %v5537_v45 = vpack.i.bf16 %v1326_v42, %v868_v41  ;;  %v5610_v44 = vld [vmem:[#allocation16 + $0xc4] ss:$16 sps:$4 sm:$0xff]  }
 0x66e   :  { %v1323_v46 = vpop.f32.mrf.mxu1  ;;  %1824 = vmatprep.subr.bf16.mxu1 %v5610_v44  ;;  %v5661_v44 = vld [vmem:[#allocation17 + $0xa8] sm:$0xff]  }
 0x66f   :  { %5538 = vrot.lane.b32.xlu1 %v5537_v45, %s7039_s8  ;;  %v5613_v45 = vld [vmem:[#allocation16 + $0xcc] ss:$16 sps:$4 sm:$0xff]   ;;  %v5608_v46 = vld [vmem:[#allocation16 + $0xc0] ss:$16 sps:$4 sm:$0xff]  }
 0x670   :  { %v5296_v47 = vpop.f32.mrf.mxu1  ;;  %1825 = vmatpush1.bf16.msra.mxu1 %v5608_v46  ;;  %v5663_v46 = vld [vmem:[#allocation17 + $0xe0] sm:$0xff]  }
 0x671   :  { %v5611_v47 = vld [vmem:[#allocation16 + $0xc8] ss:$16 sps:$4 sm:$0xff]   ;;  %1826 = vmatprep.subr.bf16.mxu1 %v5616_v48  ;;  %v5665_v48 = vld [vmem:[#allocation17 + $0xa0] sm:$0xff]  }
 0x672   :  { %v1430_v52 = vpop.f32.mrf.mxu1 }
 0x673   :  { %v1436_v57 = vmul.f32 %v5849_v49, %v1430_v52  ;;  %v5619_v49 = vld [vmem:[#allocation16 + $0xac] ss:$16 sps:$4 sm:$0xff]   ;;  %v5614_v52 = vld [vmem:[#allocation16 + $0xa0] ss:$16 sps:$4 sm:$0xff]  }
 0x674   :  { %v5307_v58 = vpop.f32.mrf.mxu1  ;;  %1827 = vmatpush1.bf16.msra.mxu1 %v5614_v52  ;;  %v5667_v52 = vld [vmem:[#allocation17 + $0xd8] sm:$0xff]  }
 0x675   :  { %v5542_v59 = vpack.i.bf16 %v1436_v57, %v978_v56  ;;  %v5617_v56 = vld [vmem:[#allocation16 + $0xa8] ss:$16 sps:$4 sm:$0xff]   ;;  %v5620_v57 = vld [vmem:[#allocation16 + $0x80] ss:$16 sps:$4 sm:$0xff]   ;;  %v5622_v58 = vld [vmem:[#allocation16 + $0x84] ss:$16 sps:$4 sm:$0xff]  }
 0x676   :  { %v1433_v60 = vpop.f32.mrf.mxu1  ;;  %1828 = vmatprep.subr.bf16.mxu1 %v5622_v58  ;;  %v5670_v58 = vld [vmem:[#allocation17 + $0x50] sm:$0xff]  }
 0x677   :  { %5543 = vrot.lane.b32.xlu1 %v5542_v59, %s6236_s23  ;;  %v5623_v59 = vld [vmem:[#allocation16 + $0x88] ss:$16 sps:$4 sm:$0xff]   ;;  %v5625_v60 = vld [vmem:[#allocation16 + $0x8c] ss:$16 sps:$4 sm:$0xff]  }
 0x678   :  { %v5308_v62 = vpop.f32.mrf.mxu1  ;;  %1829 = vmatpush1.bf16.msra.mxu1 %v5620_v57  ;;  %v5669_v57 = vld [vmem:[#allocation17 + $0x98] sm:$0xff]  }
 0x679   :  { %v5628_v62 = vld [vmem:[#allocation16 + $0x64] ss:$16 sps:$4 sm:$0xff]  }
 0x67a   :  { %1830 = vmatprep.subr.bf16.mxu1 %v5628_v62  ;;  %v5673_v62 = vld [vmem:[#allocation17 + $0x90] sm:$0xff]  }
 0x67c   :  { %1831 = vmatpush1.bf16.msra.mxu1 %v5626_v17  ;;  %v5675_v17 = vld [vmem:[#allocation17 + $0xc8] sm:$0xff]  }
 0x67d   :  { %1832 = vmatprep.subr.bf16.mxu1 %v5634_v2  ;;  %v5677_v2 = vld [vmem:[#allocation17 + $0x88] sm:$0xff]  }
 0x680   :  { %1833 = vmatpush1.bf16.msra.mxu1 %v5632_v6  ;;  %v5679_v6 = vld [vmem:[#allocation17 + $0xc0] sm:$0xff]  }
 0x6d5   :  { %v5534_v0 = vpop.permute.xlu0 %5533 }
 0x6d6   :  { %v5536_v7 = vunpack.i.h.bf16 %v5534_v0  ;;  %v5535_v38 = vunpack.i.l.bf16 %v5534_v0  ;;  %v5629_v0 = vld [vmem:[#allocation16 + $0x68] ss:$16 sps:$4 sm:$0xff]  }
 0x6d8   :  { %v1449_v16 = vsel %vm539_vm1, %v1106_v8, %v5536_v7  ;;  %v991_v18 = vsel %vm539_vm1, %v645_v13, %v5535_v38  ;;  %v5635_v7 = vld [vmem:[#allocation16 + $0x48] ss:$16 sps:$4 sm:$0xff]   ;;  %v5640_v38 = vld [vmem:[#allocation16 + $0x24] ss:$16 sps:$4 sm:$0xff]  }
 0x6d9   :  { %v5641_v8 = vld [vmem:[#allocation16 + $0x28] ss:$16 sps:$4 sm:$0xff]   ;;  %1834 = vmatprep.subr.bf16.mxu1 %v5640_v38  ;;  %v5646_v13 = vld [vmem:[#allocation16 + $0x4] ss:$16 sps:$4 sm:$0xff]  }
 0x6da   :  { %v5681_v38 = vld [vmem:[#allocation17 + $0x80] sm:$0xff]  }
 0x6e1   :  { %v5539_v3 = vpop.permute.xlu1 %5538 }
 0x6e2   :  { %v5541_v10 = vunpack.i.h.bf16 %v5539_v3  ;;  %v5540_v11 = vunpack.i.l.bf16 %v5539_v3  ;;  %v5637_v3 = vld [vmem:[#allocation16 + $0x4c] ss:$16 sps:$4 sm:$0xff]  }
 0x6e4   :  { %v1450_v21 = vsel %vm992_vm4, %v1449_v16, %v5541_v10  ;;  %v993_v22 = vsel %vm992_vm4, %v991_v18, %v5540_v11  ;;  %v5643_v10 = vld [vmem:[#allocation16 + $0x2c] ss:$16 sps:$4 sm:$0xff]   ;;  %v5638_v11 = vld [vmem:[#allocation16 + $0x20] ss:$16 sps:$4 sm:$0xff]   ;;  %v5647_v18 = vld [vmem:[#allocation16 + $0x8] ss:$16 sps:$4 sm:$0xff]  }
 0x6e5   :  { %1835 = vmatpush1.bf16.msra.mxu1 %v5638_v11  ;;  %v5644_v16 = vld [vmem:[#allocation16] ss:$16 sps:$4 sm:$0xff]   ;;  %v1656_v11 = vsub.s32 3, %v6432_v54 }
 0x6e6   :  { %1836 = vmatprep.subr.bf16.mxu1 %v5646_v13 }
 0x6e9   :  { %v5544_v5 = vpop.permute.xlu1 %5543  ;;  %1837 = vmatpush1.bf16.msra.mxu1 %v5644_v16 }
 0x6ea   :  { %v5546_v19 = vunpack.i.h.bf16 %v5544_v5  ;;  %v5545_v20 = vunpack.i.l.bf16 %v5544_v5  ;;  %v5649_v5 = vld [vmem:[#allocation16 + $0xc] ss:$16 sps:$4 sm:$0xff]   ;;  %5037 = vmatprep.subr.bf16.mxu1 %v5650_v34 }
 0x6ec   :  { %v1451_v23 = vsel %vm994_vm5, %v1450_v21, %v5546_v19  ;;  %v995_v12 = vsel %vm994_vm5, %v993_v22, %v5545_v20 }
 0x6ed   :  { %v1469_v14 = vpack.c.bf16 %v1451_v23, %v995_v12 }
 0x6ef   :  { %5326 = vmatmul.mubr.bf16.vlgmr.msra.gmra.mxu0 %v1469_v14 }
 0x6f0   :  { %1897 = vmatprep.mubr.bf16.mxu0 %v6234_v27  ;;  %1866 = vmatpush1.bf16.msra.mxu0 %v5605_v35  ;;  %v5651_v35 = vld [vmem:[#allocation17 + $0xf8] sm:$0xff]  }
 0x6f1   :  { %1867 = vmatprep.subr.bf16.mxu0 %v5613_v45  ;;  %v5662_v45 = vld [vmem:[#allocation17 + $0x60] sm:$0xff]  }
 0x6f4   :  { %1868 = vmatpush1.bf16.msra.mxu0 %v5611_v47  ;;  %v5664_v47 = vld [vmem:[#allocation17 + $0x20] sm:$0xff]  }
 0x6f5   :  { %1869 = vmatprep.subr.bf16.mxu0 %v5619_v49  ;;  %v5666_v49 = vld [vmem:[#allocation17 + $0x58] sm:$0xff]  }
 0x6f8   :  { %1870 = vmatpush1.bf16.msra.mxu0 %v5617_v56  ;;  %v5668_v56 = vld [vmem:[#allocation17 + $0x18] sm:$0xff]  }
 0x6f9   :  { %1871 = vmatprep.subr.bf16.mxu0 %v5625_v60  ;;  %v5672_v60 = vld [vmem:[#allocation17 + $0x10] sm:$0xff]  }
 0x6fc   :  { %1872 = vmatpush1.bf16.msra.mxu0 %v5623_v59  ;;  %v5671_v59 = vld [vmem:[#allocation17 + $0xd0] sm:$0xff]  }
 0x6fd   :  { %1873 = vmatprep.subr.bf16.mxu0 %v5631_v63  ;;  %v5674_v63 = vld [vmem:[#allocation17 + $0x48] sm:$0xff]  }
 0x700   :  { %1874 = vmatpush1.bf16.msra.mxu0 %v5629_v0  ;;  %v5676_v0 = vld [vmem:[#allocation17 + $0x8] sm:$0xff]  }
 0x701   :  { %1875 = vmatprep.subr.bf16.mxu0 %v5637_v3  ;;  %v5678_v3 = vld [vmem:[#allocation17 + $0x40] sm:$0xff]  }
 0x704   :  { %1876 = vmatpush1.bf16.msra.mxu0 %v5635_v7  ;;  %v5680_v7 = vld [vmem:[#allocation17] sm:$0xff]  }
 0x705   :  { %1877 = vmatprep.subr.bf16.mxu0 %v5643_v10  ;;  %v1639_v10 = vld [vmem:[%s7017_s11] sm:$0xf] }
 0x706   :  { %v1653_v13 = vrot.slane %v1639_v10, %v6445_v1  ;;  %v1657_v16 = vrot.slane %v1639_v10, %v1656_v11 }
 0x708   :  { %1878 = vmatpush1.bf16.msra.mxu0 %v5641_v8  ;;  %v1645_v8 = vrot.slane %v1639_v10, %v6441_v61 }
 0x709   :  { %1879 = vmatprep.subr.bf16.mxu0 %v5649_v5  ;;  %v1649_v5 = vrot.slane %v1639_v10, %v6435_v55 }
 0x70c   :  { %1880 = vmatpush1.bf16.msra.mxu0 %v5647_v18 }
 0x70d   :  { %5059 = vmatprep.subr.bf16.mxu0 %v5651_v35 }
 0x7af   :  { %v1558_v24 = vpop.f32.mrf.mxu0 }
 0x7b0   :  { %v1559_v25 = vadd.f32 %v4767_v15, %v1558_v24  ;;  %v4776_v24 = vld [vmem:[#allocation13] ss:$0 sm:$0xff] }
 0x7b1   :  { %v5327_v26 = vpop.f32.mrf.mxu0 }
 0x7b2   :  { %v1565_v53 = vadd.f32 %v1559_v25, %v6422_v50 }
 0x7b3   :  { %v1561_v28 = vpop.f32.mrf.mxu0 }
 0x7b4   :  { %v1562_v30 = vadd.f32 %v4767_v15, %v1561_v28  ;;  %1569 = vadd.xlane.f32.xlu1 %v1565_v53  ;;  %v4777_v28 = vld [vmem:[#allocation14] ss:$0 sm:$0xff] }
 0x7b5   :  { %v5328_v31 = vpop.f32.mrf.mxu0 }
 0x7b6   :  { %v1566_v32 = vadd.f32 %v1562_v30, %v6424_v51 }
 0x7b8   :  { %1571 = vadd.xlane.f32.xlu0 %v1566_v32 }
 0x83d   :  { %v1570_v37 = vpop.xlane.xlu1 %1569 }
 0x83e   :  { %v1573_v39 = vmul.f32 0.0078125, %v1570_v37  ;;  %v5653_v37 = vld [vmem:[#allocation17 + $0xb8] sm:$0xff]  }
 0x840   :  { %v6639_v40 = vsub.f32 %v1565_v53, %v1573_v39  ;;  %v5654_v39 = vld [vmem:[#allocation17 + $0x70] sm:$0xff]  }
 0x841   :  { %v1572_v50 = vpop.xlane.xlu0 %1571 }
 0x842   :  { %v1574_v41 = vmul.f32 0.0078125, %v1572_v50  ;;  %v1577_v42 = vmul.f32 %v6639_v40, %v6639_v40  ;;  %v5656_v50 = vld [vmem:[#allocation17 + $0x30] sm:$0xff]  }
 0x844   :  { %v6643_v43 = vsub.f32 %v1566_v32, %v1574_v41  ;;  %1579 = vadd.xlane.f32.xlu0 %v1577_v42  ;;  %v5657_v41 = vld [vmem:[#allocation17 + $0xb0] sm:$0xff]   ;;  %v5658_v42 = vld [vmem:[#allocation17 + $0x68] sm:$0xff]  }
 0x846   :  { %v1578_v51 = vmul.f32 %v6643_v43, %v6643_v43 }
 0x848   :  { %1581 = vadd.xlane.f32.xlu0 %v1578_v51  ;;  %v5660_v51 = vld [vmem:[#allocation17 + $0x28] sm:$0xff]  }
 0x8cd   :  { %v1580_v19 = vpop.xlane.xlu0 %1579 }
 0x8ce   :  { %v1583_v20 = vmul.f32 0.0078125, %v1580_v19 }
 0x8d0   :  { %v1585_v21 = vadd.f32 1e-12, %v1583_v20 }
 0x8d1   :  { %v1582_v22 = vpop.xlane.xlu0 %1581 }
 0x8d2   :  { %5854 = vrsqrt.f32 %v1585_v21  ;;  %v1584_v23 = vmul.f32 0.0078125, %v1582_v22 }
 0x8d4   :  { %v1586_v12 = vadd.f32 1e-12, %v1584_v23 }
 0x8d6   :  { %5856 = vrsqrt.f32 %v1586_v12 }
 0x8df   :  { %v5855_v14 = vpop.eup %5854 }
 0x8e0   :  { %v1589_v15 = vmul.f32 %v5855_v14, %v6639_v40  ;;  %v5655_v40 = vld [vmem:[#allocation17 + $0xf0] sm:$0xff]  }
 0x8e2   :  { %v1597_v53 = vmul.f32 %v4776_v24, %v1589_v15 }
 0x8e3   :  { %v5857_v25 = vpop.eup %5856 }
 0x8e4   :  { %v1590_v26 = vmul.f32 %v5857_v25, %v6643_v43  ;;  %v6649_v31 = vadd.f32 %v4777_v28, %v1597_v53  ;;  %v5659_v43 = vld [vmem:[#allocation17 + $0xe8] sm:$0xff]  }
 0x8e6   :  { %v1598_v30 = vmul.f32 %v4776_v24, %v1590_v26 }
 0x8e8   :  { %v6651_v32 = vadd.f32 %v4777_v28, %v1598_v30 }
 0x8ea   :  { %v1640_v33 = vpack.c.bf16 %v6651_v32, %v6649_v31 }
 0x8ec   :  { %1855 = vmatmul.mubr.bf16.vlgmr.msra.gmra.mxu1 %v1640_v33  ;;  %1898 = vmatmul.mubr.bf16.vlgmr.msra.gmra.mxu0 %v1640_v33 }
 0x8ed   :  { %5038 = vmatpush3.bf16.msra.mxu1 %v5652_v36  ;;  %5060 = vmatpush3.bf16.msra.mxu0 %v5653_v37 }
 0x8ee   :  { %5039 = vmatprep.subr.bf16.mxu1 %v5654_v39  ;;  %5061 = vmatprep.subr.bf16.mxu0 %v5655_v40 }
 0x8f1   :  { %5040 = vmatpush3.bf16.msra.mxu1 %v5656_v50  ;;  %5062 = vmatpush3.bf16.msra.mxu0 %v5657_v41 }
 0x8f2   :  { %5041 = vmatprep.subr.bf16.mxu1 %v5658_v42  ;;  %5063 = vmatprep.subr.bf16.mxu0 %v5659_v43 }
 0x8f5   :  { %5042 = vmatpush3.bf16.msra.mxu1 %v5660_v51  ;;  %5064 = vmatpush3.bf16.msra.mxu0 %v5661_v44 }
 0x8f6   :  { %5043 = vmatprep.subr.bf16.mxu1 %v5662_v45  ;;  %5065 = vmatprep.subr.bf16.mxu0 %v5663_v46 }
 0x8f9   :  { %5044 = vmatpush3.bf16.msra.mxu1 %v5664_v47  ;;  %5066 = vmatpush3.bf16.msra.mxu0 %v5665_v48 }
 0x8fa   :  { %5045 = vmatprep.subr.bf16.mxu1 %v5666_v49  ;;  %5067 = vmatprep.subr.bf16.mxu0 %v5667_v52 }
 0x8fd   :  { %5046 = vmatpush3.bf16.msra.mxu1 %v5668_v56  ;;  %5068 = vmatpush3.bf16.msra.mxu0 %v5669_v57 }
 0x8fe   :  { %5047 = vmatprep.subr.bf16.mxu1 %v5670_v58  ;;  %5069 = vmatprep.subr.bf16.mxu0 %v5671_v59 }
 0x901   :  { %5048 = vmatpush3.bf16.msra.mxu1 %v5672_v60  ;;  %5070 = vmatpush3.bf16.msra.mxu0 %v5673_v62 }
 0x902   :  { %5049 = vmatprep.subr.bf16.mxu1 %v5674_v63  ;;  %5071 = vmatprep.subr.bf16.mxu0 %v5675_v17 }
 0x905   :  { %5050 = vmatpush3.bf16.msra.mxu1 %v5676_v0  ;;  %5072 = vmatpush3.bf16.msra.mxu0 %v5677_v2 }
 0x906   :  { %5051 = vmatprep.subr.bf16.mxu1 %v5678_v3  ;;  %5073 = vmatprep.subr.bf16.mxu0 %v5679_v6 }
 0x909   :  { %5052 = vmatpush3.bf16.msra.mxu1 %v5680_v7  ;;  %5074 = vmatpush3.bf16.msra.mxu0 %v5681_v38 }
 0x90a   :  { %5329 = vmatprep.subr.bf16.mxu0 %v6233_v4 }
 0x9ac   :  { %v1856_v18 = vpop.f32.mrf.mxu1  ;;  %v1899_v19 = vpop.f32.mrf.mxu0 }
 0x9ad   :  { %v6665_v20 = vadd.f32 %v1856_v18, %v1645_v8  ;;  %v6667_v21 = vadd.f32 %v1899_v19, %v1653_v13 }
 0x9ae   :  { %v1858_v22 = vpop.f32.mrf.mxu1  ;;  %v1901_v23 = vpop.f32.mrf.mxu0 }
 0x9af   :  { %v1916_v12 = vmul.f32 0.044715, %v6665_v20  ;;  %v1918_v14 = vmul.f32 0.044715, %v6667_v21  ;;  %v1859_v15 = vadd.f32 %v1858_v22, %v1649_v5  ;;  %v6671_v24 = vadd.f32 %v1901_v23, %v1657_v16 }
 0x9b0   :  { %v1860_v25 = vpop.f32.mrf.mxu1  ;;  %v1903_v26 = vpop.f32.mrf.mxu0 }
 0x9b1   :  { %v1924_v53 = vmul.f32 %v1916_v12, %v6665_v20  ;;  %v1926_v28 = vmul.f32 %v1918_v14, %v6667_v21  ;;  %v1917_v30 = vmul.f32 0.044715, %v1859_v15  ;;  %v1919_v33 = vmul.f32 0.044715, %v6671_v24 }
 0x9b2   :  { %v1861_v34 = vadd.f32 %v1860_v25, %v1645_v8  ;;  %v6676_v35 = vadd.f32 %v1903_v26, %v1653_v13  ;;  %v1862_v36 = vpop.f32.mrf.mxu1  ;;  %v1905_v37 = vpop.f32.mrf.mxu0 }
 0x9b3   :  { %v1932_v39 = vmul.f32 %v1924_v53, %v6665_v20  ;;  %v1934_v40 = vmul.f32 %v1926_v28, %v6667_v21  ;;  %v1925_v50 = vmul.f32 %v1917_v30, %v1859_v15  ;;  %v1927_v41 = vmul.f32 %v1919_v33, %v6671_v24 }
 0x9b4   :  { %v1920_v42 = vmul.f32 0.044715, %v1861_v34  ;;  %v1922_v43 = vmul.f32 0.044715, %v6676_v35  ;;  %v1863_v51 = vadd.f32 %v1862_v36, %v1649_v5  ;;  %v1906_v44 = vadd.f32 %v1905_v37, %v1657_v16 }
 0x9b5   :  { %v1940_v45 = vadd.f32 %v1932_v39, %v6665_v20  ;;  %v1942_v46 = vadd.f32 %v1934_v40, %v6667_v21  ;;  %v1933_v47 = vmul.f32 %v1925_v50, %v1859_v15  ;;  %v1935_v48 = vmul.f32 %v1927_v41, %v6671_v24 }
 0x9b6   :  { %v1928_v49 = vmul.f32 %v1920_v42, %v1861_v34  ;;  %v1930_v52 = vmul.f32 %v1922_v43, %v6676_v35  ;;  %v1921_v56 = vmul.f32 0.044715, %v1863_v51  ;;  %v1923_v57 = vmul.f32 0.044715, %v1906_v44 }
 0x9b7   :  { %v1948_v58 = vmul.f32 0.7978846, %v1940_v45  ;;  %v1950_v59 = vmul.f32 0.7978846, %v1942_v46  ;;  %v1941_v60 = vadd.f32 %v1933_v47, %v1859_v15  ;;  %v1943_v3 = vadd.f32 %v1935_v48, %v6671_v24 }
 0x9b8   :  { %v1936_v62 = vmul.f32 %v1928_v49, %v1861_v34  ;;  %v1938_v63 = vmul.f32 %v1930_v52, %v6676_v35  ;;  %v1929_v17 = vmul.f32 %v1921_v56, %v1863_v51  ;;  %v1931_v0 = vmul.f32 %v1923_v57, %v1906_v44 }
 0x9b9   :  { %v1949_v2 = vmul.f32 0.7978846, %v1941_v60  ;;  %5858 = vtanh.f32 %v1948_v58  ;;  %v1951_v8 = vmul.f32 0.7978846, %v1943_v3  ;;  %v1909_v28 = vmul.f32 0.5, %v1859_v15 }
 0x9ba   :  { %v1944_v6 = vadd.f32 %v1936_v62, %v1861_v34  ;;  %v1946_v7 = vadd.f32 %v1938_v63, %v6676_v35  ;;  %v1937_v38 = vmul.f32 %v1929_v17, %v1863_v51  ;;  %5860 = vtanh.f32 %v1950_v59 }
 0x9bb   :  { %v1939_v10 = vmul.f32 %v1931_v0, %v1906_v44  ;;  %5862 = vtanh.f32 %v1949_v2  ;;  %v1908_v33 = vmul.f32 0.5, %v6665_v20  ;;  %v1912_v40 = vmul.f32 0.5, %v1861_v34 }
 0x9bc   :  { %v1952_v13 = vmul.f32 0.7978846, %v1944_v6  ;;  %v1954_v5 = vmul.f32 0.7978846, %v1946_v7  ;;  %v1945_v16 = vadd.f32 %v1937_v38, %v1863_v51  ;;  %5864 = vtanh.f32 %v1951_v8 }
 0x9bd   :  { %v1947_v18 = vadd.f32 %v1939_v10, %v1906_v44  ;;  %v1913_v43 = vmul.f32 0.5, %v1863_v51  ;;  %v1914_v46 = vmul.f32 0.5, %v6676_v35  ;;  %v1911_v48 = vmul.f32 0.5, %v6671_v24 }
 0x9be   :  { %5866 = vtanh.f32 %v1952_v13  ;;  %v1953_v19 = vmul.f32 0.7978846, %v1945_v16  ;;  %v1915_v49 = vmul.f32 0.5, %v1906_v44  ;;  %v1910_v20 = vmul.f32 0.5, %v6667_v21  ;;  %v4810_v44 = vld [vmem:[%s7019_s13] ss:$0 sm:$0xff] }
 0x9bf   :  { %5868 = vtanh.f32 %v1954_v5  ;;  %v1955_v22 = vmul.f32 0.7978846, %v1947_v18 }
 0x9c0   :  { %5870 = vtanh.f32 %v1953_v19 }
 0x9c1   :  { %5872 = vtanh.f32 %v1955_v22 }
 0x9c6   :  { %v5859_v23 = vpop.eup %5858 }
 0x9c7   :  { %v5861_v12 = vpop.eup %5860  ;;  %v1964_v50 = vadd.f32 1.0, %v5859_v23 }
 0x9c8   :  { %v5863_v14 = vpop.eup %5862  ;;  %v1966_v47 = vadd.f32 1.0, %v5861_v12 }
 0x9c9   :  { %v5865_v25 = vpop.eup %5864  ;;  %v1965_v30 = vadd.f32 1.0, %v5863_v14  ;;  %v1972_v60 = vmul.f32 %v1964_v50, %v1908_v33  ;;  %v5682_v14 = vld [vmem:[#allocation10 + $0x168] ss:$12 sps:$4 sm:$0xff]   ;;  %v5689_v50 = vld [vmem:[#allocation10 + $0x158] ss:$12 sps:$4 sm:$0xff]  }
 0x9ca   :  { %v1967_v39 = vadd.f32 1.0, %v5865_v25  ;;  %v1974_v63 = vmul.f32 %v1966_v47, %v1910_v20  ;;  %v5684_v25 = vld [vmem:[#allocation10 + $0x16c] ss:$12 sps:$4 sm:$0xff]   ;;  %v5708_v20 = vld [vmem:[#allocation10 + $0xdc] ss:$12 sps:$4 sm:$0xff]  }
 0x9cb   :  { %v5867_v26 = vpop.eup %5866  ;;  %v1973_v56 = vmul.f32 %v1965_v30, %v1909_v28  ;;  %2551 = vmatprep.subr.bf16.mxu1 %v5684_v25  ;;  %v5694_v47 = vld [vmem:[#allocation10 + $0x120] ss:$12 sps:$4 sm:$0xff]  }
 0x9cc   :  { %v5869_v53 = vpop.eup %5868  ;;  %v1968_v36 = vadd.f32 1.0, %v5867_v26  ;;  %v1975_v59 = vmul.f32 %v1967_v39, %v1911_v48  ;;  %v5685_v26 = vld [vmem:[#allocation10 + $0x170] ss:$12 sps:$4 sm:$0xff]   ;;  %v5700_v48 = vld [vmem:[#allocation10 + $0x10c] ss:$12 sps:$4 sm:$0xff]  }
 0x9cd   :  { %v5871_v37 = vpop.eup %5870  ;;  %v1970_v41 = vadd.f32 1.0, %v5869_v53  ;;  %v5686_v39 = vld [vmem:[#allocation10 + $0x150] ss:$12 sps:$4 sm:$0xff]  }
 0x9ce   :  { %v5873_v42 = vpop.eup %5872  ;;  %v1969_v45 = vadd.f32 1.0, %v5871_v37  ;;  %v1976_v15 = vmul.f32 %v1968_v36, %v1912_v40  ;;  %v5688_v40 = vld [vmem:[#allocation10 + $0x154] ss:$12 sps:$4 sm:$0xff]  }
 0x9cf   :  { %v1971_v52 = vadd.f32 1.0, %v5873_v42  ;;  %v1978_v58 = vmul.f32 %v1970_v41, %v1914_v46  ;;  %v5690_v41 = vld [vmem:[#allocation10 + $0x138] ss:$12 sps:$4 sm:$0xff]   ;;  %v5692_v42 = vld [vmem:[#allocation10 + $0x13c] ss:$12 sps:$4 sm:$0xff]  }
 0x9d0   :  { %v1977_v57 = vmul.f32 %v1969_v45, %v1913_v43  ;;  %v2045_v17 = vpack.c.bf16 %v1976_v15, %v1972_v60  ;;  %v5693_v43 = vld [vmem:[#allocation10 + $0x140] ss:$12 sps:$4 sm:$0xff]   ;;  %v5696_v45 = vld [vmem:[#allocation10 + $0x124] ss:$12 sps:$4 sm:$0xff]   ;;  %v5697_v46 = vld [vmem:[#allocation10 + $0x128] ss:$12 sps:$4 sm:$0xff]  }
 0x9d1   :  { %v1979_v34 = vmul.f32 %v1971_v52, %v1915_v49  ;;  %v2047_v35 = vpack.c.bf16 %v1978_v58, %v1974_v63  ;;  %v5701_v49 = vld [vmem:[#allocation10 + $0x110] ss:$12 sps:$4 sm:$0xff]   ;;  %v5698_v52 = vld [vmem:[#allocation10 + $0x108] ss:$12 sps:$4 sm:$0xff]   ;;  %v5709_v58 = vld [vmem:[#allocation10 + $0xe0] ss:$12 sps:$4 sm:$0xff]  }
 0x9d2   :  { %v2046_v62 = vpack.c.bf16 %v1977_v57, %v1973_v56  ;;  %v5704_v15 = vld [vmem:[#allocation10 + $0xf4] ss:$12 sps:$4 sm:$0xff]   ;;  %v5705_v56 = vld [vmem:[#allocation10 + $0xf8] ss:$12 sps:$4 sm:$0xff]   ;;  %v5702_v57 = vld [vmem:[#allocation10 + $0xf0] ss:$12 sps:$4 sm:$0xff]  }
 0x9d3   :  { %v2048_v51 = vpack.c.bf16 %v1979_v34, %v1975_v59  ;;  %v5706_v59 = vld [vmem:[#allocation10 + $0xd8] ss:$12 sps:$4 sm:$0xff]   ;;  %v5713_v60 = vld [vmem:[#allocation10 + $0xc8] ss:$12 sps:$4 sm:$0xff]  }
 0x9d4   :  { %2279 = vmatprep.mubr.bf16.mxu1 %v2046_v62  ;;  %v5712_v34 = vld [vmem:[#allocation10 + $0xc4] ss:$12 sps:$4 sm:$0xff]   ;;  %v5710_v62 = vld [vmem:[#allocation10 + $0xc0] ss:$12 sps:$4 sm:$0xff]  }
 0x9d5   :  { %2320 = vmatprep.mubr.bf16.mxu0 %v2048_v51  ;;  %2280 = vmatmul.mubr.bf16.vlgmr.msra.gmra.mxu1 %v2045_v17 }
 0x9d6   :  { %2321 = vmatmul.mubr.bf16.vlgmr.msra.gmra.mxu0 %v2047_v35  ;;  %2583 = vmatprep.mubr.bf16.mxu1 %v6234_v27 }
 0x9d7   :  { %5345 = vmatprep.mubr.msk.bf16.mxu0 %vm6235_vm0, %v6233_v4  ;;  %5330 = vmatpush3.bf16.msra.mxu0 %v5685_v26 }
 0x9d8   :  { %2552 = vmatpush1.bf16.msra.mxu1 %v5682_v14  ;;  %5331 = vmatprep.subr.bf16.mxu0 %v6233_v4 }
 0x9d9   :  { %2553 = vmatprep.subr.bf16.mxu1 %v5688_v40 }
 0x9db   :  { %5332 = vmatpush3.bf16.msra.mxu0 %v5689_v50 }
 0x9dc   :  { %2554 = vmatpush1.bf16.msra.mxu1 %v5686_v39  ;;  %5333 = vmatprep.subr.bf16.mxu0 %v6233_v4 }
 0x9dd   :  { %2555 = vmatprep.subr.bf16.mxu1 %v5692_v42 }
 0x9df   :  { %5334 = vmatpush3.bf16.msra.mxu0 %v5693_v43 }
 0x9e0   :  { %2556 = vmatpush1.bf16.msra.mxu1 %v5690_v41  ;;  %5335 = vmatprep.subr.bf16.mxu0 %v6233_v4 }
 0x9e1   :  { %2557 = vmatprep.subr.bf16.mxu1 %v5696_v45 }
 0x9e3   :  { %5336 = vmatpush3.bf16.msra.mxu0 %v5697_v46 }
 0x9e4   :  { %2558 = vmatpush1.bf16.msra.mxu1 %v5694_v47  ;;  %5337 = vmatprep.subr.bf16.mxu0 %v6233_v4 }
 0x9e5   :  { %2559 = vmatprep.subr.bf16.mxu1 %v5700_v48 }
 0x9e7   :  { %5338 = vmatpush3.bf16.msra.mxu0 %v5701_v49 }
 0x9e8   :  { %2560 = vmatpush1.bf16.msra.mxu1 %v5698_v52  ;;  %5339 = vmatprep.subr.bf16.mxu0 %v6233_v4 }
 0x9e9   :  { %2561 = vmatprep.subr.bf16.mxu1 %v5704_v15 }
 0x9eb   :  { %5340 = vmatpush3.bf16.msra.mxu0 %v5705_v56 }
 0x9ec   :  { %2562 = vmatpush1.bf16.msra.mxu1 %v5702_v57  ;;  %5341 = vmatprep.subr.bf16.mxu0 %v6233_v4 }
 0x9ed   :  { %2563 = vmatprep.subr.bf16.mxu1 %v5708_v20 }
 0x9ef   :  { %5342 = vmatpush3.bf16.msra.mxu0 %v5709_v58 }
 0x9f0   :  { %2564 = vmatpush1.bf16.msra.mxu1 %v5706_v59  ;;  %5343 = vmatprep.subr.bf16.mxu0 %v6233_v4 }
 0x9f1   :  { %2565 = vmatprep.subr.bf16.mxu1 %v5712_v34 }
 0x9f3   :  { %5344 = vmatpush3.bf16.msra.mxu0 %v5713_v60 }
 0x9f4   :  { %2566 = vmatpush1.bf16.msra.mxu1 %v5710_v62  ;;  %5373 = vmatprep.subr.bf16.mxu0 %v6233_v4 }
 0x9f5   :  { %5349 = vmatprep.subr.bf16.mxu1 %v6233_v4 }
 0xa95   :  { %v5053_v24 = vpop.f32.mrf.mxu1 }
 0xa96   :  { %v5075_v21 = vpop.f32.mrf.mxu0 }
 0xa97   :  { %v5054_v0 = vpop.f32.mrf.mxu1 }
 0xa98   :  { %v5055_v2 = vadd.f32 %v5054_v0, %v5053_v24  ;;  %v5076_v3 = vpop.f32.mrf.mxu0 }
 0xa99   :  { %v5056_v6 = vpop.f32.mrf.mxu1  ;;  %v5077_v38 = vadd.f32 %v5076_v3, %v5075_v21 }
 0xa9a   :  { %v2282_v7 = vadd.f32 %v5055_v2, %v4810_v44  ;;  %v5078_v10 = vpop.f32.mrf.mxu0  ;;  %v4843_v2 = vld [vmem:[%s7020_s14] ss:$0 sm:$0xff] }
 0xa9b   :  { %v5057_v8 = vpop.f32.mrf.mxu1 }
 0xa9c   :  { %v2323_v13 = vadd.f32 %v5077_v38, %v2282_v7  ;;  %v5058_v5 = vadd.f32 %v5057_v8, %v5056_v6  ;;  %v5079_v16 = vpop.f32.mrf.mxu0  ;;  %v4844_v38 = vld [vmem:[%s7021_s15] ss:$0 sm:$0xff] }
 0xa9d   :  { %v5080_v19 = vadd.f32 %v5079_v16, %v5078_v10 }
 0xa9e   :  { %v2285_v18 = vadd.f32 %v5058_v5, %v4810_v44  ;;  %v2329_v22 = vadd.f32 %v2323_v13, %v6649_v31 }
 0xaa0   :  { %v2326_v23 = vadd.f32 %v5080_v19, %v2285_v18  ;;  %2333 = vadd.xlane.f32.xlu1 %v2329_v22  ;;  %v4845_v19 = vld [vmem:[%s7011_s5 + $0x3] sm:$0x7] }
 0xaa2   :  { %v2330_v12 = vadd.f32 %v2326_v23, %v6651_v32 }
 0xaa4   :  { %2335 = vadd.xlane.f32.xlu0 %v2330_v12 }
 0xb29   :  { %v2334_v53 = vpop.xlane.xlu1 %2333 }
 0xb2a   :  { %v2337_v28 = vmul.f32 0.0078125, %v2334_v53 }
 0xb2c   :  { %v6702_v30 = vsub.f32 %v2329_v22, %v2337_v28  ;;  %v2411_v28 = vrot.slane %v4845_v19, %v6441_v61 }
 0xb2d   :  { %v2336_v33 = vpop.xlane.xlu0 %2335 }
 0xb2e   :  { %v2338_v36 = vmul.f32 0.0078125, %v2336_v33  ;;  %v2341_v31 = vmul.f32 %v6702_v30, %v6702_v30 }
 0xb30   :  { %v6706_v37 = vsub.f32 %v2330_v12, %v2338_v36  ;;  %2343 = vadd.xlane.f32.xlu1 %v2341_v31  ;;  %v2415_v12 = vrot.slane %v4845_v19, %v6435_v55  ;;  %v2419_v36 = vrot.slane %v4845_v19, %v6445_v1 }
 0xb32   :  { %v2342_v32 = vmul.f32 %v6706_v37, %v6706_v37 }
 0xb34   :  { %2345 = vadd.xlane.f32.xlu0 %v2342_v32 }
 0xbb9   :  { %v2344_v63 = vpop.xlane.xlu1 %2343 }
 0xbba   :  { %v2347_v51 = vmul.f32 0.0078125, %v2344_v63 }
 0xbbc   :  { %v2349_v17 = vadd.f32 1e-12, %v2347_v51 }
 0xbbd   :  { %v2346_v35 = vpop.xlane.xlu0 %2345 }
 0xbbe   :  { %5874 = vrsqrt.f32 %v2349_v17  ;;  %v2348_v24 = vmul.f32 0.0078125, %v2346_v35 }
 0xbc0   :  { %v2350_v21 = vadd.f32 1e-12, %v2348_v24 }
 0xbc2   :  { %5876 = vrsqrt.f32 %v2350_v21 }
 0xbcb   :  { %v5875_v44 = vpop.eup %5874 }
 0xbcc   :  { %v2353_v0 = vmul.f32 %v5875_v44, %v6702_v30 }
 0xbce   :  { %v2361_v7 = vmul.f32 %v4843_v2, %v2353_v0 }
 0xbcf   :  { %v5877_v3 = vpop.eup %5876 }
 0xbd0   :  { %v2354_v6 = vmul.f32 %v5877_v3, %v6706_v37  ;;  %v6726_v8 = vadd.f32 %v4844_v38, %v2361_v7 }
 0xbd2   :  { %v2362_v10 = vmul.f32 %v4843_v2, %v2354_v6 }
 0xbd4   :  { %v6728_v13 = vadd.f32 %v4844_v38, %v2362_v10 }
 0xbd6   :  { %v2406_v5 = vpack.c.bf16 %v6728_v13, %v6726_v8 }
 0xbd8   :  { %2584 = vmatmul.mubr.bf16.vlgmr.msra.gmra.mxu1 %v2406_v5  ;;  %5346 = vmatmul.mubr.bf16.vlgmr.msra.gmra.mxu0 %v2406_v5 }
 0xbd9   :  { %5351 = vmatprep.mubr.msk.bf16.mxu1 %vm6235_vm0, %v6233_v4  ;;  %5375 = vmatprep.mubr.msk.bf16.mxu0 %vm6235_vm0, %v6233_v4 }
 0xc98   :  { %v2585_v16 = vpop.f32.mrf.mxu1  ;;  %v2628_v18 = vpop.f32.mrf.mxu0 }
 0xc99   :  { %v2586_v32 = vadd.f32 %v2585_v16, %v2411_v28  ;;  %v2629_v50 = vadd.f32 %v2628_v18, %v2419_v36 }
 0xc9a   :  { %v2587_v22 = vpop.f32.mrf.mxu1  ;;  %v5347_v23 = vpop.f32.mrf.mxu0 }
 0xc9b   :  { %v2588_v30 = vadd.f32 %v2587_v22, %v2415_v12  ;;  %v2635_v42 = vmul.f32 0.17677669, %v2586_v32 }
 0xc9c   :  { %v2589_v14 = vpop.f32.mrf.mxu1  ;;  %v2631_v25 = vpop.f32.mrf.mxu0 }
 0xc9d   :  { %v2590_v31 = vadd.f32 %v2589_v14, %v2411_v28  ;;  %v2632_v39 = vadd.f32 %v2631_v25, %v2419_v36 }
 0xc9e   :  { %v2591_v26 = vpop.f32.mrf.mxu1  ;;  %v5348_v53 = vpop.f32.mrf.mxu0 }
 0xc9f   :  { %v2592_v33 = vadd.f32 %v2591_v26, %v2415_v12  ;;  %v2636_v41 = vmul.f32 0.17677669, %v2590_v31  ;;  %v6745_v43 = vpack.c.bf16 %v2632_v39, %v2629_v50 }
 0xca1   :  { %v2638_v37 = vpack.c.bf16 %v2592_v33, %v2588_v30  ;;  %v2637_v45 = vpack.c.bf16 %v2636_v41, %v2635_v42  ;;  %v2701_v47 = vsel %vm601_vm2, %v6745_v43, 0 }
 0xca3   :  { %2748 = vrot.lane.b32.xlu0 %v2638_v37, %s6236_s23  ;;  %v2644_v40 = vsel %vm539_vm1, %v2638_v37, 0  ;;  %v3093_v46 = vrot.slane %v2638_v37, 4  ;;  %v3092_v20 = vrot.slane %v2637_v45, 4 }
 0xca4   :  { %5350 = vmatpush3.bf16.xpose.msra.mxu1 %v2644_v40 }
 0xca5   :  { %5355 = vmatprep.subr.bf16.mxu1 %v6233_v4  ;;  %v3098_v38 = vsel %vm539_vm1, %v3093_v46, 0 }
 0xca7   :  { %2969 = vrot.lane.b32.xlu0 %v2638_v37, %s6237_s1 }
 0xcab   :  { %3201 = vrot.lane.b32.xlu0 %v3093_v46, %s6236_s23  ;;  %5352 = vmatmul.mubr.msk.bf16.vlgmr.msra.gmra.mxu1 %vm539_vm1, %v2637_v45 }
 0xcac   :  { %5356 = vmatpush3.bf16.msra.mxu1 %v2701_v47  ;;  %5357 = vmatprep.mubr.msk.bf16.mxu1 %vm6235_vm0, %v6233_v4 }
 0xcad   :  { %5361 = vmatprep.subr.bf16.mxu1 %v6233_v4 }
 0xcaf   :  { %3311 = vrot.lane.b32.xlu0 %v3093_v46, %s7039_s8 }
 0xcb3   :  { %3421 = vrot.lane.b32.xlu0 %v3093_v46, %s6237_s1 }
 0xcb7   :  { %2808 = vrot.lane.b32.xlu0 %v6745_v43, %s6236_s23 }
 0xd15   :  { %v2749_v58 = vpop.permute.xlu0 %2748 }
 0xd16   :  { %v2754_v6 = vsel %vm539_vm1, %v2749_v58, 0 }
 0xd19   :  { %v2970_v60 = vpop.permute.xlu0 %2969 }
 0xd1a   :  { %v2975_v44 = vsel %vm539_vm1, %v2970_v60, 0 }
 0xd1d   :  { %v3202_v51 = vpop.permute.xlu0 %3201 }
 0xd1e   :  { %v3207_v16 = vsel %vm539_vm1, %v3202_v51, 0 }
 0xd21   :  { %v3312_v24 = vpop.permute.xlu0 %3311 }
 0xd22   :  { %v3317_v19 = vsel %vm539_vm1, %v3312_v24, 0 }
 0xd25   :  { %v3422_v3 = vpop.permute.xlu0 %3421 }
 0xd26   :  { %v3427_v23 = vsel %vm539_vm1, %v3422_v3, 0 }
 0xd29   :  { %v2809_v10 = vpop.permute.xlu0 %2808 }
 0xd2a   :  { %v2814_v5 = vsel %vm601_vm2, %v2809_v10, 0 }
 0xd6b   :  { %v2680_v48 = vpop.f32.mrf.mxu1 }
 0xd6c   :  { %v2681_v49 = vadd.f32 %v2680_v48, %v6477_v29 }
 0xd6d   :  { %v5353_v52 = vpop.f32.mrf.mxu1 }
 0xd6e   :  { %v2686_v15 = vsel %vm586_vm3, %v2681_v49, -inf }
 0xd6f   :  { %2687 = vmax.xlane.f32.xlu1 %v2686_v15  ;;  %v2683_v56 = vpop.f32.mrf.mxu1 }
 0xd71   :  { %v5354_v57 = vpop.f32.mrf.mxu1 }
 0xd80   :  { %2745 = vrot.lane.b32.xlu1 %v2637_v45, %s6236_s23 }
 0xd84   :  { %2859 = vrot.lane.b32.xlu1 %v2638_v37, %s7039_s8 }
 0xd88   :  { %2857 = vrot.lane.b32.xlu1 %v2637_v45, %s7039_s8 }
 0xd8c   :  { %2967 = vrot.lane.b32.xlu1 %v2637_v45, %s6237_s1 }
 0xd90   :  { %3199 = vrot.lane.b32.xlu1 %v3092_v20, %s6236_s23 }
 0xd94   :  { %3309 = vrot.lane.b32.xlu1 %v3092_v20, %s7039_s8 }
 0xd98   :  { %3419 = vrot.lane.b32.xlu1 %v3092_v20, %s6237_s1 }
 0xdf8   :  { %v2688_v59 = vpop.xlane.xlu1 %2687 }
 0xdf9   :  { %v2689_v34 = vsub.f32 %v2681_v49, %v2688_v59 }
 0xdfb   :  { %v2690_v62 = vmul.f32 1.442695, %v2689_v34 }
 0xdfc   :  { %v2746_v63 = vpop.permute.xlu1 %2745 }
 0xdfd   :  { %5878 = vpow2.f32 %v2690_v62 }
 0xe00   :  { %v2860_v17 = vpop.permute.xlu1 %2859 }
 0xe01   :  { %v2865_v35 = vsel %vm539_vm1, %v2860_v17, 0 }
 0xe02   :  { %5374 = vmatpush3.bf16.xpose.msra.mxu0 %v2865_v35 }
 0xe03   :  { %5385 = vmatprep.subr.bf16.mxu0 %v6233_v4 }
 0xe04   :  { %v2858_v21 = vpop.permute.xlu1 %2857 }
 0xe08   :  { %v2968_v7 = vpop.permute.xlu1 %2967 }
 0xe09   :  { %5376 = vmatmul.mubr.msk.bf16.vlgmr.msra.gmra.mxu0 %vm539_vm1, %v2858_v21 }
 0xe0a   :  { %v6772_v0 = vpop.eup %5878  ;;  %5386 = vmatpush3.bf16.xpose.msra.mxu0 %v2975_v44  ;;  %5387 = vmatprep.mubr.msk.bf16.mxu0 %vm6235_vm0, %v6233_v4 }
 0xe0b   :  { %v2696_v2 = vpack.c.bf16 %v6772_v0, %v6772_v0  ;;  %5397 = vmatprep.subr.bf16.mxu0 %v6233_v4 }
 0xe0c   :  { %v3200_v18 = vpop.permute.xlu1 %3199 }
 0xe0d   :  { %5358 = vmatmul.mubr.msk.bf16.vlgmr.msra.gmra.mxu1 %vm586_vm3, %v2696_v2 }
 0xe0e   :  { %5362 = vmatpush3.bf16.xpose.msra.mxu1 %v2754_v6  ;;  %5363 = vmatprep.mubr.msk.bf16.mxu1 %vm6235_vm0, %v6233_v4 }
 0xe0f   :  { %5367 = vmatprep.subr.bf16.mxu1 %v6233_v4 }
 0xe10   :  { %v3310_v22 = vpop.permute.xlu1 %3309 }
 0xe11   :  { %5388 = vmatmul.mubr.msk.bf16.vlgmr.msra.gmra.mxu0 %vm539_vm1, %v2968_v7 }
 0xe12   :  { %5398 = vmatpush3.bf16.xpose.msra.mxu0 %v3098_v38  ;;  %5399 = vmatprep.mubr.msk.bf16.mxu0 %vm6235_vm0, %v6233_v4 }
 0xe13   :  { %5409 = vmatprep.subr.bf16.mxu0 %v6233_v4 }
 0xe14   :  { %v3420_v12 = vpop.permute.xlu1 %3419 }
 0xe15   :  { %5364 = vmatmul.mubr.msk.bf16.vlgmr.msra.gmra.mxu1 %vm539_vm1, %v2746_v63 }
 0xe16   :  { %5368 = vmatpush3.bf16.msra.mxu1 %v2814_v5  ;;  %5369 = vmatprep.mubr.msk.bf16.mxu1 %vm6235_vm0, %v6233_v4 }
 0xe17   :  { %5379 = vmatprep.subr.bf16.mxu1 %v6233_v4 }
 0xe19   :  { %5400 = vmatmul.mubr.msk.bf16.vlgmr.msra.gmra.mxu0 %vm539_vm1, %v3092_v20 }
 0xe1a   :  { %5410 = vmatpush3.bf16.xpose.msra.mxu0 %v3207_v16  ;;  %5411 = vmatprep.mubr.msk.bf16.mxu0 %vm6235_vm0, %v6233_v4  ;;  %v3151_v16 = vrot.slane %v6745_v43, 4 }
 0xe1b   :  { %5421 = vmatprep.subr.bf16.mxu0 %v6233_v4 }
 0xe21   :  { %5412 = vmatmul.mubr.msk.bf16.vlgmr.msra.gmra.mxu0 %vm539_vm1, %v3200_v18 }
 0xe22   :  { %5422 = vmatpush3.bf16.xpose.msra.mxu0 %v3317_v19  ;;  %5423 = vmatprep.mubr.msk.bf16.mxu0 %vm6235_vm0, %v6233_v4 }
 0xe23   :  { %5433 = vmatprep.subr.bf16.mxu0 %v6233_v4 }
 0xe29   :  { %5424 = vmatmul.mubr.msk.bf16.vlgmr.msra.gmra.mxu0 %vm539_vm1, %v3310_v22 }
 0xe2a   :  { %5434 = vmatpush3.bf16.xpose.msra.mxu0 %v3427_v23  ;;  %5435 = vmatprep.mubr.msk.bf16.mxu0 %vm6235_vm0, %v6233_v4 }
 0xe2b   :  { %5445 = vmatprep.subr.bf16.mxu0 %v6233_v4 }
 0xe31   :  { %5436 = vmatmul.mubr.msk.bf16.vlgmr.msra.gmra.mxu0 %vm539_vm1, %v3420_v12 }
 0xe32   :  { %5461 = vmatprep.mubr.msk.bf16.mxu0 %vm6235_vm0, %v6233_v4 }
 0xec9   :  { %v2901_v14 = vpop.f32.mrf.mxu0 }
 0xeca   :  { %v6813_v25 = vadd.f32 %v2901_v14, %v6477_v29 }
 0xecb   :  { %v5377_v26 = vpop.f32.mrf.mxu0 }
 0xecc   :  { %v2907_v53 = vsel %vm586_vm3, %v6813_v25, -inf }
 0xecd   :  { %2908 = vmax.xlane.f32.xlu1 %v2907_v53  ;;  %v6817_v28 = vpop.f32.mrf.mxu1  ;;  %v2904_v30 = vpop.f32.mrf.mxu0 }
 0xecf   :  { %v5359_v33 = vpop.f32.mrf.mxu1  ;;  %v5378_v36 = vpop.f32.mrf.mxu0 }
 0xed1   :  { %v2740_v31 = vpop.f32.mrf.mxu1  ;;  %v3011_v37 = vpop.f32.mrf.mxu0 }
 0xed2   :  { %v3012_v32 = vadd.f32 %v3011_v37, %v6477_v29 }
 0xed3   :  { %v5360_v39 = vpop.f32.mrf.mxu1  ;;  %v5389_v40 = vpop.f32.mrf.mxu0 }
 0xed4   :  { %v3017_v50 = vsel %vm586_vm3, %v3012_v32, -inf }
 0xed5   :  { %3018 = vmax.xlane.f32.xlu0 %v3017_v50  ;;  %v2790_v41 = vpop.f32.mrf.mxu1  ;;  %v3014_v42 = vpop.f32.mrf.mxu0 }
 0xed6   :  { %v2791_v56 = vadd.f32 %v2790_v41, %v6477_v29  ;;  %v2692_v42 = vsel %vm586_vm3, %v6772_v0, 0.0  ;;  %v3156_v0 = vsel %vm601_vm2, %v3151_v16, 0 }
 0xed7   :  { %v5365_v45 = vpop.f32.mrf.mxu1  ;;  %v5390_v46 = vpop.f32.mrf.mxu0 }
 0xed8   :  { %v2796_v59 = vsel %vm586_vm3, %v2791_v56, -inf }
 0xed9   :  { %v2793_v47 = vpop.f32.mrf.mxu1  ;;  %v3134_v48 = vpop.f32.mrf.mxu0 }
 0xeda   :  { %v3135_v49 = vadd.f32 %v3134_v48, %v6533_v9 }
 0xedb   :  { %v5366_v52 = vpop.f32.mrf.mxu1  ;;  %v5401_v15 = vpop.f32.mrf.mxu0 }
 0xedc   :  { %v3140_v57 = vsel %vm586_vm3, %v3135_v49, -inf }
 0xedd   :  { %3141 = vmax.xlane.f32.xlu0 %v3140_v57  ;;  %v3137_v20 = vpop.f32.mrf.mxu0 }
 0xede   :  { %2918 = vrot.lane.b32.xlu1 %v6745_v43, %s7039_s8 }
 0xedf   :  { %v5402_v58 = vpop.f32.mrf.mxu0 }
 0xee1   :  { %v3243_v34 = vpop.f32.mrf.mxu0  ;;  %2797 = vmax.xlane.f32.xlu0 %v2796_v59 }
 0xee2   :  { %v3244_v3 = vadd.f32 %v3243_v34, %v6533_v9 }
 0xee3   :  { %v5413_v60 = vpop.f32.mrf.mxu0 }
 0xee4   :  { %v3249_v7 = vsel %vm586_vm3, %v3244_v3, -inf }
 0xee5   :  { %v3246_v62 = vpop.f32.mrf.mxu0 }
 0xee7   :  { %v5414_v63 = vpop.f32.mrf.mxu0 }
 0xee9   :  { %v3353_v51 = vpop.f32.mrf.mxu0 }
 0xeea   :  { %v6831_v6 = vadd.f32 %v3353_v51, %v6533_v9 }
 0xeeb   :  { %v5425_v17 = vpop.f32.mrf.mxu0 }
 0xeec   :  { %v3359_v38 = vsel %vm586_vm3, %v6831_v6, -inf }
 0xeed   :  { %v3356_v35 = vpop.f32.mrf.mxu0 }
 0xeef   :  { %v5426_v24 = vpop.f32.mrf.mxu0 }
 0xef1   :  { %v3463_v29 = vpop.f32.mrf.mxu0 }
 0xef2   :  { %v6837_v10 = vadd.f32 %v3463_v29, %v6533_v9 }
 0xef3   :  { %v5437_v21 = vpop.f32.mrf.mxu0 }
 0xef4   :  { %v3469_v5 = vsel %vm586_vm3, %v6837_v10, -inf }
 0xef5   :  { %v3466_v44 = vpop.f32.mrf.mxu0 }
 0xef7   :  { %v5438_v2 = vpop.f32.mrf.mxu0  ;;  %3028 = vrot.lane.b32.xlu0 %v6745_v43, %s6237_s1 }
 0xf02   :  { %3250 = vmax.xlane.f32.xlu1 %v3249_v7 }
 0xf06   :  { %3360 = vmax.xlane.f32.xlu1 %v3359_v38 }
 0xf16   :  { %3470 = vmax.xlane.f32.xlu0 %v3469_v5 }
 0xf17   :  { %3370 = vrot.lane.b32.xlu1 %v3151_v16, %s7039_s8 }
 0xf1b   :  { %3480 = vrot.lane.b32.xlu1 %v3151_v16, %s6237_s1 }
 0xf2c   :  { %3260 = vrot.lane.b32.xlu0 %v3151_v16, %s6236_s23 }
 0xf56   :  { %v2909_v23 = vpop.xlane.xlu1 %2908 }
 0xf57   :  { %v2910_v9 = vsub.f32 %v6813_v25, %v2909_v23 }
 0xf59   :  { %v2911_v30 = vmul.f32 1.442695, %v2910_v9 }
 0xf5a   :  { %v2919_v33 = vpop.permute.xlu1 %2918 }
 0xf5e   :  { %v3019_v18 = vpop.xlane.xlu0 %3018 }
 0xf5f   :  { %v3020_v22 = vsub.f32 %v3012_v32, %v3019_v18  ;;  %v2924_v32 = vsel %vm601_vm2, %v2919_v33, 0  ;;  %v5714_v18 = vld [vmem:[#allocation11 + $0x78] sm:$0xff]  }
 0xf60   :  { %5446 = vmatpush3.bf16.msra.mxu0 %v5714_v18 }
 0xf61   :  { %v3021_v26 = vmul.f32 1.442695, %v3020_v22  ;;  %5447 = vmatprep.subr.bf16.mxu0 %v6233_v4  ;;  %v5716_v22 = vld [vmem:[#allocation11 + $0x68] sm:$0xff]  }
 0xf66   :  { %v3142_v19 = vpop.xlane.xlu0 %3141 }
 0xf67   :  { %v3143_v36 = vsub.f32 %v3135_v49, %v3142_v19  ;;  %v5715_v19 = vld [vmem:[#allocation11 + $0x70] sm:$0xff]  }
 0xf68   :  { %5448 = vmatpush3.bf16.msra.mxu0 %v5715_v19 }
 0xf69   :  { %v3144_v25 = vmul.f32 1.442695, %v3143_v36  ;;  %5449 = vmatprep.subr.bf16.mxu0 %v6233_v4 }
 0xf6a   :  { %v2798_v12 = vpop.xlane.xlu0 %2797 }
 0xf6b   :  { %v2799_v14 = vsub.f32 %v2791_v56, %v2798_v12 }
 0xf6c   :  { %5450 = vmatpush3.bf16.msra.mxu0 %v5716_v22 }
 0xf6d   :  { %v2800_v53 = vmul.f32 1.442695, %v2799_v14  ;;  %5451 = vmatprep.subr.bf16.mxu0 %v6233_v4 }
 0xf6e   :  { %v3029_v41 = vpop.permute.xlu0 %3028 }
 0xf6f   :  { %5880 = vpow2.f32 %v2800_v53  ;;  %v3034_v46 = vsel %vm601_vm2, %v3029_v41, 0 }
 0xf70   :  { %5882 = vpow2.f32 %v3021_v26 }
 0xf71   :  { %5884 = vpow2.f32 %v2911_v30 }
 0xf72   :  { %5886 = vpow2.f32 %v3144_v25 }
 0xf7c   :  { %v5881_v43 = vpop.eup %5880 }
 0xf7d   :  { %v2802_v31 = vsel %vm586_vm3, %v5881_v43, 0.0  ;;  %v2806_v37 = vpack.c.bf16 %v5881_v43, %v5881_v43  ;;  %v5883_v39 = vpop.eup %5882 }
 0xf7e   :  { %2803 = vadd.xlane.f32.xlu1 %v2802_v31  ;;  %v3023_v40 = vsel %vm586_vm3, %v5883_v39, 0.0  ;;  %v5885_v50 = vpop.eup %5884  ;;  %v3027_v49 = vpack.c.bf16 %v5883_v39, %v5883_v39 }
 0xf7f   :  { %5370 = vmatmul.mubr.msk.bf16.vlgmr.msra.gmra.mxu1 %vm586_vm3, %v2806_v37  ;;  %v2917_v45 = vpack.c.bf16 %v5885_v50, %v5885_v50  ;;  %v5887_v57 = vpop.eup %5886  ;;  %v2913_v51 = vsel %vm586_vm3, %v5885_v50, 0.0 }
 0xf80   :  { %5380 = vmatpush3.bf16.msra.mxu1 %v2924_v32  ;;  %5381 = vmatprep.mubr.msk.bf16.mxu1 %vm6235_vm0, %v6233_v4  ;;  %v3150_v58 = vpack.c.bf16 %v5887_v57, %v5887_v57  ;;  %v3146_v5 = vsel %vm586_vm3, %v5887_v57, 0.0 }
 0xf81   :  { %5391 = vmatprep.subr.bf16.mxu1 %v6233_v4 }
 0xf82   :  { %3024 = vadd.xlane.f32.xlu1 %v3023_v40 }
 0xf86   :  { %2693 = vadd.xlane.f32.xlu1 %v2692_v42 }
 0xf87   :  { %5382 = vmatmul.mubr.msk.bf16.vlgmr.msra.gmra.mxu1 %vm586_vm3, %v2917_v45 }
 0xf88   :  { %5392 = vmatpush3.bf16.msra.mxu1 %v3034_v46  ;;  %5393 = vmatprep.mubr.msk.bf16.mxu1 %vm6235_vm0, %v6233_v4  ;;  %v5717_v46 = vld [vmem:[#allocation11 + $0x60] sm:$0xff]  }
 0xf89   :  { %5403 = vmatprep.subr.bf16.mxu1 %v6233_v4  ;;  %5452 = vmatpush3.bf16.msra.mxu0 %v5717_v46 }
 0xf8a   :  { %5453 = vmatprep.subr.bf16.mxu0 %v6233_v4 }
 0xf8b   :  { %v3251_v47 = vpop.xlane.xlu1 %3250 }
 0xf8c   :  { %v3252_v48 = vsub.f32 %v3244_v3, %v3251_v47  ;;  %v5718_v47 = vld [vmem:[#allocation11 + $0x58] sm:$0xff]  }
 0xf8d   :  { %5454 = vmatpush3.bf16.msra.mxu0 %v5718_v47 }
 0xf8e   :  { %v3253_v52 = vmul.f32 1.442695, %v3252_v48  ;;  %5455 = vmatprep.subr.bf16.mxu0 %v6233_v4 }
 0xf8f   :  { %v3361_v15 = vpop.xlane.xlu1 %3360  ;;  %5394 = vmatmul.mubr.msk.bf16.vlgmr.msra.gmra.mxu1 %vm586_vm3, %v3027_v49 }
 0xf90   :  { %5888 = vpow2.f32 %v3253_v52  ;;  %v3362_v56 = vsub.f32 %v6831_v6, %v3361_v15  ;;  %5404 = vmatpush3.bf16.msra.mxu1 %v3156_v0  ;;  %5405 = vmatprep.mubr.msk.bf16.mxu1 %vm6235_vm0, %v6233_v4 }
 0xf91   :  { %5415 = vmatprep.subr.bf16.mxu1 %v6233_v4 }
 0xf92   :  { %v3363_v20 = vmul.f32 1.442695, %v3362_v56 }
 0xf93   :  { %v3371_v29 = vpop.permute.xlu1 %3370 }
 0xf94   :  { %5890 = vpow2.f32 %v3363_v20  ;;  %v3376_v2 = vsel %vm601_vm2, %v3371_v29, 0 }
 0xf97   :  { %5406 = vmatmul.mubr.msk.bf16.vlgmr.msra.gmra.mxu1 %vm586_vm3, %v3150_v58  ;;  %v3481_v3 = vpop.permute.xlu1 %3480  ;;  %v5719_v58 = vld [vmem:[#allocation11 + $0x50] sm:$0xff]  }
 0xf98   :  { %5417 = vmatprep.mubr.msk.bf16.mxu1 %vm6235_vm0, %v6233_v4  ;;  %v3486_v7 = vsel %vm601_vm2, %v3481_v3, 0  ;;  %5456 = vmatpush3.bf16.msra.mxu0 %v5719_v58  ;;  %v5722_v58 = vld [vmem:[#allocation16 + $0x1e0] ss:$16 sps:$4 sm:$0xff]  }
 0xf99   :  { %5457 = vmatprep.subr.bf16.mxu0 %v6233_v4 }
 0xf9d   :  { %v5889_v59 = vpop.eup %5888 }
 0xf9e   :  { %v3255_v34 = vsel %vm586_vm3, %v5889_v59, 0.0  ;;  %v3259_v44 = vpack.c.bf16 %v5889_v59, %v5889_v59 }
 0xf9f   :  { %3256 = vadd.xlane.f32.xlu0 %v3255_v34  ;;  %v3471_v60 = vpop.xlane.xlu0 %3470 }
 0xfa0   :  { %v3472_v62 = vsub.f32 %v6837_v10, %v3471_v60  ;;  %v5720_v60 = vld [vmem:[#allocation11 + $0x48] sm:$0xff]  }
 0xfa1   :  { %v5891_v17 = vpop.eup %5890  ;;  %5458 = vmatpush3.bf16.msra.mxu0 %v5720_v60 }
 0xfa2   :  { %v3473_v63 = vmul.f32 1.442695, %v3472_v62  ;;  %v3365_v21 = vsel %vm586_vm3, %v5891_v17, 0.0  ;;  %v3369_v6 = vpack.c.bf16 %v5891_v17, %v5891_v17  ;;  %5459 = vmatprep.subr.bf16.mxu0 %v6233_v4 }
 0xfa3   :  { %2914 = vadd.xlane.f32.xlu0 %v2913_v51  ;;  %v3261_v35 = vpop.permute.xlu0 %3260 }
 0xfa4   :  { %5892 = vpow2.f32 %v3473_v63  ;;  %v3266_v24 = vsel %vm601_vm2, %v3261_v35, 0 }
 0xfa5   :  { %5416 = vmatpush3.bf16.msra.mxu1 %v3266_v24 }
 0xfa6   :  { %5427 = vmatprep.subr.bf16.mxu1 %v6233_v4 }
 0xfa7   :  { %3366 = vadd.xlane.f32.xlu0 %v3365_v21 }
 0xfa8   :  { %5418 = vmatmul.mubr.msk.bf16.vlgmr.msra.gmra.mxu1 %vm586_vm3, %v3259_v44  ;;  %v5721_v44 = vld [vmem:[#allocation11 + $0x40] sm:$0xff]  }
 0xfa9   :  { %5428 = vmatpush3.bf16.msra.mxu1 %v3376_v2  ;;  %5429 = vmatprep.mubr.msk.bf16.mxu1 %vm6235_vm0, %v6233_v4 }
 0xfaa   :  { %5439 = vmatprep.subr.bf16.mxu1 %v6233_v4  ;;  %5460 = vmatpush3.bf16.msra.mxu0 %v5721_v44  ;;  %v5733_v44 = vld [vmem:[#allocation16 + $0x1cc] ss:$16 sps:$4 sm:$0xff]  }
 0xfb0   :  { %5430 = vmatmul.mubr.msk.bf16.vlgmr.msra.gmra.mxu1 %vm586_vm3, %v3369_v6 }
 0xfb1   :  { %v5893_v38 = vpop.eup %5892  ;;  %5440 = vmatpush3.bf16.msra.mxu1 %v3486_v7  ;;  %5441 = vmatprep.mubr.msk.bf16.mxu1 %vm6235_vm0, %v6233_v4 }
 0xfb2   :  { %v3475_v10 = vsel %vm586_vm3, %v5893_v38, 0.0  ;;  %v3479_v16 = vpack.c.bf16 %v5893_v38, %v5893_v38 }
 0xfb3   :  { %3476 = vadd.xlane.f32.xlu0 %v3475_v10 }
 0xfb7   :  { %3147 = vadd.xlane.f32.xlu0 %v3146_v5 }
 0xfb8   :  { %5442 = vmatmul.mubr.msk.bf16.vlgmr.msra.gmra.mxu1 %vm586_vm3, %v3479_v16 }
 0xfb9   :  { %3952 = vmatprep.mubr.bf16.mxu1 %v6234_v27 }
0x1007   :  { %v2804_v32 = vpop.xlane.xlu1 %2803 }
0x1008   :  { %5894 = vrcp.f32 %v2804_v32 }
0x100b   :  { %v3025_v49 = vpop.xlane.xlu1 %3024 }
0x1015   :  { %v5895_v48 = vpop.eup %5894 }
0x1028   :  { %v3257_v37 = vpop.xlane.xlu0 %3256 }
0x1029   :  { %5896 = vrcp.f32 %v3257_v37 }
0x102c   :  { %v2915_v50 = vpop.xlane.xlu0 %2914 }
0x102d   :  { %5898 = vrcp.f32 %v2915_v50 }
0x1030   :  { %v3367_v45 = vpop.xlane.xlu0 %3366 }
0x1031   :  { %5900 = vrcp.f32 %v3367_v45 }
0x1032   :  { %5902 = vrcp.f32 %v3025_v49 }
0x1036   :  { %v5897_v52 = vpop.eup %5896 }
0x103a   :  { %v5899_v63 = vpop.eup %5898 }
0x103c   :  { %v3477_v15 = vpop.xlane.xlu0 %3476 }
0x103d   :  { %5904 = vrcp.f32 %v3477_v15 }
0x103e   :  { %v5901_v51 = vpop.eup %5900 }
0x103f   :  { %v2850_v23 = vpop.f32.mrf.mxu1  ;;  %v5903_v6 = vpop.eup %5902 }
0x1040   :  { %v2856_v56 = vmul.f32 %v5895_v48, %v2850_v23  ;;  %v2694_v23 = vpop.xlane.xlu1 %2693 }
0x1041   :  { %v5371_v12 = vpop.f32.mrf.mxu1  ;;  %5906 = vrcp.f32 %v2694_v23  ;;  %v5749_v23 = vld [vmem:[#allocation16 + $0x168] ss:$16 sps:$4 sm:$0xff]  }
0x1042   :  { %v3148_v12 = vpop.xlane.xlu0 %3147 }
0x1043   :  { %v2853_v14 = vpop.f32.mrf.mxu1  ;;  %5908 = vrcp.f32 %v3148_v12  ;;  %v5754_v12 = vld [vmem:[#allocation16 + $0x144] ss:$16 sps:$4 sm:$0xff]  }
0x1045   :  { %v5372_v9 = vpop.f32.mrf.mxu1 }
0x1047   :  { %v2960_v26 = vpop.f32.mrf.mxu1 }
0x1048   :  { %v2966_v35 = vmul.f32 %v5899_v63, %v2960_v26 }
0x1049   :  { %v5383_v53 = vpop.f32.mrf.mxu1 }
0x104a   :  { %v5905_v7 = vpop.eup %5904 }
0x104b   :  { %v2963_v30 = vpop.f32.mrf.mxu1 }
0x104d   :  { %v5384_v43 = vpop.f32.mrf.mxu1 }
0x104e   :  { %v5907_v26 = vpop.eup %5906 }
0x104f   :  { %v3070_v33 = vpop.f32.mrf.mxu1  ;;  %v2743_v37 = vmul.f32 %v5907_v26, %v6817_v28  ;;  %v4887_v28 = vld [vmem:[%s7013_s7 + $0x1] ss:$0 sm:$0xff]  ;;  %v5755_v26 = vld [vmem:[#allocation16 + $0x148] ss:$16 sps:$4 sm:$0xff]  }
0x1050   :  { %v3076_v10 = vmul.f32 %v5903_v6, %v3070_v33  ;;  %v5909_v43 = vpop.eup %5908  ;;  %v5737_v6 = vld [vmem:[#allocation16 + $0x1a8] ss:$16 sps:$4 sm:$0xff]  }
0x1051   :  { %v5395_v36 = vpop.f32.mrf.mxu1 }
0x1053   :  { %v3073_v31 = vpop.f32.mrf.mxu1 }
0x1055   :  { %v5396_v39 = vpop.f32.mrf.mxu1 }
0x1057   :  { %v6891_v25 = vpop.f32.mrf.mxu1 }
0x1058   :  { %v3198_v33 = vmul.f32 %v5909_v43, %v6891_v25  ;;  %v5758_v43 = vld [vmem:[#allocation16 + $0x120] ss:$16 sps:$4 sm:$0xff]  }
0x1059   :  { %v5407_v40 = vpop.f32.mrf.mxu1 }
0x105b   :  { %v3195_v41 = vpop.f32.mrf.mxu1 }
0x105d   :  { %v5408_v42 = vpop.f32.mrf.mxu1 }
0x1068   :  { %v3302_v0 = vpop.f32.mrf.mxu1 }
0x1069   :  { %v3308_v57 = vmul.f32 %v5897_v52, %v3302_v0 }
0x106a   :  { %v5419_v20 = vpop.f32.mrf.mxu1 }
0x106b   :  { %v5547_v59 = vpack.i.bf16 %v3308_v57, %v2856_v56 }
0x106c   :  { %v3305_v34 = vpop.f32.mrf.mxu1 }
0x106d   :  { %5548 = vrot.lane.b32.xlu1 %v5547_v59, %s6237_s1  ;;  %v5724_v59 = vld [vmem:[#allocation16 + $0x1e4] ss:$16 sps:$4 sm:$0xff]   ;;  %v5725_v34 = vld [vmem:[#allocation16 + $0x1e8] ss:$16 sps:$4 sm:$0xff]  }
0x106e   :  { %v5420_v62 = vpop.f32.mrf.mxu1  ;;  %3920 = vmatprep.subr.bf16.mxu1 %v5724_v59  ;;  %v5772_v59 = vld [vmem:[#allocation17 + $0x138] sm:$0xff]  }
0x106f   :  { %3921 = vmatpush1.bf16.msra.mxu1 %v5722_v58  ;;  %v5771_v58 = vld [vmem:[#allocation17 + $0x1f8] sm:$0xff]  }
0x1070   :  { %v3412_v17 = vpop.f32.mrf.mxu1 }
0x1071   :  { %v3418_v24 = vmul.f32 %v5901_v51, %v3412_v17 }
0x1072   :  { %v5431_v29 = vpop.f32.mrf.mxu1 }
0x1073   :  { %v5552_v21 = vpack.i.bf16 %v3418_v24, %v2966_v35  ;;  %v5728_v24 = vld [vmem:[#allocation16 + $0x1c0] ss:$16 sps:$4 sm:$0xff]   ;;  %v5730_v29 = vld [vmem:[#allocation16 + $0x1c4] ss:$16 sps:$4 sm:$0xff]  }
0x1074   :  { %v3415_v2 = vpop.f32.mrf.mxu1  ;;  %3922 = vmatprep.subr.bf16.mxu1 %v5730_v29  ;;  %v5784_v29 = vld [vmem:[#allocation17 + $0x120] sm:$0xff]  }
0x1075   :  { %5553 = vrot.lane.b32.xlu0 %v5552_v21, %s7039_s8  ;;  %v5731_v21 = vld [vmem:[#allocation16 + $0x1c8] ss:$16 sps:$4 sm:$0xff]   ;;  %3923 = vmatpush1.bf16.msra.mxu1 %v5728_v24  ;;  %v5734_v2 = vld [vmem:[#allocation16 + $0x1a0] ss:$16 sps:$4 sm:$0xff]  }
0x1076   :  { %v5432_v3 = vpop.f32.mrf.mxu1  ;;  %v5783_v24 = vld [vmem:[#allocation17 + $0x1e0] sm:$0xff]  }
0x1077   :  { %v5736_v3 = vld [vmem:[#allocation16 + $0x1a4] ss:$16 sps:$4 sm:$0xff]  }
0x1078   :  { %v3522_v38 = vpop.f32.mrf.mxu1  ;;  %3924 = vmatprep.subr.bf16.mxu1 %v5736_v3  ;;  %v5788_v3 = vld [vmem:[#allocation17 + $0x118] sm:$0xff]  }
0x1079   :  { %v3528_v5 = vmul.f32 %v5905_v7, %v3522_v38  ;;  %v5739_v7 = vld [vmem:[#allocation16 + $0x1ac] ss:$16 sps:$4 sm:$0xff]   ;;  %v5742_v38 = vld [vmem:[#allocation16 + $0x184] ss:$16 sps:$4 sm:$0xff]   ;;  %3925 = vmatpush1.bf16.msra.mxu1 %v5734_v2 }
0x107a   :  { %v5443_v16 = vpop.f32.mrf.mxu1  ;;  %3926 = vmatprep.subr.bf16.mxu1 %v5742_v38  ;;  %v5787_v2 = vld [vmem:[#allocation17 + $0x1d8] sm:$0xff]   ;;  %v5791_v38 = vld [vmem:[#allocation17 + $0x1d0] sm:$0xff]  }
0x107b   :  { %v5557_v18 = vpack.i.bf16 %v3528_v5, %v3076_v10  ;;  %v5745_v10 = vld [vmem:[#allocation16 + $0x18c] ss:$16 sps:$4 sm:$0xff]   ;;  %v5740_v5 = vld [vmem:[#allocation16 + $0x180] ss:$16 sps:$4 sm:$0xff]   ;;  %v5743_v16 = vld [vmem:[#allocation16 + $0x188] ss:$16 sps:$4 sm:$0xff]  }
0x107c   :  { %v3525_v19 = vpop.f32.mrf.mxu1 }
0x107d   :  { %5558 = vrot.lane.b32.xlu1 %v5557_v18, %s6236_s23  ;;  %v5748_v18 = vld [vmem:[#allocation16 + $0x164] ss:$16 sps:$4 sm:$0xff]   ;;  %v5751_v19 = vld [vmem:[#allocation16 + $0x16c] ss:$16 sps:$4 sm:$0xff]   ;;  %3927 = vmatpush1.bf16.msra.mxu1 %v5740_v5  ;;  %s6238_s23 = smov [#allocation22]  }
0x107e   :  { %v5444_v22 = vpop.f32.mrf.mxu1  ;;  %3928 = vmatprep.subr.bf16.mxu1 %v5748_v18  ;;  %v5793_v5 = vld [vmem:[#allocation17 + $0x190] sm:$0xff]   ;;  %v5795_v18 = vld [vmem:[#allocation17 + $0x1c8] sm:$0xff]   ;;  %s4710_s1 = sshll.u32 %s6238_s23, 4  ;;  %s4711_s1 = int_to_ptr.vmem [resolvable:$true] %s4710_s1 }
0x107f   :  { %v5746_v22 = vld [vmem:[#allocation16 + $0x160] ss:$16 sps:$4 sm:$0xff]   ;;  %p6181_p5 = scmp.lt.s32.totalorder %s4711_s1, %s4711_s1 }
0x1081   :  { %3929 = vmatpush1.bf16.msra.mxu1 %v5746_v22  ;;  %v5797_v22 = vld [vmem:[#allocation17 + $0x188] sm:$0xff]  }
0x1082   :  { %3930 = vmatprep.subr.bf16.mxu1 %v5754_v12  ;;  %v5799_v12 = vld [vmem:[#allocation17 + $0x1c0] sm:$0xff]  }
0x10df   :  { %v5549_v14 = vpop.permute.xlu1 %5548 }
0x10e0   :  { %v5551_v53 = vunpack.i.h.bf16 %v5549_v14  ;;  %v5550_v30 = vunpack.i.l.bf16 %v5549_v14  ;;  %v5757_v14 = vld [vmem:[#allocation16 + $0x14c] ss:$16 sps:$4 sm:$0xff]  }
0x10e2   :  { %v3541_v32 = vsel %vm539_vm1, %v3198_v33, %v5551_v53  ;;  %v3089_v40 = vsel %vm539_vm1, %v2743_v37, %v5550_v30  ;;  %v5760_v53 = vld [vmem:[#allocation16 + $0x124] ss:$16 sps:$4 sm:$0xff]   ;;  %v5763_v30 = vld [vmem:[#allocation16 + $0x12c] ss:$16 sps:$4 sm:$0xff]   ;;  %v5764_v37 = vld [vmem:[#allocation16 + $0x100] ss:$16 sps:$4 sm:$0xff]  }
0x10e3   :  { %v5769_v33 = vld [vmem:[#allocation16 + $0x10c] ss:$16 sps:$4 sm:$0xff]  }
0x10e7   :  { %v5554_v9 = vpop.permute.xlu0 %5553 }
0x10e8   :  { %v5556_v36 = vunpack.i.h.bf16 %v5554_v9  ;;  %v5555_v31 = vunpack.i.l.bf16 %v5554_v9  ;;  %v5752_v9 = vld [vmem:[#allocation16 + $0x140] ss:$16 sps:$4 sm:$0xff]  }
0x10e9   :  { %3931 = vmatpush1.bf16.msra.mxu1 %v5752_v9  ;;  %v5801_v9 = vld [vmem:[#allocation17 + $0x180] sm:$0xff]  }
0x10ea   :  { %v3542_v42 = vsel %vm992_vm4, %v3541_v32, %v5556_v36  ;;  %v3090_v45 = vsel %vm992_vm4, %v3089_v40, %v5555_v31  ;;  %3932 = vmatprep.subr.bf16.mxu1 %v5760_v53  ;;  %v5761_v36 = vld [vmem:[#allocation16 + $0x128] ss:$16 sps:$4 sm:$0xff]   ;;  %v5766_v31 = vld [vmem:[#allocation16 + $0x104] ss:$16 sps:$4 sm:$0xff]  }
0x10ed   :  { %3933 = vmatpush1.bf16.msra.mxu1 %v5758_v43 }
0x10ee   :  { %3934 = vmatprep.subr.bf16.mxu1 %v5766_v31 }
0x10ef   :  { %v5559_v39 = vpop.permute.xlu1 %5558 }
0x10f0   :  { %v5561_v50 = vunpack.i.h.bf16 %v5559_v39  ;;  %v5560_v41 = vunpack.i.l.bf16 %v5559_v39  ;;  %v5767_v39 = vld [vmem:[#allocation16 + $0x108] ss:$16 sps:$4 sm:$0xff]  }
0x10f1   :  { %3935 = vmatpush1.bf16.msra.mxu1 %v5764_v37 }
0x10f2   :  { %v3543_v46 = vsel %vm994_vm5, %v3542_v42, %v5561_v50  ;;  %v3091_v47 = vsel %vm994_vm5, %v3090_v45, %v5560_v41 }
0x10f3   :  { %v3563_v48 = vpack.c.bf16 %v3543_v46, %v3091_v47 }
0x10f5   :  { %5462 = vmatmul.mubr.bf16.vlgmr.msra.gmra.mxu0 %v3563_v48  ;;  %v4896_v48 = vld [vmem:[#allocation13 + $0x1] ss:$0 sm:$0xff] }
0x10f6   :  { %3995 = vmatprep.mubr.bf16.mxu0 %v6234_v27  ;;  %v5727_v27 = vld [vmem:[#allocation16 + $0x1ec] ss:$16 sps:$4 sm:$0xff]  }
0x10f7   :  { %3963 = vmatprep.subr.bf16.mxu0 %v5727_v27  ;;  %v5774_v27 = vld [vmem:[#allocation17 + $0x170] sm:$0xff]  }
0x10f8   :  { %3964 = vmatpush1.bf16.msra.mxu0 %v5725_v34  ;;  %v5773_v34 = vld [vmem:[#allocation17 + $0x1b8] sm:$0xff]  }
0x10f9   :  { %3965 = vmatprep.subr.bf16.mxu0 %v5733_v44  ;;  %v5786_v44 = vld [vmem:[#allocation17 + $0x158] sm:$0xff]  }
0x10fc   :  { %3966 = vmatpush1.bf16.msra.mxu0 %v5731_v21  ;;  %v5785_v21 = vld [vmem:[#allocation17 + $0x1a0] sm:$0xff]  }
0x10fd   :  { %3967 = vmatprep.subr.bf16.mxu0 %v5739_v7  ;;  %v5790_v7 = vld [vmem:[#allocation17 + $0x150] sm:$0xff]  }
0x1100   :  { %3968 = vmatpush1.bf16.msra.mxu0 %v5737_v6  ;;  %v5789_v6 = vld [vmem:[#allocation17 + $0x198] sm:$0xff]  }
0x1101   :  { %3969 = vmatprep.subr.bf16.mxu0 %v5745_v10  ;;  %v5792_v10 = vld [vmem:[#allocation17 + $0x110] sm:$0xff]  }
0x1104   :  { %3970 = vmatpush1.bf16.msra.mxu0 %v5743_v16  ;;  %v5794_v16 = vld [vmem:[#allocation17 + $0x148] sm:$0xff]  }
0x1105   :  { %3971 = vmatprep.subr.bf16.mxu0 %v5751_v19  ;;  %v5796_v19 = vld [vmem:[#allocation17 + $0x108] sm:$0xff]  }
0x1108   :  { %3972 = vmatpush1.bf16.msra.mxu0 %v5749_v23  ;;  %v5798_v23 = vld [vmem:[#allocation17 + $0x140] sm:$0xff]  }
0x1109   :  { %3973 = vmatprep.subr.bf16.mxu0 %v5757_v14  ;;  %v5800_v14 = vld [vmem:[#allocation17 + $0x100] sm:$0xff]  }
0x110c   :  { %3974 = vmatpush1.bf16.msra.mxu0 %v5755_v26  ;;  %v4898_v26 = vld [vmem:[%s7017_s11 + $0x4] sm:$0xf] }
0x110d   :  { %3975 = vmatprep.subr.bf16.mxu0 %v5763_v30  ;;  %v3743_v53 = vrot.slane %v4898_v26, %v6441_v61  ;;  %v3751_v30 = vrot.slane %v4898_v26, %v6445_v1  ;;  %v3747_v43 = vrot.slane %v4898_v26, %v6435_v55 }
0x1110   :  { %3976 = vmatpush1.bf16.msra.mxu0 %v5761_v36  ;;  %v3755_v36 = vrot.slane %v4898_v26, %v1656_v11 }
0x1111   :  { %3977 = vmatprep.subr.bf16.mxu0 %v5769_v33 }
0x1114   :  { %3978 = vmatpush1.bf16.msra.mxu0 %v5767_v39 }
0x1115   :  { %5153 = vmatprep.subr.bf16.mxu0 %v5771_v58 }
0x11b5   :  { %v3652_v25 = vpop.f32.mrf.mxu0 }
0x11b6   :  { %v3653_v49 = vadd.f32 %v4887_v28, %v3652_v25 }
0x11b7   :  { %v5463_v52 = vpop.f32.mrf.mxu0 }
0x11b8   :  { %v3659_v15 = vadd.f32 %v3653_v49, %v6726_v8  ;;  %v4897_v52 = vld [vmem:[#allocation14 + $0x1] ss:$0 sm:$0xff] }
0x11b9   :  { %v3655_v0 = vpop.f32.mrf.mxu0 }
0x11ba   :  { %v3656_v56 = vadd.f32 %v4887_v28, %v3655_v0  ;;  %3665 = vadd.xlane.f32.xlu1 %v3659_v15 }
0x11bb   :  { %v5464_v57 = vpop.f32.mrf.mxu0 }
0x11bc   :  { %v3660_v20 = vadd.f32 %v3656_v56, %v6728_v13 }
0x11be   :  { %3667 = vadd.xlane.f32.xlu0 %v3660_v20 }
0x1243   :  { %v3666_v60 = vpop.xlane.xlu1 %3665 }
0x1244   :  { %v3669_v62 = vmul.f32 0.0078125, %v3666_v60  ;;  %v5775_v60 = vld [vmem:[#allocation17 + $0x1f0] sm:$0xff]  }
0x1246   :  { %v6914_v63 = vsub.f32 %v3659_v15, %v3669_v62  ;;  %v5776_v62 = vld [vmem:[#allocation17 + $0x130] sm:$0xff]  }
0x1247   :  { %v3668_v8 = vpop.xlane.xlu0 %3667 }
0x1248   :  { %v3670_v51 = vmul.f32 0.0078125, %v3668_v8  ;;  %v3673_v17 = vmul.f32 %v6914_v63, %v6914_v63  ;;  %v5778_v8 = vld [vmem:[#allocation17 + $0x168] sm:$0xff]  }
0x124a   :  { %v6918_v35 = vsub.f32 %v3660_v20, %v3670_v51  ;;  %3675 = vadd.xlane.f32.xlu0 %v3673_v17  ;;  %v5770_v20 = vld [vmem:[#allocation17 + $0x178] sm:$0xff]   ;;  %v5779_v51 = vld [vmem:[#allocation17 + $0x1e8] sm:$0xff]  }
0x124b   :  { %5131 = vmatprep.subr.bf16.mxu1 %v5770_v20  ;;  %v5780_v17 = vld [vmem:[#allocation17 + $0x128] sm:$0xff]  }
0x124c   :  { %v3674_v13 = vmul.f32 %v6918_v35, %v6918_v35 }
0x124e   :  { %3677 = vadd.xlane.f32.xlu1 %v3674_v13  ;;  %v5782_v13 = vld [vmem:[#allocation17 + $0x160] sm:$0xff]  }
0x12d3   :  { %v3676_v32 = vpop.xlane.xlu0 %3675 }
0x12d4   :  { %v3679_v40 = vmul.f32 0.0078125, %v3676_v32 }
0x12d6   :  { %v3681_v50 = vadd.f32 1e-12, %v3679_v40 }
0x12d7   :  { %v3678_v41 = vpop.xlane.xlu1 %3677 }
0x12d8   :  { %5910 = vrsqrt.f32 %v3681_v50  ;;  %v3680_v42 = vmul.f32 0.0078125, %v3678_v41 }
0x12da   :  { %v3682_v45 = vadd.f32 1e-12, %v3680_v42 }
0x12dc   :  { %5912 = vrsqrt.f32 %v3682_v45 }
0x12e5   :  { %v5911_v46 = vpop.eup %5910 }
0x12e6   :  { %v3685_v47 = vmul.f32 %v5911_v46, %v6914_v63  ;;  %v5777_v63 = vld [vmem:[#allocation17 + $0x1b0] sm:$0xff]  }
0x12e8   :  { %v3693_v49 = vmul.f32 %v4896_v48, %v3685_v47 }
0x12e9   :  { %v5913_v28 = vpop.eup %5912 }
0x12ea   :  { %v3686_v25 = vmul.f32 %v5913_v28, %v6918_v35  ;;  %v6924_v0 = vadd.f32 %v4897_v52, %v3693_v49  ;;  %v5781_v35 = vld [vmem:[#allocation17 + $0x1a8] sm:$0xff]  }
0x12ec   :  { %v3694_v15 = vmul.f32 %v4896_v48, %v3686_v25 }
0x12ee   :  { %v6926_v56 = vadd.f32 %v4897_v52, %v3694_v15 }
0x12f0   :  { %v3738_v57 = vpack.c.bf16 %v6926_v56, %v6924_v0 }
0x12f2   :  { %3953 = vmatmul.mubr.bf16.vlgmr.msra.gmra.mxu1 %v3738_v57  ;;  %3996 = vmatmul.mubr.bf16.vlgmr.msra.gmra.mxu0 %v3738_v57 }
0x12f3   :  { %5132 = vmatpush3.bf16.msra.mxu1 %v5772_v59  ;;  %5154 = vmatpush3.bf16.msra.mxu0 %v5773_v34 }
0x12f4   :  { %5133 = vmatprep.subr.bf16.mxu1 %v5774_v27  ;;  %5155 = vmatprep.subr.bf16.mxu0 %v5775_v60 }
0x12f7   :  { %5134 = vmatpush3.bf16.msra.mxu1 %v5776_v62  ;;  %5156 = vmatpush3.bf16.msra.mxu0 %v5777_v63 }
0x12f8   :  { %5135 = vmatprep.subr.bf16.mxu1 %v5778_v8  ;;  %5157 = vmatprep.subr.bf16.mxu0 %v5779_v51 }
0x12fb   :  { %5136 = vmatpush3.bf16.msra.mxu1 %v5780_v17  ;;  %5158 = vmatpush3.bf16.msra.mxu0 %v5781_v35 }
0x12fc   :  { %5137 = vmatprep.subr.bf16.mxu1 %v5782_v13  ;;  %5159 = vmatprep.subr.bf16.mxu0 %v5783_v24 }
0x12ff   :  { %5138 = vmatpush3.bf16.msra.mxu1 %v5784_v29  ;;  %5160 = vmatpush3.bf16.msra.mxu0 %v5785_v21 }
0x1300   :  { %5139 = vmatprep.subr.bf16.mxu1 %v5786_v44  ;;  %5161 = vmatprep.subr.bf16.mxu0 %v5787_v2 }
0x1303   :  { %5140 = vmatpush3.bf16.msra.mxu1 %v5788_v3  ;;  %5162 = vmatpush3.bf16.msra.mxu0 %v5789_v6 }
0x1304   :  { %5141 = vmatprep.subr.bf16.mxu1 %v5790_v7  ;;  %5163 = vmatprep.subr.bf16.mxu0 %v5791_v38 }
0x1307   :  { %5142 = vmatpush3.bf16.msra.mxu1 %v5792_v10  ;;  %5164 = vmatpush3.bf16.msra.mxu0 %v5793_v5 }
0x1308   :  { %5143 = vmatprep.subr.bf16.mxu1 %v5794_v16  ;;  %5165 = vmatprep.subr.bf16.mxu0 %v5795_v18 }
0x130b   :  { %5144 = vmatpush3.bf16.msra.mxu1 %v5796_v19  ;;  %5166 = vmatpush3.bf16.msra.mxu0 %v5797_v22 }
0x130c   :  { %5145 = vmatprep.subr.bf16.mxu1 %v5798_v23  ;;  %5167 = vmatprep.subr.bf16.mxu0 %v5799_v12 }
0x130f   :  { %5146 = vmatpush3.bf16.msra.mxu1 %v5800_v14  ;;  %5168 = vmatpush3.bf16.msra.mxu0 %v5801_v9 }
0x1310   :  { %5465 = vmatprep.subr.bf16.mxu1 %v6233_v4  ;;  %5485 = vmatprep.subr.bf16.mxu0 %v6233_v4 }
0x13b2   :  { %v3954_v31 = vpop.f32.mrf.mxu1  ;;  %v3997_v33 = vpop.f32.mrf.mxu0 }
0x13b3   :  { %v6940_v37 = vadd.f32 %v3954_v31, %v3743_v53  ;;  %v6942_v39 = vadd.f32 %v3997_v33, %v3751_v30 }
0x13b4   :  { %v3956_v32 = vpop.f32.mrf.mxu1  ;;  %v3999_v40 = vpop.f32.mrf.mxu0 }
0x13b5   :  { %v4014_v50 = vmul.f32 0.044715, %v6940_v37  ;;  %v4016_v41 = vmul.f32 0.044715, %v6942_v39  ;;  %v3957_v61 = vadd.f32 %v3956_v32, %v3747_v43  ;;  %v6946_v42 = vadd.f32 %v3999_v40, %v3755_v36 }
0x13b6   :  { %v3958_v1 = vpop.f32.mrf.mxu1  ;;  %v4001_v55 = vpop.f32.mrf.mxu0  ;;  %v4006_v40 = vmul.f32 0.5, %v6940_v37 }
0x13b7   :  { %v4022_v54 = vmul.f32 %v4014_v50, %v6940_v37  ;;  %v4024_v11 = vmul.f32 %v4016_v41, %v6942_v39  ;;  %v4015_v45 = vmul.f32 0.044715, %v3957_v61  ;;  %v4017_v46 = vmul.f32 0.044715, %v6946_v42 }
0x13b8   :  { %v3959_v47 = vadd.f32 %v3958_v1, %v3743_v53  ;;  %v6951_v48 = vadd.f32 %v4001_v55, %v3751_v30  ;;  %v3960_v28 = vpop.f32.mrf.mxu1  ;;  %v4003_v25 = vpop.f32.mrf.mxu0  ;;  %v4007_v33 = vmul.f32 0.5, %v3957_v61 }
0x13b9   :  { %v4030_v49 = vmul.f32 %v4022_v54, %v6940_v37  ;;  %v4032_v52 = vmul.f32 %v4024_v11, %v6942_v39  ;;  %v4023_v15 = vmul.f32 %v4015_v45, %v3957_v61  ;;  %v4025_v57 = vmul.f32 %v4017_v46, %v6946_v42 }
0x13ba   :  { %v4018_v20 = vmul.f32 0.044715, %v3959_v47  ;;  %v4020_v58 = vmul.f32 0.044715, %v6951_v48  ;;  %v3961_v59 = vadd.f32 %v3960_v28, %v3747_v43  ;;  %v4004_v34 = vadd.f32 %v4003_v25, %v3755_v36 }
0x13bb   :  { %v4038_v27 = vadd.f32 %v4030_v49, %v6940_v37  ;;  %v4040_v60 = vadd.f32 %v4032_v52, %v6942_v39  ;;  %v4031_v62 = vmul.f32 %v4023_v15, %v3957_v61  ;;  %v4033_v63 = vmul.f32 %v4025_v57, %v6946_v42 }
0x13bc   :  { %v4026_v8 = vmul.f32 %v4018_v20, %v3959_v47  ;;  %v4028_v51 = vmul.f32 %v4020_v58, %v6951_v48  ;;  %v4019_v17 = vmul.f32 0.044715, %v3961_v59  ;;  %v4021_v35 = vmul.f32 0.044715, %v4004_v34 }
0x13bd   :  { %v4046_v13 = vmul.f32 0.7978846, %v4038_v27  ;;  %v4048_v24 = vmul.f32 0.7978846, %v4040_v60  ;;  %v4039_v29 = vadd.f32 %v4031_v62, %v3957_v61  ;;  %v4041_v7 = vadd.f32 %v4033_v63, %v6946_v42 }
0x13be   :  { %v4034_v21 = vmul.f32 %v4026_v8, %v3959_v47  ;;  %v4036_v44 = vmul.f32 %v4028_v51, %v6951_v48  ;;  %v4027_v2 = vmul.f32 %v4019_v17, %v3961_v59  ;;  %v4029_v3 = vmul.f32 %v4021_v35, %v4004_v34 }
0x13bf   :  { %v4047_v6 = vmul.f32 0.7978846, %v4039_v29  ;;  %5914 = vtanh.f32 %v4046_v13  ;;  %v4049_v18 = vmul.f32 0.7978846, %v4041_v7  ;;  %v4010_v55 = vmul.f32 0.5, %v3959_v47 }
0x13c0   :  { %v4042_v38 = vadd.f32 %v4034_v21, %v3959_v47  ;;  %v4044_v10 = vadd.f32 %v4036_v44, %v6951_v48  ;;  %v4035_v5 = vmul.f32 %v4027_v2, %v3961_v59  ;;  %5916 = vtanh.f32 %v4048_v24 }
0x13c1   :  { %v4037_v16 = vmul.f32 %v4029_v3, %v4004_v34  ;;  %5918 = vtanh.f32 %v4047_v6  ;;  %v4011_v46 = vmul.f32 0.5, %v3961_v59  ;;  %v4012_v25 = vmul.f32 0.5, %v6951_v48 }
0x13c2   :  { %v4050_v19 = vmul.f32 0.7978846, %v4042_v38  ;;  %v4052_v22 = vmul.f32 0.7978846, %v4044_v10  ;;  %v4043_v23 = vadd.f32 %v4035_v5, %v3961_v59  ;;  %5920 = vtanh.f32 %v4049_v18 }
0x13c3   :  { %v4045_v12 = vadd.f32 %v4037_v16, %v4004_v34  ;;  %v4009_v52 = vmul.f32 0.5, %v6946_v42  ;;  %v4013_v15 = vmul.f32 0.5, %v4004_v34  ;;  %v4008_v37 = vmul.f32 0.5, %v6942_v39  ;;  %v4932_v34 = vld [vmem:[%s7019_s13 + $0x1] ss:$0 sm:$0xff] }
0x13c4   :  { %5922 = vtanh.f32 %v4050_v19  ;;  %v4051_v14 = vmul.f32 0.7978846, %v4043_v23 }
0x13c5   :  { %5924 = vtanh.f32 %v4052_v22  ;;  %v4053_v9 = vmul.f32 0.7978846, %v4045_v12 }
0x13c6   :  { %5926 = vtanh.f32 %v4051_v14 }
0x13c7   :  { %5928 = vtanh.f32 %v4053_v9 }
0x13cc   :  { %v5915_v26 = vpop.eup %5914 }
0x13cd   :  { %v5917_v53 = vpop.eup %5916  ;;  %v4062_v54 = vadd.f32 1.0, %v5915_v26 }
0x13ce   :  { %v5919_v30 = vpop.eup %5918  ;;  %v4064_v49 = vadd.f32 1.0, %v5917_v53 }
0x13cf   :  { %v5921_v43 = vpop.eup %5920  ;;  %v4063_v32 = vadd.f32 1.0, %v5919_v30  ;;  %v4070_v62 = vmul.f32 %v4062_v54, %v4006_v40  ;;  %v5802_v30 = vld [vmem:[#allocation19 + $0x38] sm:$0xff]   ;;  %v5809_v40 = vld [vmem:[#allocation19] sm:$0xff]  }
0x13d0   :  { %v4065_v1 = vadd.f32 1.0, %v5921_v43  ;;  %v4072_v8 = vmul.f32 %v4064_v49, %v4008_v37  ;;  %v5805_v43 = vld [vmem:[#allocation19 + $0x20] sm:$0xff]  }
0x13d1   :  { %v5923_v36 = vpop.eup %5922  ;;  %v4071_v20 = vmul.f32 %v4063_v32, %v4007_v33  ;;  %v5808_v33 = vld [vmem:[#allocation19 + $0x8] sm:$0xff]   ;;  %v5810_v32 = vld [vmem:[#allocation20 + $0x38] sm:$0xff]  }
0x13d2   :  { %v5925_v31 = vpop.eup %5924  ;;  %v4066_v50 = vadd.f32 1.0, %v5923_v36  ;;  %v4073_v60 = vmul.f32 %v4065_v1, %v4009_v52  ;;  %v5806_v36 = vld [vmem:[#allocation19 + $0x18] sm:$0xff]   ;;  %v4967_v52 = vld [vmem:[%s7020_s14 + $0x1] ss:$0 sm:$0xff] }
0x13d3   :  { %v5927_v41 = vpop.eup %5926  ;;  %v4068_v11 = vadd.f32 1.0, %v5925_v31  ;;  %v5807_v31 = vld [vmem:[#allocation19 + $0x10] sm:$0xff]  }
0x13d4   :  { %v5929_v45 = vpop.eup %5928  ;;  %v4067_v28 = vadd.f32 1.0, %v5927_v41  ;;  %v4074_v61 = vmul.f32 %v4066_v50, %v4010_v55  ;;  %v5811_v50 = vld [vmem:[#allocation20 + $0x30] sm:$0xff]   ;;  %v5812_v41 = vld [vmem:[#allocation20 + $0x28] sm:$0xff]  }
0x13d5   :  { %v4069_v57 = vadd.f32 1.0, %v5929_v45  ;;  %v4076_v27 = vmul.f32 %v4068_v11, %v4012_v25 }
0x13d6   :  { %v4075_v58 = vmul.f32 %v4067_v28, %v4011_v46  ;;  %v4145_v51 = vpack.c.bf16 %v4074_v61, %v4070_v62  ;;  %v5813_v62 = vld [vmem:[#allocation20 + $0x20] sm:$0xff]  }
0x13d7   :  { %v4077_v47 = vmul.f32 %v4069_v57, %v4013_v15  ;;  %v4147_v48 = vpack.c.bf16 %v4076_v27, %v4072_v8  ;;  %v5815_v8 = vld [vmem:[#allocation20 + $0x10] sm:$0xff]  }
0x13d8   :  { %v4146_v63 = vpack.c.bf16 %v4075_v58, %v4071_v20  ;;  %v4968_v20 = vld [vmem:[%s7021_s15 + $0x1] ss:$0 sm:$0xff] }
0x13d9   :  { %v4148_v59 = vpack.c.bf16 %v4077_v47, %v4073_v60 }
0x13da   :  { %4379 = vmatprep.mubr.bf16.mxu1 %v4146_v63  ;;  %v5814_v63 = vld [vmem:[#allocation20 + $0x18] sm:$0xff]  }
0x13db   :  { %4420 = vmatprep.mubr.bf16.mxu0 %v4148_v59  ;;  %4380 = vmatmul.mubr.bf16.vlgmr.msra.gmra.mxu1 %v4145_v51  ;;  %v5816_v59 = vld [vmem:[#allocation20 + $0x8] sm:$0xff]   ;;  %v5817_v51 = vld [vmem:[#allocation20] sm:$0xff]  }
0x13dc   :  { %4421 = vmatmul.mubr.bf16.vlgmr.msra.gmra.mxu0 %v4147_v48  ;;  %5481 = vmatprep.mubr.msk.bf16.mxu1 %vm6235_vm0, %v6233_v4  ;;  %v4969_v48 = vld [vmem:[%s7023_s17] ss:$0 sm:$0xff]  ;;  %s6176_s17 = scalar_lea.vmem %s4711_s1, 32 }
0x13dd   :  { %5501 = vmatprep.mubr.msk.bf16.mxu0 %vm6235_vm0, %v6233_v4  ;;  %5466 = vmatpush3.bf16.msra.mxu1 %v5802_v30  ;;  %p6177_p4 = scmp.ne.s32.totalorder %s4711_s1, %s6176_s17  ;;  %p6182_p6 = scmp.lt.s32.totalorder %s6176_s17, %s6176_s17 }
0x13de   :  { %5467 = vmatprep.subr.bf16.mxu1 %v6233_v4  ;;  %5486 = vmatpush3.bf16.msra.mxu0 %v5810_v32 }
0x13df   :  { %5487 = vmatprep.subr.bf16.mxu0 %v6233_v4  ;;  %p6183_p7 = por %p6182_p6, %p6181_p5 }
0x13e1   :  { %p6184_p8 = pnand %p6183_p7, %p6177_p4 }
0x13e2   :  { %5488 = vmatpush3.bf16.msra.mxu0 %v5811_v50 }
0x13e3   :  { %5489 = vmatprep.subr.bf16.mxu0 %v6233_v4 }
0x13e6   :  { %5490 = vmatpush3.bf16.msra.mxu0 %v5812_v41 }
0x13e7   :  { %5491 = vmatprep.subr.bf16.mxu0 %v6233_v4 }
0x13ea   :  { %5492 = vmatpush3.bf16.msra.mxu0 %v5813_v62 }
0x13eb   :  { %5493 = vmatprep.subr.bf16.mxu0 %v6233_v4 }
0x13ee   :  { %5494 = vmatpush3.bf16.msra.mxu0 %v5814_v63 }
0x13ef   :  { %5495 = vmatprep.subr.bf16.mxu0 %v6233_v4 }
0x13f2   :  { %5496 = vmatpush3.bf16.msra.mxu0 %v5815_v8 }
0x13f3   :  { %5497 = vmatprep.subr.bf16.mxu0 %v6233_v4 }
0x13f6   :  { %5498 = vmatpush3.bf16.msra.mxu0 %v5816_v59 }
0x13f7   :  { %5499 = vmatprep.subr.bf16.mxu0 %v6233_v4 }
0x13fa   :  { %5500 = vmatpush3.bf16.msra.mxu0 %v5817_v51 }
0x149b   :  { %v5147_v39 = vpop.f32.mrf.mxu1 }
0x149c   :  { %v5169_v42 = vpop.f32.mrf.mxu0 }
0x149d   :  { %v5148_v17 = vpop.f32.mrf.mxu1 }
0x149e   :  { %v5149_v35 = vadd.f32 %v5148_v17, %v5147_v39  ;;  %v5170_v13 = vpop.f32.mrf.mxu0 }
0x149f   :  { %v5150_v24 = vpop.f32.mrf.mxu1  ;;  %v5171_v21 = vadd.f32 %v5170_v13, %v5169_v42 }
0x14a0   :  { %v4382_v29 = vadd.f32 %v5149_v35, %v4932_v34  ;;  %v5172_v44 = vpop.f32.mrf.mxu0 }
0x14a1   :  { %v5151_v2 = vpop.f32.mrf.mxu1 }
0x14a2   :  { %v4423_v3 = vadd.f32 %v5171_v21, %v4382_v29  ;;  %v5152_v6 = vadd.f32 %v5151_v2, %v5150_v24  ;;  %v5173_v7 = vpop.f32.mrf.mxu0  ;;  %v4978_v29 = vld [vmem:[%s7025_s19] ss:$0 sm:$0xff] }
0x14a3   :  { %v5174_v10 = vadd.f32 %v5173_v7, %v5172_v44 }
0x14a4   :  { %v4385_v38 = vadd.f32 %v5152_v6, %v4932_v34  ;;  %v4429_v5 = vadd.f32 %v4423_v3, %v6924_v0  ;;  %v5803_v0 = vld [vmem:[#allocation19 + $0x30] sm:$0xff]  }
0x14a5   :  { %5468 = vmatpush3.bf16.msra.mxu1 %v5803_v0 }
0x14a6   :  { %v4426_v16 = vadd.f32 %v5174_v10, %v4385_v38  ;;  %4435 = vadd.xlane.f32.xlu1 %v4429_v5  ;;  %5469 = vmatprep.subr.bf16.mxu1 %v6233_v4 }
0x14a8   :  { %v4430_v18 = vadd.f32 %v4426_v16, %v6926_v56  ;;  %v5804_v56 = vld [vmem:[#allocation19 + $0x28] sm:$0xff]  }
0x14a9   :  { %5470 = vmatpush3.bf16.msra.mxu1 %v5804_v56 }
0x14aa   :  { %4437 = vadd.xlane.f32.xlu0 %v4430_v18  ;;  %5471 = vmatprep.subr.bf16.mxu1 %v6233_v4 }
0x14ad   :  { %5472 = vmatpush3.bf16.msra.mxu1 %v5805_v43 }
0x14ae   :  { %5473 = vmatprep.subr.bf16.mxu1 %v6233_v4 }
0x14b1   :  { %5474 = vmatpush3.bf16.msra.mxu1 %v5806_v36 }
0x14b2   :  { %5475 = vmatprep.subr.bf16.mxu1 %v6233_v4 }
0x14b5   :  { %5476 = vmatpush3.bf16.msra.mxu1 %v5807_v31 }
0x14b6   :  { %5477 = vmatprep.subr.bf16.mxu1 %v6233_v4 }
0x14b9   :  { %5478 = vmatpush3.bf16.msra.mxu1 %v5808_v33 }
0x14ba   :  { %5479 = vmatprep.subr.bf16.mxu1 %v6233_v4 }
0x14bd   :  { %5480 = vmatpush3.bf16.msra.mxu1 %v5809_v40 }
0x152f   :  { %v4436_v19 = vpop.xlane.xlu1 %4435 }
0x1530   :  { %v4439_v22 = vmul.f32 0.0078125, %v4436_v19 }
0x1532   :  { %v4441_v23 = vsub.f32 %v4429_v5, %v4439_v22 }
0x1533   :  { %v4438_v12 = vpop.xlane.xlu0 %4437 }
0x1534   :  { %v4440_v14 = vmul.f32 0.0078125, %v4438_v12  ;;  %v4443_v9 = vmul.f32 %v4441_v23, %v4441_v23 }
0x1536   :  { %v4442_v26 = vsub.f32 %v4430_v18, %v4440_v14  ;;  %4445 = vadd.xlane.f32.xlu1 %v4443_v9 }
0x1538   :  { %v4444_v53 = vmul.f32 %v4442_v26, %v4442_v26 }
0x153a   :  { %4447 = vadd.xlane.f32.xlu0 %v4444_v53 }
0x15bf   :  { %v4446_v1 = vpop.xlane.xlu1 %4445 }
0x15c0   :  { %v4449_v55 = vmul.f32 0.0078125, %v4446_v1 }
0x15c2   :  { %v4451_v54 = vadd.f32 1e-12, %v4449_v55 }
0x15c3   :  { %v4448_v11 = vpop.xlane.xlu0 %4447 }
0x15c4   :  { %5930 = vrsqrt.f32 %v4451_v54  ;;  %v4450_v45 = vmul.f32 0.0078125, %v4448_v11 }
0x15c6   :  { %v4452_v46 = vadd.f32 1e-12, %v4450_v45 }
0x15c8   :  { %5932 = vrsqrt.f32 %v4452_v46 }
0x15d1   :  { %v5931_v28 = vpop.eup %5930 }
0x15d2   :  { %v4455_v25 = vmul.f32 %v5931_v28, %v4441_v23 }
0x15d4   :  { %v4463_v57 = vmul.f32 %v4967_v52, %v4455_v25 }
0x15d5   :  { %v5933_v49 = vpop.eup %5932 }
0x15d6   :  { %v4456_v15 = vmul.f32 %v5933_v49, %v4442_v26  ;;  %v4471_v37 = vadd.f32 %v4968_v20, %v4463_v57 }
0x15d8   :  { %v4464_v61 = vmul.f32 %v4967_v52, %v4456_v15 }
0x15da   :  { %v4472_v58 = vadd.f32 %v4968_v20, %v4464_v61 }
0x15dc   :  { %v4474_v27 = vrot.slane %v4472_v58, 7 }
0x15de   :  { %v4477_v60 = vsel %vm4476_vm6, %v4471_v37, %v4474_v27 }
0x15df   :  { %v4495_v47 = vpack.c.bf16 %v4477_v60, %v4477_v60 }
0x15e1   :  { %5482 = vmatmul.mubr.bf16.vlgmr.msra.gmra.mxu1 %v4495_v47 }
0x16a1   :  { %v4584_v39 = vpop.f32.mrf.mxu1 }
0x16a2   :  { %v4585_v42 = vadd.f32 %v4969_v48, %v4584_v39 }
0x16a3   :  { %v5483_v34 = vpop.f32.mrf.mxu1 }
0x16a4   :  { %5934 = vtanh.f32 %v4585_v42 }
0x16a5   :  { %v4587_v17 = vpop.f32.mrf.mxu1 }
0x16a7   :  { %v5484_v35 = vpop.f32.mrf.mxu1 }
0x16b1   :  { %v5935_v13 = vpop.eup %5934 }
0x16b2   :  { %v4608_v24 = vpack.c.bf16 %v5935_v13, %v5935_v13 }
0x16b4   :  { %5502 = vmatmul.mubr.bf16.vlgmr.msra.gmra.mxu0 %v4608_v24 }
0x1774   :  { %v4697_v4 = vpop.f32.mrf.mxu0 }
0x1775   :  { %v4698_v21 = vadd.f32 %v4978_v29, %v4697_v4 }
0x1776   :  { %v5503_v44 = vpop.f32.mrf.mxu0 }
0x1777   :  { %4703 = vst [vmem:[#allocation22] sm:$0x3] %v4698_v21 }
0x1778   :  { %v4700_v2 = vpop.f32.mrf.mxu0 }
0x1779   :  { %6187 = shalt.err (!%p6184_p8)
}
0x177a   :  { %4713 = dma.vmem_to_hbm [thread:$0]  %s4711_s1, 32, %s7026_s20, [#allocation4]   ;;  %v5504_v3 = vpop.f32.mrf.mxu0 }
0x177b   :  { %6210 = dma.done.wait [#allocation4], 32  }
0x177c   :  { %6211 = vsyncadd [#allocation4], 4294967264 }
0x177d   :  { %4717 = vsyncpa [#allocation3], 1 }
0x177e   :  { %4718 = vsyncpa [#allocation6], 1 }
0x177f   :  { %4719 = vsyncpa [#allocation9], 1 }
0x1780   :  { %4720 = vsyncpa [#allocation12], 1 }
0x1781   :  { %4721 = vsyncpa [#allocation15], 1 }
0x1782   :  { %4722 = vsyncpa [#allocation18], 1 }
0x1783   :  { %4723 = vsyncpa [#allocation21], 1 }
0x1784   :  { %4724 = vsyncpa [#allocation4], 1 }

</bundles_post_ra>
